<compile_context>
chip_gen: v5e
topology: v5e:2x2
jax: 0.10.0
libtpu: 0.0.40
codegen_flags: <defaults>
</compile_context>

<pallas_src>
import functools
import math

import jax
import jax.numpy as jnp
from jax import lax
from jax.experimental import pallas as pl
from jax.experimental.pallas import tpu as pltpu


_SQRT_2_OVER_PI = 0.7978845608028654


def _gelu_tanh(x):
    # TODO(synk): torch nn.GELU() defaults to the exact erf formulation; the tanh
    # approximation is used here (lowers cleanly on Mosaic), deviation < ~3e-4 abs.
    return 0.5 * x * (1.0 + jnp.tanh(_SQRT_2_OVER_PI * (x + 0.044715 * x * x * x)))


def _value_mlp_attention_kernel(q_ref, w1t_ref, b1_ref, w2_ref, b2_ref,
                                wr_ref, bv_ref, out_ref, *, compute_dtype):
    # q:(tb,Dq) bf16   w1t:(Dq,H) bf16   b1:(1,H) f32   w2:(1,H) bf16   b2:(1,) f32 SMEM
    # wr/bv/out:(1,tb) f32   (batch on the lane axis -> dense stores / DMAs)
    # Hidden layer on the MXU (bf16 operands, f32 accumulation); stays in vregs/VMEM.
    h = jnp.dot(q_ref[...], w1t_ref[...],
                preferred_element_type=jnp.float32) + b1_ref[...]          # (tb, H) f32
    g = _gelu_tanh(h.astype(compute_dtype))                                # VALU + EUP tanh
    # Second Linear (H -> 1), produced already transposed as a (1, tb) row:
    #   s = w2 (1,H) X g (tb,H), contracted over H (MXU, f32 accumulate) -> lane-dense.
    s = lax.dot_general(w2_ref[...], g.astype(w2_ref.dtype),
                        dimension_numbers=(((1,), (1,)), ((), ())),
                        preferred_element_type=jnp.float32)                # (1, tb) f32
    s = s + b2_ref[0]
    a = pl.reciprocal(1.0 + jnp.exp(-s), approx=False)                     # sigmoid
    out_ref[...] = (a * wr_ref[...] + (1.0 - a) * bv_ref[...]).astype(out_ref.dtype)


def _round_up(x, m):
    return (x + m - 1) // m * m


def _cdiv(a, b):
    return (a + b - 1) // b


def _default_compute_dtype():
    # bf16 elementwise math only pays off on chips with a bf16 VPU/EUP (v6e / v7x).
    try:
        kind = jax.devices()[0].device_kind.lower()
    except Exception:
        return jnp.float32
    if any(old in kind for old in ("v2", "v3", "v4", "v5")):
        return jnp.float32
    return jnp.bfloat16


def prepare_value_mlp_attention_params(params, matmul_dtype=jnp.bfloat16):
    """One-time parameter prep, hoisted out of the per-call path."""
    W1, b1, W2, b2 = params["W1"], params["b1"], params["W2"], params["b2"]
    H = W1.shape[0]
    return {
        "w1t": jnp.asarray(W1).T.astype(matmul_dtype),                # (Dq, H) pre-transposed
        "b1": jnp.asarray(b1).reshape(1, H).astype(jnp.float32),      # (1, H)
        "w2": jnp.asarray(W2).reshape(1, H).astype(matmul_dtype),     # (1, H)
        "b2": jnp.asarray(b2).reshape(1).astype(jnp.float32),         # (1,)  SMEM scalar
    }


def _choose_tiles(batch, block_b):
    """Pick (tile, padded_batch) respecting bf16 sublane (16) and lane (128) tiling."""
    b16 = _round_up(max(batch, 1), 16)             # bf16 query rows: multiple of 16
    if b16 < 256:
        return b16, b16                            # single grid step; block == full lanes
    # Multi-step: lane-dense (1, tb) blocks need tb % 128 == 0; force >= 2 steps so both
    # v7x TensorCores get work (one extra ~0.35us step is noise on v5e/v6e).
    n_steps = max(_cdiv(b16, block_b), 2)
    tb = _round_up(_cdiv(b16, n_steps), 128)
    n_steps = max(_cdiv(b16, tb), 2)
    return tb, tb * n_steps


def value_mlp_attention(prepared_params, query, weighted_results, board_val, *,
                        block_b=512, compute_dtype=None, matmul_dtype=jnp.bfloat16):
    """Pallas-backed equivalent of ValueMLPAttention.forward (V = 1 value head)."""
    p = prepared_params
    if "w1t" not in p:                             # accept raw torch-style params too
        p = prepare_value_mlp_attention_params(p, matmul_dtype)
    if compute_dtype is None:
        compute_dtype = _default_compute_dtype()

    B, Dq = query.shape
    H = p["w1t"].shape[1]
    assert weighted_results.shape in ((B,), (B, 1)), "value head expects (B,) or (B, 1)"
    assert board_val.shape == weighted_results.shape
    out_shape_orig = weighted_results.shape

    # Batch on the lane axis for the blend inputs / output (lane-dense stores & DMAs).
    wr = jnp.asarray(weighted_results).reshape(1, B).astype(jnp.float32)
    bv = jnp.asarray(board_val).reshape(1, B).astype(jnp.float32)
    q = query.astype(matmul_dtype)

    tb, Bp = _choose_tiles(B, block_b)
    if Bp != B:
        q = jnp.pad(q, ((0, Bp - B), (0, 0)))
        wr = jnp.pad(wr, ((0, 0), (0, Bp - B)))
        bv = jnp.pad(bv, ((0, 0), (0, Bp - B)))

    grid_spec = pltpu.PrefetchScalarGridSpec(
        num_scalar_prefetch=0,
        grid=(Bp // tb,),
        in_specs=[
            pl.BlockSpec((tb, Dq), lambda i: (i, 0)),            # query tile
            pl.BlockSpec((Dq, H), lambda i: (0, 0)),             # W1^T (grid-invariant)
            pl.BlockSpec((1, H), lambda i: (0, 0)),              # b1
            pl.BlockSpec((1, H), lambda i: (0, 0)),              # W2 row
            pl.BlockSpec(memory_space=pltpu.MemorySpace.SMEM),   # b2 scalar
            pl.BlockSpec((1, tb), lambda i: (0, i)),             # weighted_results (lanes)
            pl.BlockSpec((1, tb), lambda i: (0, i)),             # board_val (lanes)
        ],
        out_specs=pl.BlockSpec((1, tb), lambda i: (0, i)),
    )
    out = pl.pallas_call(
        functools.partial(_value_mlp_attention_kernel, compute_dtype=compute_dtype),
        out_shape=jax.ShapeDtypeStruct((1, Bp), jnp.float32),
        grid_spec=grid_spec,
        compiler_params=pltpu.CompilerParams(
            dimension_semantics=("parallel",)),                  # v7x: shard batch over 2 TCs
    )(q, p["w1t"], p["b1"], p["w2"], p["b2"], wr, bv)
    return out[0, :B].reshape(out_shape_orig)


def value_mlp_attention_reference(params, query, weighted_results, board_val, *,
                                  matmul_dtype=jnp.bfloat16, compute_dtype=jnp.float32):
    """Pure-JAX transcription (same dtype choices / formulas) for checking the kernel."""
    W1, b1, W2, b2 = params["W1"], params["b1"], params["W2"], params["b2"]
    h = jnp.dot(query.astype(matmul_dtype), W1.T.astype(matmul_dtype),
                preferred_element_type=jnp.float32) + b1[None, :]
    g = _gelu_tanh(h.astype(compute_dtype))
    s = jnp.dot(g.astype(matmul_dtype), W2.reshape(-1, 1).astype(matmul_dtype),
                preferred_element_type=jnp.float32) + b2.reshape(1, 1)
    a = 1.0 / (1.0 + jnp.exp(-s))                                # (B, 1)
    if weighted_results.ndim == 1:
        a = a[:, 0]
    return a * weighted_results + (1.0 - a) * board_val


if __name__ == "__main__":
    B, Dq, H = 256, 256, 512            # batch, query_dim, mlp hidden (fixed 512 in module)
    key = jax.random.PRNGKey(0)
    k1, k2, k3, k4, k5, k6, k7 = jax.random.split(key, 7)

    bound1 = 1.0 / math.sqrt(Dq)
    bound2 = 1.0 / math.sqrt(H)
    params = {
        "W1": jax.random.uniform(k1, (H, Dq), jnp.float32, -bound1, bound1),
        "b1": jax.random.uniform(k2, (H,), jnp.float32, -bound1, bound1),
        "W2": jax.random.uniform(k3, (1, H), jnp.float32, -bound2, bound2),
        "b2": jax.random.uniform(k4, (1,), jnp.float32, -bound2, bound2),
    }
    query = jax.random.normal(k5, (B, Dq), jnp.float32)
    weighted_results = jax.random.normal(k6, (B, 1), jnp.float32)
    board_val = jax.random.normal(k7, (B, 1), jnp.float32)

    compute_dtype = _default_compute_dtype()
    prepped = prepare_value_mlp_attention_params(params)   # one-time parameter prep

    # block_b=128 with B=256 -> grid=(2,): exercises the multi-step lane-dense pipeline.
    out = value_mlp_attention(prepped, query, weighted_results, board_val,
                              block_b=128, compute_dtype=compute_dtype)
    out = jax.block_until_ready(out)

    ref = value_mlp_attention_reference(params, query, weighted_results, board_val,
                                        compute_dtype=compute_dtype)
    assert out.shape == (B, 1), out.shape
    max_err = float(jnp.max(jnp.abs(out - ref)))
    # Tolerance covers per-op bf16 rounding differences between Mosaic and XLA fusions
    # when the GELU chain runs in bf16 (v6e/v7x); f32 path agrees to ~1e-5.
    assert jnp.allclose(out, ref, atol=1e-2, rtol=1e-2), f"mismatch vs reference: {max_err:e}"

    print("KERNEL_OK")
</pallas_src>

<mosaic_0001>
module attributes {stable_mosaic.version = 11 : i64} {
  func.func @_value_mlp_attention_kernel(%arg0: i32, %arg1: memref<128x256xbf16, #tpu.memory_space<vmem>>, %arg2: memref<256x512xbf16, #tpu.memory_space<vmem>>, %arg3: memref<1x512xf32, #tpu.memory_space<vmem>>, %arg4: memref<1x512xbf16, #tpu.memory_space<vmem>>, %arg5: memref<1xf32, #tpu.memory_space<smem>>, %arg6: memref<1x128xf32, #tpu.memory_space<vmem>>, %arg7: memref<1x128xf32, #tpu.memory_space<vmem>>, %arg8: memref<1x128xf32, #tpu.memory_space<vmem>>) attributes {dimension_semantics = [#tpu.dimension_semantics<parallel>], iteration_bounds = array<i64: 2>, scalar_prefetch = 0 : i64, scratch_operands = 0 : i64, tpu.core_type = #tpu.core_type<tc>, window_params = [{transform_indices = @transform_0, window_bounds = array<i64: 128, 256>}, {pipeline_mode = #tpu.pipeline_mode<synchronous>, transform_indices = @transform_1, window_bounds = array<i64: 256, 512>}, {pipeline_mode = #tpu.pipeline_mode<synchronous>, transform_indices = @transform_2, window_bounds = array<i64: 1, 512>}, {pipeline_mode = #tpu.pipeline_mode<synchronous>, transform_indices = @transform_3, window_bounds = array<i64: 1, 512>}, {transform_indices = @transform_4, window_bounds = array<i64: 1>}, {transform_indices = @transform_5, window_bounds = array<i64: 1, 128>}, {transform_indices = @transform_6, window_bounds = array<i64: 1, 128>}, {transform_indices = @transform_7, window_bounds = array<i64: 1, 128>}]} {
    %c0 = arith.constant 0 : index
    %c0_0 = arith.constant 0 : index
    %0 = vector.load %arg1[%c0, %c0_0] : memref<128x256xbf16, #tpu.memory_space<vmem>>, vector<128x256xbf16>
    %c0_1 = arith.constant 0 : index
    %c0_2 = arith.constant 0 : index
    %1 = vector.load %arg2[%c0_1, %c0_2] : memref<256x512xbf16, #tpu.memory_space<vmem>>, vector<256x512xbf16>
    %cst = arith.constant dense<0.000000e+00> : vector<128x512xf32>
    %2 = tpu.matmul %0, %1, %cst {dimension_numbers = #tpu.dot_dimension_numbers<[1], [0], [0], [1], [0, 0, 1, 1], [], []>} : vector<128x256xbf16>, vector<256x512xbf16>, vector<128x512xf32> -> vector<128x512xf32>
    %c0_3 = arith.constant 0 : index
    %c0_4 = arith.constant 0 : index
    %3 = vector.load %arg3[%c0_3, %c0_4] : memref<1x512xf32, #tpu.memory_space<vmem>>, vector<1x512xf32>
    %4 = vector.broadcast %3 : vector<1x512xf32> to vector<128x512xf32>
    %5 = arith.addf %2, %4 : vector<128x512xf32>
    %6 = arith.truncf %5 : vector<128x512xf32> to vector<128x512xbf16>
    %cst_5 = arith.constant 5.000000e-01 : bf16
    %7 = vector.broadcast %cst_5 : bf16 to vector<128x512xbf16>
    %8 = arith.mulf %7, %6 : vector<128x512xbf16>
    %cst_6 = arith.constant 4.467770e-02 : bf16
    %9 = vector.broadcast %cst_6 : bf16 to vector<128x512xbf16>
    %10 = arith.mulf %9, %6 : vector<128x512xbf16>
    %11 = arith.mulf %10, %6 : vector<128x512xbf16>
    %12 = arith.mulf %11, %6 : vector<128x512xbf16>
    %13 = arith.addf %6, %12 : vector<128x512xbf16>
    %cst_7 = arith.constant 7.968750e-01 : bf16
    %14 = vector.broadcast %cst_7 : bf16 to vector<128x512xbf16>
    %15 = arith.mulf %14, %13 : vector<128x512xbf16>
    %16 = math.tanh %15 : vector<128x512xbf16>
    %cst_8 = arith.constant 1.000000e+00 : bf16
    %17 = vector.broadcast %cst_8 : bf16 to vector<128x512xbf16>
    %18 = arith.addf %17, %16 : vector<128x512xbf16>
    %19 = arith.mulf %8, %18 : vector<128x512xbf16>
    %c0_9 = arith.constant 0 : index
    %c0_10 = arith.constant 0 : index
    %20 = vector.load %arg4[%c0_9, %c0_10] : memref<1x512xbf16, #tpu.memory_space<vmem>>, vector<1x512xbf16>
    %cst_11 = arith.constant dense<0.000000e+00> : vector<1x128xf32>
    %21 = tpu.matmul %20, %19, %cst_11 {dimension_numbers = #tpu.dot_dimension_numbers<[1], [1], [0], [0], [0, 0, 1, 0], [], []>} : vector<1x512xbf16>, vector<128x512xbf16>, vector<1x128xf32> -> vector<1x128xf32>
    %c0_12 = arith.constant 0 : index
    %22 = memref.load %arg5[%c0_12] : memref<1xf32, #tpu.memory_space<smem>>
    %23 = vector.broadcast %22 : f32 to vector<1x128xf32>
    %24 = arith.addf %21, %23 : vector<1x128xf32>
    %cst_13 = arith.constant 0.000000e+00 : f32
    %25 = vector.broadcast %cst_13 : f32 to vector<1x128xf32>
    %26 = arith.subf %25, %24 : vector<1x128xf32>
    %27 = math.exp %26 : vector<1x128xf32>
    %cst_14 = arith.constant 1.000000e+00 : f32
    %28 = vector.broadcast %cst_14 : f32 to vector<1x128xf32>
    %29 = arith.addf %28, %27 : vector<1x128xf32>
    %30 = tpu.reciprocal %29 : vector<1x128xf32> -> vector<1x128xf32>
    %c0_15 = arith.constant 0 : index
    %c0_16 = arith.constant 0 : index
    %31 = vector.load %arg6[%c0_15, %c0_16] : memref<1x128xf32, #tpu.memory_space<vmem>>, vector<1x128xf32>
    %32 = arith.mulf %30, %31 : vector<1x128xf32>
    %cst_17 = arith.constant 1.000000e+00 : f32
    %33 = vector.broadcast %cst_17 : f32 to vector<1x128xf32>
    %34 = arith.subf %33, %30 : vector<1x128xf32>
    %c0_18 = arith.constant 0 : index
    %c0_19 = arith.constant 0 : index
    %35 = vector.load %arg7[%c0_18, %c0_19] : memref<1x128xf32, #tpu.memory_space<vmem>>, vector<1x128xf32>
    %36 = arith.mulf %34, %35 : vector<1x128xf32>
    %37 = arith.addf %32, %36 : vector<1x128xf32>
    %c0_20 = arith.constant 0 : index
    %c0_21 = arith.constant 0 : index
    %38 = vector.load %arg8[%c0_20, %c0_21] : memref<1x128xf32, #tpu.memory_space<vmem>>, vector<1x128xf32>
    tpu.vector_store %arg8[%c0_20, %c0_21], %37 {strides = array<i32>} : memref<1x128xf32, #tpu.memory_space<vmem>>, vector<1x128xf32>,
    return
  }
  func.func @transform_0(%arg0: i32) -> (i32, i32) {
    %c0_i32 = arith.constant 0 : i32
    %c0_i32_0 = arith.constant 0 : i32
    return %arg0, %c0_i32 : i32, i32
  }
  func.func @transform_1(%arg0: i32) -> (i32, i32) {
    %c0_i32 = arith.constant 0 : i32
    %c0_i32_0 = arith.constant 0 : i32
    %c0_i32_1 = arith.constant 0 : i32
    return %c0_i32, %c0_i32_0 : i32, i32
  }
  func.func @transform_2(%arg0: i32) -> (i32, i32) {
    %c0_i32 = arith.constant 0 : i32
    %c0_i32_0 = arith.constant 0 : i32
    %c0_i32_1 = arith.constant 0 : i32
    return %c0_i32, %c0_i32_0 : i32, i32
  }
  func.func @transform_3(%arg0: i32) -> (i32, i32) {
    %c0_i32 = arith.constant 0 : i32
    %c0_i32_0 = arith.constant 0 : i32
    %c0_i32_1 = arith.constant 0 : i32
    return %c0_i32, %c0_i32_0 : i32, i32
  }
  func.func @transform_4(%arg0: i32) -> i32 {
    %c0_i32 = arith.constant 0 : i32
    %c0_i32_0 = arith.constant 0 : i32
    return %c0_i32 : i32
  }
  func.func @transform_5(%arg0: i32) -> (i32, i32) {
    %c0_i32 = arith.constant 0 : i32
    %c0_i32_0 = arith.constant 0 : i32
    return %c0_i32, %arg0 : i32, i32
  }
  func.func @transform_6(%arg0: i32) -> (i32, i32) {
    %c0_i32 = arith.constant 0 : i32
    %c0_i32_0 = arith.constant 0 : i32
    return %c0_i32, %arg0 : i32, i32
  }
  func.func @transform_7(%arg0: i32) -> (i32, i32) {
    %c0_i32 = arith.constant 0 : i32
    %c0_i32_0 = arith.constant 0 : i32
    return %c0_i32, %arg0 : i32, i32
  }
}

</mosaic_0001>

<bundles_post_ra>
// kernel: tpu_custom_call.1
= control target key start
LH: loop header
LB: loop body
LE: loop exit
PB: predicated region body
PF: predicated region fallthrough
CT: control target
= control target key end

     0   :  { %s5052_s0 = inlined_call_operand.hbm [shape: bf16[256,256], index: 0, kind: input, shape index: {}]   ;;  %s5053_s1 = inlined_call_operand.hbm [shape: bf16[256,512], index: 1, kind: input, shape index: {}]   ;;  %s5054_s2 = inlined_call_operand.hbm [shape: f32[1,512], index: 2, kind: input, shape index: {}]   ;;  %s5055_s3 = inlined_call_operand.vmem [shape: bf16[1,512], index: 3, kind: input, shape index: {}]   ;;  %s5056_s4 = inlined_call_operand.<no memory space> [shape: f32[1], index: 4, kind: input, shape index: {}]   ;;  %s5057_s5 = inlined_call_operand.hbm [shape: f32[1,256], index: 5, kind: input, shape index: {}]   ;;  %s5058_s6 = inlined_call_operand.vmem [shape: f32[1,256], index: 6, kind: input, shape index: {}]   ;;  %s5059_s7 = inlined_call_operand.hbm [shape: f32[1,256], index: 7, kind: output, shape index: {}]  }
   0x1   :  { %5096 = sst [smem:[#allocation65_spill]] %s5052_s0 }
   0x2   :  { %5097 = sst [smem:[#allocation66_spill]] %s5053_s1 }
   0x3   :  { %5098 = sst [smem:[#allocation67_spill]] %s5054_s2 }
   0x4   :  { %12 = sst [smem:[#allocation2]] %s5056_s4 }
   0x5   :  { %13 = vsyncpa [#allocation4], 0 }
   0x6   :  { %15 = vsyncpa [#allocation4 + $0x1], 0 }
   0x7   :  { %16 = vsyncpa [#allocation7], 0 }
   0x8   :  { %17 = vsyncpa [#allocation10], 0 }
   0x9   :  { %19 = vsyncpa [#allocation10 + $0x1], 0 }
   0xa   :  { %20 = vsyncpa [#allocation5], 0 }
   0xb   :  { %22 = vsyncpa [#allocation5 + $0x1], 0  ;;  %s3821_s26 = smov 0   ;;  %s3823_s27 = smov 0  }
   0xc   :  { %s3825_s28 = smov 0   ;;  %s3827_s29 = smov 0  }
   0xd LB: > { %s3842_s4 = sadd.s32 4294967295, %s3770_s29   ;;  %s2951_s30 = sadd.s32 4294967294, %s3770_s29   ;;  %s3770_s29 = sphi %s3827_s29, %s5225_s29   ;;  %s3766_s28 = sphi %s3825_s28, %s5224_s28   ;;  %s3762_s27 = sphi %s3823_s27, %s5223_s27   ;;  %s3758_s26 = sphi %s3821_s26, %s5222_s26  }
   0xe   : > { %p48_p0 = scmp.ne.s32.totalorder %s3762_s27, %s3758_s26  ;;  %p49_p1 = scmp.eq.s32.totalorder %s3842_s4, 0 }
   0xf   : > { %p208_p2 = scmp.eq.s32.totalorder %s3842_s4, 1  ;;  %p214_p3 = scmp.eq.s32.totalorder %s2951_s30, 1 }
  0x10   : > { %p3851_p4 = por %p49_p1, %p48_p0  ;;  %p2952_p5 = scmp.ge.s32.totalorder %s3770_s29, 1 }
  0x11   : > { %p3856_p6 = por %p214_p3, %p48_p0  ;;  %p221_p7 = scmp.lt.s32.totalorder %s3770_s29, 3 }
  0x12   : > { %s5101_s1 = sld [smem:[#allocation66_spill]]  ;;  %s3772_s14 = smov [#allocation6]  }
  0x13   : > { %p3864_p8 = pnand %p2952_p5, %p221_p7  ;;  %s234_s15 = sshll.u32 %s3772_s14, 4  ;;  %s235_s15 = int_to_ptr.vmem [resolvable:$true] %s234_s15 }
  0x14   : > { %s5103_s2 = sld [smem:[#allocation67_spill]]  ;;  %s3773_s19 = smov 256  }
  0x15   : > { %p3382_p9 = pneg %p3864_p8  ;;  %s3774_s20 = smov 16  }
  0x16   : > { %s3775_s21 = smov [#allocation8]   ;;  %s3877_s23 = sadd.s32 1, %s3770_s29  }
  0x17   : > { %p3383_p10 = pnand %p3382_p9, %p49_p1  ;;  %s249_s22 = sshll.u32 %s3775_s21, 4  ;;  %s250_s22 = int_to_ptr.vmem [resolvable:$true] %s249_s22 }
  0x18   : > { %s232_s12 = sshll.u32 %s5101_s1, 4  ;;  %s35_s24 = sadd.s32 1, %s3766_s28  ;;  %s233_s12 = int_to_ptr.hbm [resolvable:$true] %s232_s12 }
  0x19   : > { %3385 = dma.hbm_to_vmem [thread:$0]  (!%p3383_p10), %s233_s12, 8192, %s235_s15, [#allocation7], %s3773_s19, %s3773_s19, %s3774_s20  }
  0x1a   : > { %s247_s18 = sshll.u32 %s5103_s2, 4  ;;  %s32_s25 = ssub.s32 %s3770_s29, %s3877_s23  ;;  %s248_s18 = int_to_ptr.hbm [resolvable:$true] %s247_s18 }
  0x1b   : > { %3388 = dma.hbm_to_vmem [thread:$0]  (!%p3383_p10), %s248_s18, 64, %s250_s22, [#allocation7]  }
  0x1c   : > { %p42_p12 = scmp.ne.s32.totalorder %s3766_s28, %s3762_s27  ;;  %p33_p13 = scmp.eq.s32.totalorder %s32_s25, 0 }
  0x1d   : > { %p43_p0 = scmp.eq.s32.totalorder %s3770_s29, 0  ;;  %p3402_p5 = scmp.lt.s32.totalorder %s3770_s29, 2 }
  0x1e   : > { %p3887_p3 = por %p208_p2, %p42_p12  ;;  %s3896_s11 = sand.u32 1, %s3766_s28  }
  0x1f   : > { %s3893_s10 = scalar_select %p33_p13, %s3766_s28, %s35_s24  }
  0x20   : > { %p44_p7 = por %p43_p0, %p42_p12  ;;  %s2956_s12 = sshll.u32 %s3896_s11, 7 }
  0x21   : > { %5105 = sst [smem:[#allocation16_spill]] %s3893_s10  ;;  %s3287_s14 = sshll.u32 %s3770_s29, 7 }
  0x22   : > { %s5106_s0 = sld [smem:[#allocation65_spill]]  ;;  %s270_s18 = scalar_lea.vmem [#allocation3], %s2956_s12 }
  0x23   : > { %s279_s19 = sshll.u32 %s270_s18, 4  ;;  %p3903_p2 = pnand %p3402_p5, %p44_p7  ;;  %s280_s19 = int_to_ptr.vmem [resolvable:$true] %s279_s19 }
  0x24   : > { %s267_s22 = scalar_lea.sflag [#allocation4], %s3896_s11 }
  0x25   : > { %p3640_p10 = pneg %p3903_p2 }
  0x28   : > { %s276_s17 = scalar_lea.hbm %s5106_s0, %s3287_s14  ;;  %s3643_s15 = scalar_lea.hbm %s5106_s0, 256 }
  0x29   : > { %s277_s20 = sshll.u32 %s276_s17, 4  ;;  %s278_s20 = int_to_ptr.hbm [resolvable:$true] %s277_s20 }
  0x2a   : > { %s3636_s24 = sshra.s32 %s278_s20, 4  ;;  %s3637_s24 = int_to_ptr.hbm [resolvable:$true] %s3636_s24 }
  0x2b   : > { %s3638_s25 = scalar_lea.hbm %s3637_s24, 128  ;;  %p3644_p0 = scmp.lt.s32.totalorder %s3637_s24, %s5106_s0 }
  0x2c   : > { %p3639_p9 = scmp.ne.s32.totalorder %s3637_s24, %s3638_s25  ;;  %p3645_p5 = scmp.lt.s32.totalorder %s3643_s15, %s3638_s25 }
  0x2e   : > { %p3641_p12 = pnand %p3640_p10, %p3639_p9  ;;  %p3646_p7 = por %p3645_p5, %p3644_p0 }
  0x30   : > { %p3642_p13 = pneg %p3641_p12 }
  0x32   : > { %p3647_p11 = pnand %p3646_p7, %p3642_p13 }
  0x34   : > { %3650 = shalt.err (!%p3647_p11)
}
  0x35   : > { %s3776_s18 = smov 128   ;;  %s3777_s1 = smov 8  }
  0x36   : > { %3392 = dma.hbm_to_vmem [thread:$0]  (!%p3903_p2), %s278_s20, 2048, %s280_s19, %s267_s22, %s3776_s18, %s3776_s18, %s3777_s1  }
  0x37   : > { %s295_s14 = scalar_lea.hbm %s5057_s5, %s3770_s29  ;;  %s292_s16 = scalar_lea.vmem [#allocation9], %s3896_s11 }
  0x38   : > { %s297_s10 = sshll.u32 %s295_s14, 4  ;;  %s299_s24 = sshll.u32 %s292_s16, 4  ;;  %s298_s10 = int_to_ptr.hbm [resolvable:$true] %s297_s10  ;;  %s300_s24 = int_to_ptr.vmem [resolvable:$true] %s299_s24 }
  0x39   : > { %s290_s25 = scalar_lea.sflag [#allocation10], %s3896_s11  ;;  %s3666_s15 = sshra.s32 %s298_s10, 4  ;;  %s3667_s15 = int_to_ptr.hbm [resolvable:$true] %s3666_s15 }
  0x3a   : > { %s3668_s17 = scalar_lea.hbm %s3667_s15, 1  ;;  %s3673_s19 = scalar_lea.hbm %s5057_s5, 2 }
  0x3b   : > { %p3669_p11 = scmp.ne.s32.totalorder %s3667_s15, %s3668_s17  ;;  %p3674_p13 = scmp.lt.s32.totalorder %s3667_s15, %s5057_s5 }
  0x3c   : > { %p3675_p0 = scmp.lt.s32.totalorder %s3673_s19, %s3668_s17 }
  0x3d   : > { %p3671_p9 = pnand %p3669_p11, %p3640_p10 }
  0x3e   : > { %p3676_p5 = por %p3675_p0, %p3674_p13 }
  0x3f   : > { %p3672_p12 = pneg %p3671_p9 }
  0x41   : > { %p3677_p7 = pnand %p3676_p5, %p3672_p12 }
  0x43   : > { %3680 = shalt.err (!%p3677_p7)
}
  0x44   : > { %3395 = dma.hbm_to_vmem [thread:$0]  (!%p3903_p2), %s298_s10, 16, %s300_s24, %s290_s25  }
  0x45   : > { %314 = sbr.rel (%p3864_p8) target bundleno = 877 (0x36d), region = 48 }
  0x4a   : > { %s3941_s11 = sand.u32 1, %s3762_s27  }
  0x4b   : > { %s2961_s0 = sshll.u32 %s3941_s11, 7  ;;  %s317_s22 = scalar_lea.sflag [#allocation4], %s3941_s11 }
  0x4c   : > { %s3945_s18 = scalar_lea.vmem [#allocation3], %s2961_s0 }
  0x4d   : > { %3741 = dma.done.wait (%p3851_p4), %s317_s22, 2048  }
  0x4e   : > { %3743 = vsyncadd (%p3851_p4), %s317_s22, 4294965248 }
  0x4f   : > { %3745 = dma.done.wait (%p49_p1), [#allocation7], 8256  }
  0x50   : > { %3747 = vsyncadd (%p49_p1), [#allocation7], 4294959040  ;;  %s337_s13 = scalar_lea.sflag [#allocation10], %s3941_s11  ;;  %s339_s10 = scalar_lea.vmem [#allocation9], %s3941_s11 }
  0x51   : > { %3749 = dma.done.wait (%p3851_p4), %s337_s13, 16  }
  0x52   : > { %3751 = vsyncadd (%p3851_p4), %s337_s13, 4294967280  ;;  %v3142_v0 = vld [vmem:[#allocation6 + $0xe0] sm:$0xf]  ;;  %v3334_v1 = vld [vmem:[#allocation6 + $0xec] sm:$0xf0]  ;;  %s2736_s12 = sld [smem:[#allocation2]]  ;;  %s2834_s1 = scalar_lea.hbm %s5059_s7, %s3842_s4 }
  0x53   : > { %v3270_v2 = vld [vmem:[#allocation6 + $0x1e0] sm:$0xf]  ;;  %v3143_v3 = vor.u32 %v3334_v1, %v3142_v0  ;;  %v3366_v4 = vld [vmem:[#allocation6 + $0x1ec] sm:$0xf0]  ;;  %v3332_v5 = vld [vmem:[#allocation6 + $0xe4] sm:$0xf] }
  0x54   : > { %v3144_v6 = vld [vmem:[#allocation6 + $0xf0] sm:$0xf0]  ;;  %v3271_v7 = vor.u32 %v3366_v4, %v3270_v2  ;;  %v3364_v9 = vld [vmem:[#allocation6 + $0x1e4] sm:$0xf]  ;;  %v3126_v11 = vld [vmem:[#allocation6 + $0xc0] sm:$0xf] }
  0x55   : > { %v3147_v8 = vor.u32 %v3332_v5, %v3144_v6  ;;  %v3272_v10 = vld [vmem:[#allocation6 + $0x1f0] sm:$0xf0]  ;;  %871 = vmatpush.bf16.msra.mxu0 %v3143_v3  ;;  %v3330_v13 = vld [vmem:[#allocation6 + $0xcc] sm:$0xf0]  ;;  %v3254_v14 = vld [vmem:[#allocation6 + $0x1c0] sm:$0xf] }
  0x56   : > { %v3275_v12 = vor.u32 %v3364_v9, %v3272_v10  ;;  %v3362_v15 = vld [vmem:[#allocation6 + $0x1cc] sm:$0xf0]  ;;  %920 = vmatpush.bf16.msra.mxu1 %v3271_v7  ;;  %v3127_v16 = vor.u32 %v3330_v13, %v3126_v11  ;;  %v3328_v18 = vld [vmem:[#allocation6 + $0xc4] sm:$0xf]  ;;  %v3128_v19 = vld [vmem:[#allocation6 + $0xd0] sm:$0xf0] }
  0x57   : > { %969 = vmatpush.bf16.msra.mxu2 %v3147_v8  ;;  %v3255_v17 = vor.u32 %v3362_v15, %v3254_v14  ;;  %v3360_v20 = vld [vmem:[#allocation6 + $0x1c4] sm:$0xf]  ;;  %v3131_v21 = vor.u32 %v3328_v18, %v3128_v19  ;;  %v3256_v22 = vld [vmem:[#allocation6 + $0x1d0] sm:$0xf0]  ;;  %v3110_v23 = vld [vmem:[#allocation6 + $0xa0] sm:$0xf] }
  0x58   : > { %1018 = vmatpush.bf16.msra.mxu3 %v3275_v12  ;;  %v3326_v24 = vld [vmem:[#allocation6 + $0xac] sm:$0xf0]  ;;  %v3259_v25 = vor.u32 %v3360_v20, %v3256_v22  ;;  %v3238_v26 = vld [vmem:[#allocation6 + $0x1a0] sm:$0xf]  ;;  %v3324_v28 = vld [vmem:[#allocation6 + $0xa4] sm:$0xf] }
  0x59   : > { %v3358_v27 = vld [vmem:[#allocation6 + $0x1ac] sm:$0xf0]  ;;  %872 = vmatpush.bf16.msra.mxu0 %v3127_v16  ;;  %v3111_v29 = vor.u32 %v3326_v24, %v3110_v23  ;;  %v3112_v30 = vld [vmem:[#allocation6 + $0xb0] sm:$0xf0]  ;;  %v3356_v31 = vld [vmem:[#allocation6 + $0x1a4] sm:$0xf] }
  0x5a   : > { %v3240_v32 = vld [vmem:[#allocation6 + $0x1b0] sm:$0xf0]  ;;  %921 = vmatpush.bf16.msra.mxu1 %v3255_v17  ;;  %v3239_v33 = vor.u32 %v3358_v27, %v3238_v26  ;;  %v3115_v34 = vor.u32 %v3324_v28, %v3112_v30  ;;  %v3094_v35 = vld [vmem:[#allocation6 + $0x80] sm:$0xf]  ;;  %v3322_v36 = vld [vmem:[#allocation6 + $0x8c] sm:$0xf0] }
  0x5b   : > { %970 = vmatpush.bf16.msra.mxu2 %v3131_v21  ;;  %v3222_v37 = vld [vmem:[#allocation6 + $0x180] sm:$0xf]  ;;  %v3243_v38 = vor.u32 %v3356_v31, %v3240_v32  ;;  %v3354_v39 = vld [vmem:[#allocation6 + $0x18c] sm:$0xf0]  ;;  %v3320_v40 = vld [vmem:[#allocation6 + $0x84] sm:$0xf]  ;;  %v3095_v44 = vor.u32 %v3322_v36, %v3094_v35 }
  0x5c   : > { %1019 = vmatpush.bf16.msra.mxu3 %v3259_v25  ;;  %v3096_v41 = vld [vmem:[#allocation6 + $0x90] sm:$0xf0]  ;;  %v3352_v42 = vld [vmem:[#allocation6 + $0x184] sm:$0xf]  ;;  %v3223_v45 = vor.u32 %v3354_v39, %v3222_v37  ;;  %v3078_v47 = vld [vmem:[#allocation6 + $0x60] sm:$0xf] }
  0x5d   : > { %v3224_v43 = vld [vmem:[#allocation6 + $0x190] sm:$0xf0]  ;;  %873 = vmatpush.bf16.msra.mxu0 %v3111_v29  ;;  %v3099_v46 = vor.u32 %v3320_v40, %v3096_v41  ;;  %v3318_v48 = vld [vmem:[#allocation6 + $0x6c] sm:$0xf0]  ;;  %v3206_v49 = vld [vmem:[#allocation6 + $0x160] sm:$0xf] }
  0x5e   : > { %922 = vmatpush.bf16.msra.mxu1 %v3239_v33  ;;  %v3227_v50 = vor.u32 %v3352_v42, %v3224_v43  ;;  %v3350_v51 = vld [vmem:[#allocation6 + $0x16c] sm:$0xf0]  ;;  %v3316_v52 = vld [vmem:[#allocation6 + $0x64] sm:$0xf]  ;;  %v3080_v53 = vld [vmem:[#allocation6 + $0x70] sm:$0xf0]  ;;  %v3079_v56 = vor.u32 %v3318_v48, %v3078_v47 }
  0x5f   : > { %971 = vmatpush.bf16.msra.mxu2 %v3115_v34  ;;  %v3348_v54 = vld [vmem:[#allocation6 + $0x164] sm:$0xf]  ;;  %v3208_v55 = vld [vmem:[#allocation6 + $0x170] sm:$0xf0]  ;;  %v3207_v57 = vor.u32 %v3350_v51, %v3206_v49  ;;  %v3083_v58 = vor.u32 %v3316_v52, %v3080_v53  ;;  %v3062_v59 = vld [vmem:[#allocation6 + $0x40] sm:$0xf] }
  0x60   : > { %1020 = vmatpush.bf16.msra.mxu3 %v3243_v38  ;;  %v3314_v60 = vld [vmem:[#allocation6 + $0x4c] sm:$0xf0]  ;;  %v3190_v61 = vld [vmem:[#allocation6 + $0x140] sm:$0xf]  ;;  %v3211_v62 = vor.u32 %v3348_v54, %v3208_v55  ;;  %v3312_v0 = vld [vmem:[#allocation6 + $0x44] sm:$0xf] }
  0x61   : > { %874 = vmatpush.bf16.msra.mxu0 %v3095_v44  ;;  %v3346_v63 = vld [vmem:[#allocation6 + $0x14c] sm:$0xf0]  ;;  %v3064_v1 = vld [vmem:[#allocation6 + $0x50] sm:$0xf0]  ;;  %v3344_v2 = vld [vmem:[#allocation6 + $0x144] sm:$0xf]  ;;  %v3063_v4 = vor.u32 %v3314_v60, %v3062_v59 }
  0x62   : > { %923 = vmatpush.bf16.msra.mxu1 %v3223_v45  ;;  %v3192_v3 = vld [vmem:[#allocation6 + $0x150] sm:$0xf0]  ;;  %v3191_v5 = vor.u32 %v3346_v63, %v3190_v61  ;;  %v3067_v6 = vor.u32 %v3312_v0, %v3064_v1  ;;  %v3046_v7 = vld [vmem:[#allocation6 + $0x20] sm:$0xf]  ;;  %v3310_v8 = vld [vmem:[#allocation6 + $0x2c] sm:$0xf0] }
  0x63   : > { %972 = vmatpush.bf16.msra.mxu2 %v3099_v46  ;;  %v3174_v9 = vld [vmem:[#allocation6 + $0x120] sm:$0xf]  ;;  %v3195_v10 = vor.u32 %v3344_v2, %v3192_v3  ;;  %v3342_v11 = vld [vmem:[#allocation6 + $0x12c] sm:$0xf0]  ;;  %v3308_v12 = vld [vmem:[#allocation6 + $0x24] sm:$0xf]  ;;  %v3047_v16 = vor.u32 %v3310_v8, %v3046_v7 }
  0x64   : > { %1021 = vmatpush.bf16.msra.mxu3 %v3227_v50  ;;  %v3048_v13 = vld [vmem:[#allocation6 + $0x30] sm:$0xf0]  ;;  %v3340_v14 = vld [vmem:[#allocation6 + $0x124] sm:$0xf]  ;;  %v3175_v17 = vor.u32 %v3342_v11, %v3174_v9  ;;  %v3030_v19 = vld [vmem:[#allocation6] sm:$0xf] }
  0x65   : > { %875 = vmatpush.bf16.msra.mxu0 %v3079_v56  ;;  %v3176_v15 = vld [vmem:[#allocation6 + $0x130] sm:$0xf0]  ;;  %v3051_v18 = vor.u32 %v3308_v12, %v3048_v13  ;;  %v3306_v20 = vld [vmem:[#allocation6 + $0xc] sm:$0xf0]  ;;  %v3158_v21 = vld [vmem:[#allocation6 + $0x100] sm:$0xf] }
  0x66   : > { %924 = vmatpush.bf16.msra.mxu1 %v3207_v57  ;;  %v3179_v22 = vor.u32 %v3340_v14, %v3176_v15  ;;  %v3338_v23 = vld [vmem:[#allocation6 + $0x10c] sm:$0xf0]  ;;  %v3304_v24 = vld [vmem:[#allocation6 + $0x4] sm:$0xf]  ;;  %v3032_v25 = vld [vmem:[#allocation6 + $0x10] sm:$0xf0]  ;;  %v3031_v28 = vor.u32 %v3306_v20, %v3030_v19 }
  0x67   : > { %973 = vmatpush.bf16.msra.mxu2 %v3083_v58  ;;  %v3336_v26 = vld [vmem:[#allocation6 + $0x104] sm:$0xf]  ;;  %v3160_v27 = vld [vmem:[#allocation6 + $0x110] sm:$0xf0]  ;;  %v2966_v29 = vld [vmem:[%s3945_s18] sm:$0xf]  ;;  %v3159_v31 = vor.u32 %v3338_v23, %v3158_v21  ;;  %v3035_v32 = vor.u32 %v3304_v24, %v3032_v25 }
  0x68   : > { %1022 = vmatpush.bf16.msra.mxu3 %v3211_v62  ;;  %v3289_v30 = vld [vmem:[%s3945_s18 + $0x4] sm:$0xf0]  ;;  %v3288_v33 = vld [vmem:[%s3945_s18 + $0x4] sm:$0xf]  ;;  %v2968_v34 = vld [vmem:[%s3945_s18 + $0x8] sm:$0xf0]  ;;  %v3163_v35 = vor.u32 %v3336_v26, %v3160_v27 }
  0x69   : > { %876 = vmatpush.bf16.msra.mxu0 %v3063_v4  ;;  %v3965_v36 = vor.u32 %v3289_v30, %v2966_v29  ;;  %v3967_v37 = vor.u32 %v3288_v33, %v2968_v34  ;;  %v2974_v38 = vld [vmem:[%s3945_s18 + $0x10] sm:$0xf]  ;;  %v3291_v39 = vld [vmem:[%s3945_s18 + $0x14] sm:$0xf0]  ;;  %v3290_v40 = vld [vmem:[%s3945_s18 + $0x14] sm:$0xf] }
  0x6a   : > { %925 = vmatpush.bf16.msra.mxu1 %v3191_v5  ;;  %v2976_v41 = vld [vmem:[%s3945_s18 + $0x18] sm:$0xf0]  ;;  %v3977_v42 = vor.u32 %v3291_v39, %v2974_v38  ;;  %v2982_v44 = vld [vmem:[%s3945_s18 + $0x20] sm:$0xf]  ;;  %v3293_v45 = vld [vmem:[%s3945_s18 + $0x24] sm:$0xf0] }
  0x6b   : > { %974 = vmatpush.bf16.msra.mxu2 %v3067_v6  ;;  %v3979_v43 = vor.u32 %v3290_v40, %v2976_v41  ;;  %v3292_v46 = vld [vmem:[%s3945_s18 + $0x24] sm:$0xf]  ;;  %v2984_v47 = vld [vmem:[%s3945_s18 + $0x28] sm:$0xf0]  ;;  %v3989_v48 = vor.u32 %v3293_v45, %v2982_v44  ;;  %v3152_v51 = vld [vmem:[#allocation6 + $0xf8] sm:$0xf0] }
  0x6c   : > { %1023 = vmatpush.bf16.msra.mxu3 %v3195_v10  ;;  %v3991_v49 = vor.u32 %v3292_v46, %v2984_v47  ;;  %v3333_v50 = vld [vmem:[#allocation6 + $0xec] sm:$0xf]  ;;  %v3280_v54 = vld [vmem:[#allocation6 + $0x1f8] sm:$0xf0]  ;;  %v3150_v55 = vld [vmem:[#allocation6 + $0xe8] sm:$0xf] }
  0x6d   : > { %877 = vmatpush.bf16.msra.mxu0 %v3047_v16  ;;  %v3365_v52 = vld [vmem:[#allocation6 + $0x1ec] sm:$0xf]  ;;  %v3155_v53 = vor.u32 %v3333_v50, %v3152_v51  ;;  %v3335_v56 = vld [vmem:[#allocation6 + $0xf4] sm:$0xf0]  ;;  %v3278_v59 = vld [vmem:[#allocation6 + $0x1e8] sm:$0xf] }
  0x6e   : > { %926 = vmatpush.bf16.msra.mxu1 %v3175_v17  ;;  %v3283_v57 = vor.u32 %v3365_v52, %v3280_v54  ;;  %v3151_v58 = vor.u32 %v3335_v56, %v3150_v55  ;;  %v3367_v60 = vld [vmem:[#allocation6 + $0x1f4] sm:$0xf0]  ;;  %v2990_v62 = vld [vmem:[%s3945_s18 + $0x30] sm:$0xf]  ;;  %v3294_v0 = vld [vmem:[%s3945_s18 + $0x34] sm:$0xf] }
  0x6f   : > { %975 = vmatpush.bf16.msra.mxu2 %v3051_v18  ;;  %v3279_v61 = vor.u32 %v3367_v60, %v3278_v59  ;;  %v3295_v63 = vld [vmem:[%s3945_s18 + $0x34] sm:$0xf0]  ;;  %v2992_v1 = vld [vmem:[%s3945_s18 + $0x38] sm:$0xf0]  ;;  %v3329_v4 = vld [vmem:[#allocation6 + $0xcc] sm:$0xf] }
  0x70   : > { %1024 = vmatpush.bf16.msra.mxu3 %v3179_v22  ;;  %v4001_v2 = vor.u32 %v3295_v63, %v2990_v62  ;;  %v4003_v3 = vor.u32 %v3294_v0, %v2992_v1  ;;  %v3136_v5 = vld [vmem:[#allocation6 + $0xd8] sm:$0xf0]  ;;  %v3361_v6 = vld [vmem:[#allocation6 + $0x1cc] sm:$0xf]  ;;  %v3134_v9 = vld [vmem:[#allocation6 + $0xc8] sm:$0xf] }
  0x71   : > { %878 = vmatpush.bf16.msra.mxu0 %v3031_v28  ;;  %v3139_v7 = vor.u32 %v3329_v4, %v3136_v5  ;;  %v3264_v8 = vld [vmem:[#allocation6 + $0x1d8] sm:$0xf0]  ;;  %v3331_v10 = vld [vmem:[#allocation6 + $0xd4] sm:$0xf0]  ;;  %v3262_v13 = vld [vmem:[#allocation6 + $0x1c8] sm:$0xf] }
  0x72   : > { %927 = vmatpush.bf16.msra.mxu1 %v3159_v31  ;;  %v3267_v11 = vor.u32 %v3361_v6, %v3264_v8  ;;  %v3135_v12 = vor.u32 %v3331_v10, %v3134_v9  ;;  %v3363_v14 = vld [vmem:[#allocation6 + $0x1d4] sm:$0xf0]  ;;  %v2998_v16 = vld [vmem:[%s3945_s18 + $0x40] sm:$0xf]  ;;  %v3297_v17 = vld [vmem:[%s3945_s18 + $0x44] sm:$0xf0] }
  0x73   : > { %976 = vmatpush.bf16.msra.mxu2 %v3035_v32  ;;  %v3263_v15 = vor.u32 %v3363_v14, %v3262_v13  ;;  %v3296_v18 = vld [vmem:[%s3945_s18 + $0x44] sm:$0xf]  ;;  %v3000_v19 = vld [vmem:[%s3945_s18 + $0x48] sm:$0xf0]  ;;  %v4013_v20 = vor.u32 %v3297_v17, %v2998_v16  ;;  %v3120_v23 = vld [vmem:[#allocation6 + $0xb8] sm:$0xf0] }
  0x74   : > { %1025 = vmatpush.bf16.msra.mxu3 %v3163_v35  ;;  %879 = vmatmul.bf16.vlgmr.msra.gmra.mxu0 %v3965_v36  ;;  %v4015_v21 = vor.u32 %v3296_v18, %v3000_v19  ;;  %v3325_v22 = vld [vmem:[#allocation6 + $0xac] sm:$0xf]  ;;  %v3248_v26 = vld [vmem:[#allocation6 + $0x1b8] sm:$0xf0]  ;;  %v3118_v27 = vld [vmem:[#allocation6 + $0xa8] sm:$0xf] }
  0x75   : > { %928 = vmatmul.bf16.vlgmr.msra.gmra.mxu1 %v3967_v37  ;;  %1067 = vmatpush.bf16.msrb.mxu0 %v3151_v58  ;;  %v3357_v24 = vld [vmem:[#allocation6 + $0x1ac] sm:$0xf]  ;;  %v3123_v25 = vor.u32 %v3325_v22, %v3120_v23  ;;  %v3327_v28 = vld [vmem:[#allocation6 + $0xb4] sm:$0xf0]  ;;  %v3246_v31 = vld [vmem:[#allocation6 + $0x1a8] sm:$0xf] }
  0x76   : > { %977 = vmatmul.bf16.vlgmr.msra.gmra.mxu2 %v3965_v36  ;;  %1116 = vmatpush.bf16.msrb.mxu1 %v3279_v61  ;;  %v3251_v29 = vor.u32 %v3357_v24, %v3248_v26  ;;  %v3119_v30 = vor.u32 %v3327_v28, %v3118_v27  ;;  %v3359_v32 = vld [vmem:[#allocation6 + $0x1b4] sm:$0xf0]  ;;  %v3102_v33 = vld [vmem:[#allocation6 + $0x88] sm:$0xf]  ;;  %v3321_v41 = vld [vmem:[#allocation6 + $0x8c] sm:$0xf] }
  0x77   : > { %1026 = vmatmul.bf16.vlgmr.msra.gmra.mxu3 %v3967_v37  ;;  %1165 = vmatpush.bf16.msrb.mxu2 %v3155_v53  ;;  %v3247_v34 = vor.u32 %v3359_v32, %v3246_v31  ;;  %v3323_v35 = vld [vmem:[#allocation6 + $0x94] sm:$0xf0]  ;;  %v3230_v38 = vld [vmem:[#allocation6 + $0x188] sm:$0xf]  ;;  %v3104_v44 = vld [vmem:[#allocation6 + $0x98] sm:$0xf0] }
  0x78   : > { %1214 = vmatpush.bf16.msrb.mxu3 %v3283_v57  ;;  %v3355_v39 = vld [vmem:[#allocation6 + $0x194] sm:$0xf0]  ;;  %v3103_v40 = vor.u32 %v3323_v35, %v3102_v33  ;;  %v3353_v45 = vld [vmem:[#allocation6 + $0x18c] sm:$0xf]  ;;  %v3107_v47 = vor.u32 %v3321_v41, %v3104_v44  ;;  %v3232_v50 = vld [vmem:[#allocation6 + $0x198] sm:$0xf0] }
  0x79   : > { %1068 = vmatpush.bf16.msrb.mxu0 %v3135_v12  ;;  %v3231_v46 = vor.u32 %v3355_v39, %v3230_v38  ;;  %v3235_v51 = vor.u32 %v3353_v45, %v3232_v50  ;;  %v3006_v52 = vld [vmem:[%s3945_s18 + $0x50] sm:$0xf]  ;;  %v3299_v53 = vld [vmem:[%s3945_s18 + $0x54] sm:$0xf0]  ;;  %v3298_v54 = vld [vmem:[%s3945_s18 + $0x54] sm:$0xf] }
  0x7a   : > { %1117 = vmatpush.bf16.msrb.mxu1 %v3263_v15  ;;  %v3008_v55 = vld [vmem:[%s3945_s18 + $0x58] sm:$0xf0]  ;;  %v4025_v56 = vor.u32 %v3299_v53, %v3006_v52  ;;  %v3086_v58 = vld [vmem:[#allocation6 + $0x68] sm:$0xf]  ;;  %v3319_v59 = vld [vmem:[#allocation6 + $0x74] sm:$0xf0] }
  0x7b   : > { %1166 = vmatpush.bf16.msrb.mxu2 %v3139_v7  ;;  %v4027_v57 = vor.u32 %v3298_v54, %v3008_v55  ;;  %v3214_v60 = vld [vmem:[#allocation6 + $0x168] sm:$0xf]  ;;  %v3087_v61 = vor.u32 %v3319_v59, %v3086_v58  ;;  %v3351_v62 = vld [vmem:[#allocation6 + $0x174] sm:$0xf0]  ;;  %v3317_v63 = vld [vmem:[#allocation6 + $0x6c] sm:$0xf] }
  0x7c   : > { %1215 = vmatpush.bf16.msrb.mxu3 %v3267_v11  ;;  %v3088_v0 = vld [vmem:[#allocation6 + $0x78] sm:$0xf0]  ;;  %v3215_v1 = vor.u32 %v3351_v62, %v3214_v60  ;;  %v3349_v5 = vld [vmem:[#allocation6 + $0x16c] sm:$0xf]  ;;  %v3070_v7 = vld [vmem:[#allocation6 + $0x48] sm:$0xf] }
  0x7d   : > { %1069 = vmatpush.bf16.msrb.mxu0 %v3119_v30  ;;  %v3091_v4 = vor.u32 %v3317_v63, %v3088_v0  ;;  %v3216_v6 = vld [vmem:[#allocation6 + $0x178] sm:$0xf0]  ;;  %v3315_v9 = vld [vmem:[#allocation6 + $0x54] sm:$0xf0]  ;;  %v3198_v10 = vld [vmem:[#allocation6 + $0x148] sm:$0xf] }
  0x7e   : > { %1118 = vmatpush.bf16.msrb.mxu1 %v3247_v34  ;;  %v3219_v8 = vor.u32 %v3349_v5, %v3216_v6  ;;  %v3347_v11 = vld [vmem:[#allocation6 + $0x154] sm:$0xf0]  ;;  %v3071_v12 = vor.u32 %v3315_v9, %v3070_v7  ;;  %v3313_v14 = vld [vmem:[#allocation6 + $0x4c] sm:$0xf]  ;;  %v3072_v15 = vld [vmem:[#allocation6 + $0x58] sm:$0xf0] }
  0x7f   : > { %1167 = vmatpush.bf16.msrb.mxu2 %v3123_v25  ;;  %v3199_v13 = vor.u32 %v3347_v11, %v3198_v10  ;;  %v3345_v16 = vld [vmem:[#allocation6 + $0x14c] sm:$0xf]  ;;  %v3075_v17 = vor.u32 %v3313_v14, %v3072_v15  ;;  %v3200_v18 = vld [vmem:[#allocation6 + $0x158] sm:$0xf0]  ;;  %v3054_v19 = vld [vmem:[#allocation6 + $0x28] sm:$0xf] }
  0x80   : > { %1216 = vmatpush.bf16.msrb.mxu3 %v3251_v29  ;;  %v3311_v22 = vld [vmem:[#allocation6 + $0x34] sm:$0xf0]  ;;  %v3203_v23 = vor.u32 %v3345_v16, %v3200_v18  ;;  %v3182_v24 = vld [vmem:[#allocation6 + $0x128] sm:$0xf]  ;;  %v3309_v26 = vld [vmem:[#allocation6 + $0x2c] sm:$0xf] }
  0x81   : > { %1070 = vmatpush.bf16.msrb.mxu0 %v3103_v40  ;;  %v3343_v25 = vld [vmem:[#allocation6 + $0x134] sm:$0xf0]  ;;  %v3055_v27 = vor.u32 %v3311_v22, %v3054_v19  ;;  %v3056_v28 = vld [vmem:[#allocation6 + $0x38] sm:$0xf0]  ;;  %v3341_v29 = vld [vmem:[#allocation6 + $0x12c] sm:$0xf] }
  0x82   : > { %1119 = vmatpush.bf16.msrb.mxu1 %v3231_v46  ;;  %v3184_v30 = vld [vmem:[#allocation6 + $0x138] sm:$0xf0]  ;;  %v3183_v31 = vor.u32 %v3343_v25, %v3182_v24  ;;  %v3059_v32 = vor.u32 %v3309_v26, %v3056_v28  ;;  %v3014_v33 = vld [vmem:[%s3945_s18 + $0x60] sm:$0xf]  ;;  %v3301_v34 = vld [vmem:[%s3945_s18 + $0x64] sm:$0xf0] }
  0x83   : > { %1168 = vmatpush.bf16.msrb.mxu2 %v3107_v47  ;;  %v3187_v35 = vor.u32 %v3341_v29, %v3184_v30  ;;  %v3300_v38 = vld [vmem:[%s3945_s18 + $0x64] sm:$0xf]  ;;  %v3016_v39 = vld [vmem:[%s3945_s18 + $0x68] sm:$0xf0]  ;;  %v4037_v40 = vor.u32 %v3301_v34, %v3014_v33  ;;  %v3038_v41 = vld [vmem:[#allocation6 + $0x8] sm:$0xf] }
  0x84   : > { %884 = vmatmul.bf16.gmra.mxu0 %v3977_v42  ;;  %1217 = vmatpush.bf16.msrb.mxu3 %v3235_v51  ;;  %v3307_v44 = vld [vmem:[#allocation6 + $0x14] sm:$0xf0]  ;;  %v3166_v45 = vld [vmem:[#allocation6 + $0x108] sm:$0xf]  ;;  %v4039_v46 = vor.u32 %v3300_v38, %v3016_v39  ;;  %v3305_v51 = vld [vmem:[#allocation6 + $0xc] sm:$0xf] }
  0x85   : > { %933 = vmatmul.bf16.gmra.mxu1 %v3979_v43  ;;  %1071 = vmatpush.bf16.msrb.mxu0 %v3087_v61  ;;  %v3039_v47 = vor.u32 %v3307_v44, %v3038_v41  ;;  %v3339_v50 = vld [vmem:[#allocation6 + $0x114] sm:$0xf0]  ;;  %v3040_v52 = vld [vmem:[#allocation6 + $0x18] sm:$0xf0]  ;;  %v3337_v55 = vld [vmem:[#allocation6 + $0x10c] sm:$0xf] }
  0x86   : > { %982 = vmatmul.bf16.gmra.mxu2 %v3977_v42  ;;  %1120 = vmatpush.bf16.msrb.mxu1 %v3215_v1  ;;  %v3167_v53 = vor.u32 %v3339_v50, %v3166_v45  ;;  %v3043_v54 = vor.u32 %v3305_v51, %v3040_v52  ;;  %v3168_v58 = vld [vmem:[#allocation6 + $0x118] sm:$0xf0]  ;;  %v3022_v60 = vld [vmem:[%s3945_s18 + $0x70] sm:$0xf]  ;;  %v3303_v61 = vld [vmem:[%s3945_s18 + $0x74] sm:$0xf0] }
  0x87   : > { %1031 = vmatmul.bf16.gmra.mxu3 %v3979_v43  ;;  %1169 = vmatpush.bf16.msrb.mxu2 %v3091_v4  ;;  %v3171_v59 = vor.u32 %v3337_v55, %v3168_v58  ;;  %v3302_v62 = vld [vmem:[%s3945_s18 + $0x74] sm:$0xf]  ;;  %v3024_v63 = vld [vmem:[%s3945_s18 + $0x78] sm:$0xf0]  ;;  %v4049_v0 = vor.u32 %v3303_v61, %v3022_v60  ;;  %v4057_v4 = vld [vmem:[#allocation8] sm:$0xf] }
  0x88   : > { %1218 = vmatpush.bf16.msrb.mxu3 %v3219_v8  ;;  %v4051_v1 = vor.u32 %v3302_v62, %v3024_v63  ;;  %v4060_v5 = vperm.slane %v4057_v4, 0  ;;  %v4067_v10 = vperm.slane %v4057_v4, 1  ;;  %p378_p1 = scmp.lt.s32.totalorder %s3842_s4, 1  ;;  %s376_s19 = scalar_lea.vmem [#allocation11], %s3941_s11 }
  0x89   : > { %1072 = vmatpush.bf16.msrb.mxu0 %v3071_v12  ;;  %s2836_s2 = sshll.u32 %s376_s19, 4  ;;  %s2838_s20 = sshll.u32 %s2834_s1, 4  ;;  %s2837_s2 = int_to_ptr.vmem [resolvable:$true] %s2836_s2  ;;  %s2839_s20 = int_to_ptr.hbm [resolvable:$true] %s2838_s20 }
  0x8a   : > { %1121 = vmatpush.bf16.msrb.mxu1 %v3199_v13  ;;  %s379_s14 = scalar_select %p378_p1, %s3842_s4, 1 }
  0x8b   : > { %1170 = vmatpush.bf16.msrb.mxu2 %v3075_v17  ;;  %s2826_s0 = scalar_lea.sflag [#allocation5], %s3941_s11  ;;  %s3710_s22 = sshra.s32 %s2839_s20, 4  ;;  %s3711_s22 = int_to_ptr.hbm [resolvable:$true] %s3710_s22 }
  0x8c   : > { %1219 = vmatpush.bf16.msrb.mxu3 %v3203_v23  ;;  %s380_s25 = scalar_lea.vmem %s5058_s6, %s379_s14  ;;  %s3712_s18 = scalar_lea.hbm %s3711_s22, 1 }
  0x8d   : > { %1073 = vmatpush.bf16.msrb.mxu0 %v3055_v27  ;;  %p3713_p4 = scmp.ne.s32.totalorder %s3711_s22, %s3712_s18  ;;  %p3717_p10 = scmp.lt.s32.totalorder %s3711_s22, %s5059_s7 }
  0x8e   : > { %1122 = vmatpush.bf16.msrb.mxu1 %v3183_v31 }
  0x8f   : > { %1171 = vmatpush.bf16.msrb.mxu2 %v3059_v32  ;;  %p3714_p8 = pnand %p3713_p4, %p3887_p3 }
  0x90   : > { %1220 = vmatpush.bf16.msrb.mxu3 %v3187_v35 }
  0x91   : > { %1074 = vmatpush.bf16.msrb.mxu0 %v3039_v47  ;;  %p3715_p2 = pneg %p3714_p8 }
  0x92   : > { %1123 = vmatpush.bf16.msrb.mxu1 %v3167_v53 }
  0x93   : > { %1172 = vmatpush.bf16.msrb.mxu2 %v3043_v54 }
  0x94   : > { %889 = vmatmul.bf16.gmra.mxu0 %v3989_v48  ;;  %1221 = vmatpush.bf16.msrb.mxu3 %v3171_v59 }
  0x95   : > { %938 = vmatmul.bf16.gmra.mxu1 %v3991_v49 }
  0x96   : > { %987 = vmatmul.bf16.gmra.mxu2 %v3989_v48 }
  0x97   : > { %1036 = vmatmul.bf16.gmra.mxu3 %v3991_v49 }
  0xa4   : > { %894 = vmatmul.bf16.gmra.mxu0 %v4001_v2 }
  0xa5   : > { %943 = vmatmul.bf16.gmra.mxu1 %v4003_v3 }
  0xa6   : > { %992 = vmatmul.bf16.gmra.mxu2 %v4001_v2 }
  0xa7   : > { %1041 = vmatmul.bf16.gmra.mxu3 %v4003_v3 }
  0xb4   : > { %899 = vmatmul.bf16.gmra.mxu0 %v4013_v20 }
  0xb5   : > { %948 = vmatmul.bf16.gmra.mxu1 %v4015_v21 }
  0xb6   : > { %997 = vmatmul.bf16.gmra.mxu2 %v4013_v20 }
  0xb7   : > { %1046 = vmatmul.bf16.gmra.mxu3 %v4015_v21 }
  0xc4   : > { %904 = vmatmul.bf16.gmra.mxu0 %v4025_v56 }
  0xc5   : > { %953 = vmatmul.bf16.gmra.mxu1 %v4027_v57 }
  0xc6   : > { %1002 = vmatmul.bf16.gmra.mxu2 %v4025_v56 }
  0xc7   : > { %1051 = vmatmul.bf16.gmra.mxu3 %v4027_v57 }
  0xd4   : > { %909 = vmatmul.bf16.gmra.mxu0 %v4037_v40 }
  0xd5   : > { %958 = vmatmul.bf16.gmra.mxu1 %v4039_v46 }
  0xd6   : > { %1007 = vmatmul.bf16.gmra.mxu2 %v4037_v40 }
  0xd7   : > { %1056 = vmatmul.bf16.gmra.mxu3 %v4039_v46 }
  0xe4   : > { %914 = vmatmul.bf16.gmra.mxu0 %v4049_v0 }
  0xe5   : > { %963 = vmatmul.bf16.gmra.mxu1 %v4051_v1 }
  0xe6   : > { %1012 = vmatmul.bf16.gmra.mxu2 %v4049_v0 }
  0xe7   : > { %1061 = vmatmul.bf16.gmra.mxu3 %v4051_v1 }
  0xf1   : > { %v880_v6 = vpop.f32.mrf.mxu0 }
  0xf2   : > { %v881_v7 = vadd.f32 %v880_v6, %v4060_v5  ;;  %v929_v8 = vpop.f32.mrf.mxu1 }
  0xf4   : > { %v930_v9 = vadd.f32 %v929_v8, %v881_v7  ;;  %1075 = vmatmul.bf16.vlgmr.msrb.gmra.mxu0 %v3965_v36 }
  0xf5   : > { %1124 = vmatmul.bf16.vlgmr.msrb.gmra.mxu1 %v3967_v37 }
  0xf6   : > { %1173 = vmatmul.bf16.vlgmr.msrb.gmra.mxu2 %v3965_v36 }
  0xf7   : > { %1222 = vmatmul.bf16.vlgmr.msrb.gmra.mxu3 %v3967_v37 }
  0xf9   : > { %v978_v11 = vpop.f32.mrf.mxu2  ;;  %v882_v14 = vpop.f32.mrf.mxu0 }
  0xfa   : > { %v979_v12 = vadd.f32 %v978_v11, %v4067_v10  ;;  %v1027_v13 = vpop.f32.mrf.mxu3  ;;  %v883_v15 = vadd.f32 %v882_v14, %v4060_v5  ;;  %v931_v16 = vpop.f32.mrf.mxu1 }
  0xfc   : > { %v1028_v17 = vadd.f32 %v1027_v13, %v979_v12  ;;  %v932_v18 = vadd.f32 %v931_v16, %v883_v15 }
  0xfe   : > { %v1263_v19 = vpack.c.bf16 %v1028_v17, %v930_v9 }
 0x100   : > { %v4080_v35 = vunpack.c.l.bf16 %v1263_v19  ;;  %v4082_v38 = vunpack.c.h.bf16 %v1263_v19 }
 0x101   : > { %v980_v22 = vpop.f32.mrf.mxu2  ;;  %v885_v24 = vpop.f32.mrf.mxu0 }
 0x102   : > { %v981_v23 = vadd.f32 %v980_v22, %v4067_v10  ;;  %v1029_v36 = vpop.f32.mrf.mxu3  ;;  %v886_v25 = vadd.f32 %v885_v24, %v4060_v5  ;;  %v934_v26 = vpop.f32.mrf.mxu1  ;;  %5108 = vst [vmem:[#allocation17_spill] sm:$0xff] %v4080_v35  ;;  %v1455_v45 = vmul.f32 0.044677734, %v4080_v35 }
 0x103   : > { %5109 = vst [vmem:[#allocation18_spill] sm:$0xff] %v4082_v38 }
 0x104   : > { %v1030_v37 = vadd.f32 %v1029_v36, %v981_v23  ;;  %v935_v27 = vadd.f32 %v934_v26, %v886_v25  ;;  %1080 = vmatmul.bf16.gmra.mxu0 %v3977_v42 }
 0x105   : > { %1129 = vmatmul.bf16.gmra.mxu1 %v3979_v43 }
 0x106   : > { %v1265_v28 = vpack.c.bf16 %v1030_v37, %v932_v18  ;;  %1178 = vmatmul.bf16.gmra.mxu2 %v3977_v42  ;;  %v1456_v42 = vmul.f32 0.044677734, %v4082_v38 }
 0x107   : > { %1227 = vmatmul.bf16.gmra.mxu3 %v3979_v43 }
 0x108   : > { %v1519_v54 = vpack.c.bf16 %v1456_v42, %v1455_v45  ;;  %v4096_v13 = vunpack.c.l.bf16 %v1265_v28 }
 0x109   : > { %v983_v29 = vpop.f32.mrf.mxu2  ;;  %v887_v32 = vpop.f32.mrf.mxu0 }
 0x10a   : > { %v984_v30 = vadd.f32 %v983_v29, %v4067_v10  ;;  %v1032_v31 = vpop.f32.mrf.mxu3  ;;  %v888_v33 = vadd.f32 %v887_v32, %v4060_v5  ;;  %v936_v34 = vpop.f32.mrf.mxu1  ;;  %v1551_v60 = vunpack.c.l.bf16 %v1519_v54  ;;  %v1552_v61 = vunpack.c.h.bf16 %v1519_v54  ;;  %5110 = vst [vmem:[#allocation19_spill] sm:$0xff] %v4096_v13 }
 0x10b   : > { %v1459_v17 = vmul.f32 0.044677734, %v4096_v13 }
 0x10c   : > { %v1033_v39 = vadd.f32 %v1032_v31, %v984_v30  ;;  %v937_v41 = vadd.f32 %v936_v34, %v888_v33  ;;  %v1615_v9 = vmul.f32 %v1551_v60, %v4080_v35  ;;  %v1616_v11 = vmul.f32 %v1552_v61, %v4082_v38 }
 0x10e   : > { %v1267_v44 = vpack.c.bf16 %v1033_v39, %v935_v27  ;;  %v1679_v15 = vpack.c.bf16 %v1616_v11, %v1615_v9 }
 0x110   : > { %v4102_v19 = vunpack.c.l.bf16 %v1267_v44  ;;  %v4104_v22 = vunpack.c.h.bf16 %v1267_v44  ;;  %v1711_v37 = vunpack.c.l.bf16 %v1679_v15  ;;  %v1712_v27 = vunpack.c.h.bf16 %v1679_v15 }
 0x111   : > { %v985_v43 = vpop.f32.mrf.mxu2  ;;  %v890_v51 = vpop.f32.mrf.mxu0 }
 0x112   : > { %v986_v47 = vadd.f32 %v985_v43, %v4067_v10  ;;  %v1034_v50 = vpop.f32.mrf.mxu3  ;;  %v891_v52 = vadd.f32 %v890_v51, %v4060_v5  ;;  %v939_v53 = vpop.f32.mrf.mxu1  ;;  %5112 = vst [vmem:[#allocation21_spill] sm:$0xff] %v4102_v19  ;;  %v1463_v30 = vmul.f32 0.044677734, %v4102_v19  ;;  %v1464_v31 = vmul.f32 0.044677734, %v4104_v22 }
 0x113   : > { %5113 = vst [vmem:[#allocation22_spill] sm:$0xff] %v4104_v22  ;;  %v1775_v34 = vmul.f32 %v1711_v37, %v4080_v35  ;;  %v1776_v39 = vmul.f32 %v1712_v27, %v4082_v38 }
 0x114   : > { %v1035_v55 = vadd.f32 %v1034_v50, %v986_v47  ;;  %v940_v58 = vadd.f32 %v939_v53, %v891_v52  ;;  %1085 = vmatmul.bf16.gmra.mxu0 %v3989_v48  ;;  %v1523_v42 = vpack.c.bf16 %v1464_v31, %v1463_v30 }
 0x115   : > { %1134 = vmatmul.bf16.gmra.mxu1 %v3991_v49  ;;  %v1839_v52 = vpack.c.bf16 %v1776_v39, %v1775_v34 }
 0x116   : > { %1183 = vmatmul.bf16.gmra.mxu2 %v3989_v48  ;;  %v1269_v59 = vpack.c.bf16 %v1035_v55, %v937_v41  ;;  %v4098_v48 = vunpack.c.h.bf16 %v1265_v28  ;;  %v1560_v61 = vunpack.c.h.bf16 %v1523_v42 }
 0x117   : > { %1232 = vmatmul.bf16.gmra.mxu3 %v3991_v49  ;;  %v1872_v11 = vunpack.c.h.bf16 %v1839_v52 }
 0x118   : > { %5111 = vst [vmem:[#allocation20_spill] sm:$0xff] %v4098_v48  ;;  %v1460_v18 = vmul.f32 0.044677734, %v4098_v48  ;;  %v4116_v53 = vunpack.c.l.bf16 %v1269_v59  ;;  %v4118_v54 = vunpack.c.h.bf16 %v1269_v59 }
 0x119   : > { %v988_v62 = vpop.f32.mrf.mxu2  ;;  %v892_v6 = vpop.f32.mrf.mxu0  ;;  %v1936_v31 = vadd.f32 %v1872_v11, %v4082_v38 }
 0x11a   : > { %v1037_v63 = vpop.f32.mrf.mxu3  ;;  %v989_v7 = vadd.f32 %v988_v62, %v4067_v10  ;;  %v941_v8 = vpop.f32.mrf.mxu1  ;;  %v893_v12 = vadd.f32 %v892_v6, %v4060_v5  ;;  %v1521_v29 = vpack.c.bf16 %v1460_v18, %v1459_v17  ;;  %5114 = vst [vmem:[#allocation23_spill] sm:$0xff] %v4116_v53  ;;  %v1467_v59 = vmul.f32 0.044677734, %v4116_v53 }
 0x11b   : > { %5115 = vst [vmem:[#allocation24_spill] sm:$0xff] %v4118_v54  ;;  %v1468_v9 = vmul.f32 0.044677734, %v4118_v54  ;;  %v1624_v17 = vmul.f32 %v1560_v61, %v4104_v22 }
 0x11c   : > { %v1038_v14 = vadd.f32 %v1037_v63, %v989_v7  ;;  %v942_v49 = vadd.f32 %v941_v8, %v893_v12  ;;  %v1555_v44 = vunpack.c.l.bf16 %v1521_v29  ;;  %v1556_v45 = vunpack.c.h.bf16 %v1521_v29 }
 0x11d   : > { %v1871_v8 = vunpack.c.l.bf16 %v1839_v52 }
 0x11e   : > { %v1271_v16 = vpack.c.bf16 %v1038_v14, %v940_v58  ;;  %v1620_v55 = vmul.f32 %v1556_v45, %v4098_v48  ;;  %v1559_v58 = vunpack.c.l.bf16 %v1523_v42 }
 0x11f   : > { %v1935_v29 = vadd.f32 %v1871_v8, %v4080_v35 }
 0x120   : > { %v4124_v62 = vunpack.c.l.bf16 %v1271_v16  ;;  %v4126_v63 = vunpack.c.h.bf16 %v1271_v16  ;;  %v1623_v14 = vmul.f32 %v1559_v58, %v4102_v19 }
 0x121   : > { %v990_v23 = vpop.f32.mrf.mxu2  ;;  %v895_v24 = vpop.f32.mrf.mxu0 }
 0x122   : > { %v1039_v36 = vpop.f32.mrf.mxu3  ;;  %v991_v25 = vadd.f32 %v990_v23, %v4067_v10  ;;  %v944_v26 = vpop.f32.mrf.mxu1  ;;  %v896_v28 = vadd.f32 %v895_v24, %v4060_v5  ;;  %5116 = vst [vmem:[#allocation25_spill] sm:$0xff] %v4124_v62  ;;  %v1471_v18 = vmul.f32 0.044677734, %v4124_v62  ;;  %v1472_v16 = vmul.f32 0.044677734, %v4126_v63 }
 0x123   : > { %5117 = vst [vmem:[#allocation26_spill] sm:$0xff] %v4126_v63 }
 0x124   : > { %1090 = vmatmul.bf16.gmra.mxu0 %v4001_v2  ;;  %v1040_v32 = vadd.f32 %v1039_v36, %v991_v25  ;;  %v945_v33 = vadd.f32 %v944_v26, %v896_v28  ;;  %v1525_v26 = vpack.c.bf16 %v1468_v9, %v1467_v59  ;;  %v1527_v34 = vpack.c.bf16 %v1472_v16, %v1471_v18 }
 0x125   : > { %1139 = vmatmul.bf16.gmra.mxu1 %v4003_v3 }
 0x126   : > { %1188 = vmatmul.bf16.gmra.mxu2 %v4001_v2  ;;  %v1273_v41 = vpack.c.bf16 %v1040_v32, %v942_v49  ;;  %v1564_v52 = vunpack.c.h.bf16 %v1525_v26  ;;  %v1568_v58 = vunpack.c.h.bf16 %v1527_v34 }
 0x127   : > { %1237 = vmatmul.bf16.gmra.mxu3 %v4003_v3  ;;  %v1619_v3 = vmul.f32 %v1555_v44, %v4096_v13 }
 0x128   : > { %v4145_v39 = vunpack.c.l.bf16 %v1273_v41  ;;  %v4147_v44 = vunpack.c.h.bf16 %v1273_v41  ;;  %v1632_v16 = vmul.f32 %v1568_v58, %v4126_v63 }
 0x129   : > { %v993_v43 = vpop.f32.mrf.mxu2  ;;  %v897_v50 = vpop.f32.mrf.mxu0  ;;  %v1681_v12 = vpack.c.bf16 %v1620_v55, %v1619_v3  ;;  %v1999_v3 = vpack.c.bf16 %v1936_v31, %v1935_v29  ;;  %v1567_v55 = vunpack.c.l.bf16 %v1527_v34 }
 0x12a   : > { %v1042_v47 = vpop.f32.mrf.mxu3  ;;  %v946_v51 = vpop.f32.mrf.mxu1  ;;  %v994_v2 = vadd.f32 %v993_v43, %v4067_v10  ;;  %v898_v60 = vadd.f32 %v897_v50, %v4060_v5  ;;  %5120 = vst [vmem:[#allocation29_spill] sm:$0xff] %v4145_v39 }
 0x12b   : > { %v1715_v32 = vunpack.c.l.bf16 %v1681_v12  ;;  %5121 = vst [vmem:[#allocation30_spill] sm:$0xff] %v4147_v44  ;;  %v1716_v43 = vunpack.c.h.bf16 %v1681_v12  ;;  %v1631_v18 = vmul.f32 %v1567_v55, %v4124_v62 }
 0x12c   : > { %v1043_v6 = vadd.f32 %v1042_v47, %v994_v2  ;;  %v947_v7 = vadd.f32 %v946_v51, %v898_v60  ;;  %v1563_v47 = vunpack.c.l.bf16 %v1525_v26 }
 0x12d   : > { %v1779_v59 = vmul.f32 %v1715_v32, %v4096_v13  ;;  %v1780_v9 = vmul.f32 %v1716_v43, %v4098_v48  ;;  %v1687_v43 = vpack.c.bf16 %v1632_v16, %v1631_v18 }
 0x12e   : > { %v1275_v49 = vpack.c.bf16 %v1043_v6, %v945_v33  ;;  %v1683_v33 = vpack.c.bf16 %v1624_v17, %v1623_v14  ;;  %v1627_v11 = vmul.f32 %v1563_v47, %v4116_v53  ;;  %v1628_v14 = vmul.f32 %v1564_v52, %v4118_v54 }
 0x130   : > { %v4135_v37 = vunpack.c.l.bf16 %v1275_v49  ;;  %v4137_v27 = vunpack.c.h.bf16 %v1275_v49  ;;  %v1719_v61 = vunpack.c.l.bf16 %v1683_v33  ;;  %v1720_v6 = vunpack.c.h.bf16 %v1683_v33 }
 0x131   : > { %v995_v15 = vpop.f32.mrf.mxu2  ;;  %v900_v24 = vpop.f32.mrf.mxu0  ;;  %v1685_v31 = vpack.c.bf16 %v1628_v14, %v1627_v11 }
 0x132   : > { %v996_v23 = vadd.f32 %v995_v15, %v4067_v10  ;;  %v1044_v36 = vpop.f32.mrf.mxu3  ;;  %v949_v25 = vpop.f32.mrf.mxu1  ;;  %5118 = vst [vmem:[#allocation27_spill] sm:$0xff] %v4135_v37  ;;  %v901_v30 = vadd.f32 %v900_v24, %v4060_v5  ;;  %v1479_v50 = vmul.f32 0.044677734, %v4135_v37  ;;  %v1480_v51 = vmul.f32 0.044677734, %v4137_v27 }
 0x133   : > { %5119 = vst [vmem:[#allocation28_spill] sm:$0xff] %v4137_v27 }
 0x134   : > { %v1045_v28 = vadd.f32 %v1044_v36, %v996_v23  ;;  %1095 = vmatmul.bf16.gmra.mxu0 %v4013_v20  ;;  %v950_v42 = vadd.f32 %v949_v25, %v901_v30  ;;  %v1531_v12 = vpack.c.bf16 %v1480_v51, %v1479_v50  ;;  %v1783_v23 = vmul.f32 %v1719_v61, %v4102_v19 }
 0x135   : > { %1144 = vmatmul.bf16.gmra.mxu1 %v4015_v21  ;;  %v1784_v36 = vmul.f32 %v1720_v6, %v4104_v22  ;;  %v1841_v25 = vpack.c.bf16 %v1780_v9, %v1779_v59  ;;  %v2031_v30 = vunpack.c.l.bf16 %v1999_v3  ;;  %v1727_v59 = vunpack.c.l.bf16 %v1687_v43 }
 0x136   : > { %1193 = vmatmul.bf16.gmra.mxu2 %v4013_v20  ;;  %v1277_v45 = vpack.c.bf16 %v1045_v28, %v947_v7  ;;  %v1476_v7 = vmul.f32 0.044677734, %v4147_v44  ;;  %v1575_v26 = vunpack.c.l.bf16 %v1531_v12  ;;  %v1576_v28 = vunpack.c.h.bf16 %v1531_v12 }
 0x137   : > { %1242 = vmatmul.bf16.gmra.mxu3 %v4015_v21  ;;  %v1475_v21 = vmul.f32 0.044677734, %v4145_v39  ;;  %v1843_v51 = vpack.c.bf16 %v1784_v36, %v1783_v23  ;;  %v4176_v6 = vmul.f32 0.796875, %v2031_v30  ;;  %v1728_v9 = vunpack.c.h.bf16 %v1687_v43 }
 0x138   : > { %v4163_v49 = vunpack.c.l.bf16 %v1277_v45  ;;  %v4165_v15 = vunpack.c.h.bf16 %v1277_v45  ;;  %v2032_v45 = vunpack.c.h.bf16 %v1999_v3  ;;  %v1640_v61 = vmul.f32 %v1576_v28, %v4137_v27 }
 0x139   : > { %v998_v2 = vpop.f32.mrf.mxu2  ;;  %v4153_v41 = vpop.f32.mrf.mxu0  ;;  %v1529_v24 = vpack.c.bf16 %v1476_v7, %v1475_v21  ;;  %v1723_v21 = vunpack.c.l.bf16 %v1685_v31  ;;  %v1724_v3 = vunpack.c.h.bf16 %v1685_v31  ;;  %v1879_v12 = vunpack.c.l.bf16 %v1843_v51 }
 0x13a   : > { %v999_v20 = vadd.f32 %v998_v2, %v4067_v10  ;;  %v1047_v60 = vpop.f32.mrf.mxu3  ;;  %v4157_v8 = vpop.f32.mrf.mxu1  ;;  %5122 = vst [vmem:[#allocation31_spill] sm:$0xff] %v4163_v49  ;;  %v1483_v32 = vmul.f32 0.044677734, %v4163_v49  ;;  %v1484_v33 = vmul.f32 0.044677734, %v4165_v15  ;;  %v1880_v14 = vunpack.c.h.bf16 %v1843_v51 }
 0x13b   : > { %5123 = vst [vmem:[#allocation32_spill] sm:$0xff] %v4165_v15  ;;  %v1571_v52 = vunpack.c.l.bf16 %v1529_v24  ;;  %v1572_v2 = vunpack.c.h.bf16 %v1529_v24  ;;  %v4184_v16 = vmul.f32 0.796875, %v2032_v45  ;;  %v1787_v31 = vmul.f32 %v1723_v21, %v4116_v53 }
 0x13c   : > { %v1048_v17 = vadd.f32 %v1047_v60, %v999_v20  ;;  %v1875_v20 = vunpack.c.l.bf16 %v1841_v25  ;;  %v1876_v60 = vunpack.c.h.bf16 %v1841_v25  ;;  %v1533_v7 = vpack.c.bf16 %v1484_v33, %v1483_v32 }
 0x13d   : > { %v1636_v18 = vmul.f32 %v1572_v2, %v4147_v44  ;;  %v1788_v32 = vmul.f32 %v1724_v3, %v4118_v54  ;;  %v1792_v33 = vmul.f32 %v1728_v9, %v4126_v63  ;;  %v1944_v51 = vadd.f32 %v1880_v14, %v4104_v22 }
 0x13e   : > { %v1279_v29 = vpack.c.bf16 %v1048_v17, %v950_v42  ;;  %v1639_v42 = vmul.f32 %v1575_v26, %v4135_v37  ;;  %v1635_v17 = vmul.f32 %v1571_v52, %v4145_v39  ;;  %v1939_v23 = vadd.f32 %v1875_v20, %v4096_v13 }
 0x13f   : > { %v1940_v36 = vadd.f32 %v1876_v60, %v4098_v48  ;;  %v1579_v25 = vunpack.c.l.bf16 %v1533_v7  ;;  %v1580_v26 = vunpack.c.h.bf16 %v1533_v7  ;;  %v903_v20 = vadd.f32 %v4153_v41, %v4060_v5 }
 0x140   : > { %v1691_v24 = vpack.c.bf16 %v1640_v61, %v1639_v42  ;;  %v4188_v28 = vunpack.c.l.bf16 %v1279_v29  ;;  %v1689_v52 = vpack.c.bf16 %v1636_v18, %v1635_v17 }
 0x141   : > { %v1000_v34 = vpop.f32.mrf.mxu2  ;;  %v905_v50 = vpop.f32.mrf.mxu0  ;;  %v1643_v42 = vmul.f32 %v1579_v25, %v4163_v49  ;;  %v1644_v61 = vmul.f32 %v1580_v26, %v4165_v15  ;;  %v4206_v3 = vpack.c.bf16 %v1940_v36, %v1939_v23  ;;  %v952_v26 = vadd.f32 %v4157_v8, %v903_v20 }
 0x142   : > { %v1049_v47 = vpop.f32.mrf.mxu3  ;;  %v906_v55 = vadd.f32 %v905_v50, %v4060_v5  ;;  %v954_v58 = vpop.f32.mrf.mxu1  ;;  %5124 = vst [vmem:[#allocation33_spill] sm:$0xff] %v4188_v28  ;;  %v1943_v50 = vadd.f32 %v1879_v12, %v4102_v19  ;;  %v1001_v2 = vadd.f32 %v1000_v34, %v4067_v10  ;;  %v1487_v21 = vmul.f32 0.044677734, %v4188_v28 }
 0x143   : > { %v1731_v14 = vunpack.c.l.bf16 %v1689_v52  ;;  %v1732_v18 = vunpack.c.h.bf16 %v1689_v52 }
 0x144   : > { %1100 = vmatmul.bf16.gmra.mxu0 %v4025_v56  ;;  %v955_v11 = vadd.f32 %v954_v58, %v906_v55  ;;  %v1735_v55 = vunpack.c.l.bf16 %v1691_v24  ;;  %v1736_v58 = vunpack.c.h.bf16 %v1691_v24  ;;  %v2003_v12 = vpack.c.bf16 %v1944_v51, %v1943_v50 }
 0x145   : > { %1149 = vmatmul.bf16.gmra.mxu1 %v4027_v57  ;;  %v1050_v17 = vadd.f32 %v1049_v47, %v1001_v2  ;;  %v1796_v2 = vmul.f32 %v1732_v18, %v4147_v44 }
 0x146   : > { %1198 = vmatmul.bf16.gmra.mxu2 %v4025_v56  ;;  %v4190_v56 = vunpack.c.h.bf16 %v1279_v29  ;;  %v1799_v24 = vmul.f32 %v1735_v55, %v4135_v37  ;;  %v1800_v25 = vmul.f32 %v1736_v58, %v4137_v27  ;;  %v2039_v50 = vunpack.c.l.bf16 %v2003_v12 }
 0x147   : > { %1247 = vmatmul.bf16.gmra.mxu3 %v4027_v57  ;;  %v1791_v57 = vmul.f32 %v1727_v59, %v4124_v62  ;;  %v1845_v59 = vpack.c.bf16 %v1788_v32, %v1787_v31  ;;  %v1281_v52 = vpack.c.bf16 %v1050_v17, %v952_v26 }
 0x148   : > { %5125 = vst [vmem:[#allocation34_spill] sm:$0xff] %v4190_v56  ;;  %v1488_v7 = vmul.f32 0.044677734, %v4190_v56 }
 0x149   : > { %v1003_v30 = vpop.f32.mrf.mxu2  ;;  %v907_v43 = vpop.f32.mrf.mxu0  ;;  %v1847_v34 = vpack.c.bf16 %v1792_v33, %v1791_v57  ;;  %v1883_v31 = vunpack.c.l.bf16 %v1845_v59  ;;  %v1884_v32 = vunpack.c.h.bf16 %v1845_v59 }
 0x14a   : > { %v1052_v45 = vpop.f32.mrf.mxu3  ;;  %v956_v29 = vpop.f32.mrf.mxu1  ;;  %v1004_v60 = vadd.f32 %v1003_v30, %v4067_v10  ;;  %v908_v41 = vadd.f32 %v907_v43, %v4060_v5  ;;  %v1693_v30 = vpack.c.bf16 %v1644_v61, %v1643_v42  ;;  %v1535_v48 = vpack.c.bf16 %v1488_v7, %v1487_v21 }
 0x14b   : > { %v1887_v57 = vunpack.c.l.bf16 %v1847_v34  ;;  %v2035_v43 = vunpack.c.l.bf16 %v4206_v3  ;;  %v1888_v51 = vunpack.c.h.bf16 %v1847_v34  ;;  %v2040_v61 = vunpack.c.h.bf16 %v2003_v12 }
 0x14c   : > { %v1053_v9 = vadd.f32 %v1052_v45, %v1004_v60  ;;  %v957_v23 = vadd.f32 %v956_v29, %v908_v41  ;;  %v1851_v29 = vpack.c.bf16 %v1800_v25, %v1799_v24  ;;  %v1739_v58 = vunpack.c.l.bf16 %v1693_v30 }
 0x14d   : > { %v1740_v20 = vunpack.c.h.bf16 %v1693_v30  ;;  %v1583_v60 = vunpack.c.l.bf16 %v1535_v48  ;;  %v1584_v42 = vunpack.c.h.bf16 %v1535_v48  ;;  %v1947_v21 = vadd.f32 %v1883_v31, %v4116_v53 }
 0x14e   : > { %v4212_v13 = vpack.c.bf16 %v1053_v9, %v955_v11  ;;  %v1795_v11 = vmul.f32 %v1731_v14, %v4145_v39  ;;  %v1948_v7 = vadd.f32 %v1884_v32, %v4118_v54  ;;  %v1951_v59 = vadd.f32 %v1887_v57, %v4124_v62 }
 0x14f   : > { %v1952_v34 = vadd.f32 %v1888_v51, %v4126_v63  ;;  %v4229_v9 = vunpack.c.l.bf16 %v1281_v52  ;;  %v4231_v14 = vunpack.c.h.bf16 %v1281_v52  ;;  %v2036_v12 = vunpack.c.h.bf16 %v4206_v3 }
 0x150   : > { %v1849_v17 = vpack.c.bf16 %v1796_v2, %v1795_v11  ;;  %v1895_v41 = vunpack.c.l.bf16 %v1851_v29  ;;  %v1896_v18 = vunpack.c.h.bf16 %v1851_v29  ;;  %v1803_v24 = vmul.f32 %v1739_v58, %v4163_v49 }
 0x151   : > { %v1005_v36 = vpop.f32.mrf.mxu2  ;;  %v4215_v45 = vpop.f32.mrf.mxu0  ;;  %5126 = vst [vmem:[#allocation35_spill] sm:$0xff] %v4229_v9  ;;  %v1804_v25 = vmul.f32 %v1740_v20, %v4165_v15  ;;  %v1648_v26 = vmul.f32 %v1584_v42, %v4190_v56  ;;  %v2104_v31 = vmul.f32 0.796875, %v2040_v61  ;;  %v2007_v3 = vpack.c.bf16 %v1952_v34, %v1951_v59 }
 0x152   : > { %v1006_v47 = vadd.f32 %v1005_v36, %v4067_v10  ;;  %v1054_v33 = vpop.f32.mrf.mxu3  ;;  %v4218_v8 = vpop.f32.mrf.mxu1  ;;  %5127 = vst [vmem:[#allocation36_spill] sm:$0xff] %v4231_v14  ;;  %v2103_v36 = vmul.f32 0.796875, %v2039_v50  ;;  %v4251_v52 = vmul.f32 0.796875, %v2035_v43  ;;  %v4253_v11 = vmul.f32 0.796875, %v2036_v12 }
 0x153   : > { %v1891_v50 = vunpack.c.l.bf16 %v1849_v17  ;;  %v1892_v2 = vunpack.c.h.bf16 %v1849_v17  ;;  %v1959_v29 = vadd.f32 %v1895_v41, %v4135_v37  ;;  %v1853_v58 = vpack.c.bf16 %v1804_v25, %v1803_v24 }
 0x154   : > { %v1055_v55 = vadd.f32 %v1054_v33, %v1006_v47  ;;  %1105 = vmatmul.bf16.gmra.mxu0 %v4037_v40  ;;  %v1491_v47 = vmul.f32 0.044677734, %v4229_v9  ;;  %v1492_v33 = vmul.f32 0.044677734, %v4231_v14  ;;  %5129 = vst [vmem:[#allocation38_spill] sm:$0xff] %v4251_v52  ;;  %v4263_v42 = vunpack.c.h.bf16 %v4212_v13 }
 0x155   : > { %1154 = vmatmul.bf16.gmra.mxu1 %v4039_v46  ;;  %5130 = vst [vmem:[#allocation39_spill] sm:$0xff] %v4253_v11  ;;  %v2047_v61 = vunpack.c.l.bf16 %v2007_v3  ;;  %v1955_v59 = vadd.f32 %v1891_v50, %v4145_v39  ;;  %v1956_v34 = vadd.f32 %v1892_v2, %v4147_v44  ;;  %v911_v12 = vadd.f32 %v4215_v45, %v4060_v5 }
 0x156   : > { %1203 = vmatmul.bf16.gmra.mxu2 %v4037_v40  ;;  %v4233_v48 = vpack.c.bf16 %v1055_v55, %v957_v23  ;;  %v1647_v40 = vmul.f32 %v1583_v60, %v4188_v28  ;;  %v2005_v23 = vpack.c.bf16 %v1948_v7, %v1947_v21  ;;  %v1960_v55 = vadd.f32 %v1896_v18, %v4137_v27 }
 0x157   : > { %1252 = vmatmul.bf16.gmra.mxu3 %v4039_v46  ;;  %v4245_v46 = vpack.c.bf16 %v4184_v16, %v4176_v6  ;;  %v4257_v16 = vpack.c.bf16 %v2104_v31, %v2103_v36  ;;  %v4260_v60 = vunpack.c.l.bf16 %v4212_v13  ;;  %v2048_v21 = vunpack.c.h.bf16 %v2007_v3 }
 0x158   : > { %v1695_v6 = vpack.c.bf16 %v1648_v26, %v1647_v40  ;;  %v2043_v20 = vunpack.c.l.bf16 %v2005_v23  ;;  %v2044_v43 = vunpack.c.h.bf16 %v2005_v23  ;;  %v1537_v7 = vpack.c.bf16 %v1492_v33, %v1491_v47 }
 0x159   : > { %v1008_v30 = vpop.f32.mrf.mxu2  ;;  %v4241_v57 = vpop.f32.mrf.mxu0  ;;  %5128 = vst [vmem:[#allocation37_spill] sm:$0xff] %v4245_v46  ;;  %v2011_v41 = vpack.c.bf16 %v1960_v55, %v1959_v29  ;;  %v1899_v18 = vunpack.c.l.bf16 %v1853_v58  ;;  %v1900_v26 = vunpack.c.h.bf16 %v1853_v58  ;;  %v1495_v36 = vmul.f32 0.044677734, %v4260_v60 }
 0x15a   : > { %v1057_v32 = vpop.f32.mrf.mxu3  ;;  %v4249_v51 = vpop.f32.mrf.mxu1  ;;  %5131 = vst [vmem:[#allocation40_spill] sm:$0xff] %v4257_v16  ;;  %v1009_v17 = vadd.f32 %v1008_v30, %v4067_v10  ;;  %v1743_v24 = vunpack.c.l.bf16 %v1695_v6  ;;  %v1744_v25 = vunpack.c.h.bf16 %v1695_v6  ;;  %v4270_v13 = vmul.f32 0.796875, %v2043_v20 }
 0x15b   : > { %v1496_v31 = vmul.f32 0.044677734, %v4263_v42  ;;  %v4274_v47 = vmul.f32 0.796875, %v2044_v43  ;;  %v2111_v33 = vmul.f32 0.796875, %v2047_v61  ;;  %v1587_v45 = vunpack.c.l.bf16 %v1537_v7 }
 0x15c   : > { %5132 = vst [vmem:[#allocation41_spill] sm:$0xff] %v4270_v13  ;;  %v1588_v50 = vunpack.c.h.bf16 %v1537_v7  ;;  %v2112_v2 = vmul.f32 0.796875, %v2048_v21  ;;  %v2009_v29 = vpack.c.bf16 %v1956_v34, %v1955_v59  ;;  %v960_v55 = vadd.f32 %v4218_v8, %v911_v12 }
 0x15d   : > { %5133 = vst [vmem:[#allocation42_spill] sm:$0xff] %v4274_v47  ;;  %v1058_v6 = vadd.f32 %v1057_v32, %v1009_v17  ;;  %v2055_v20 = vunpack.c.l.bf16 %v2011_v41  ;;  %v1963_v58 = vadd.f32 %v1899_v18, %v4163_v49  ;;  %v1807_v38 = vmul.f32 %v1743_v24, %v4188_v28 }
 0x15e   : > { %v1808_v35 = vmul.f32 %v1744_v25, %v4190_v56  ;;  %v2056_v43 = vunpack.c.h.bf16 %v2011_v41  ;;  %v1964_v61 = vadd.f32 %v1900_v26, %v4165_v15  ;;  %v1539_v46 = vpack.c.bf16 %v1496_v31, %v1495_v36 }
 0x15f   : > { %v1651_v8 = vmul.f32 %v1587_v45, %v4229_v9  ;;  %v1652_v32 = vmul.f32 %v1588_v50, %v4231_v14  ;;  %v4288_v21 = vunpack.c.l.bf16 %v4233_v48  ;;  %v4291_v59 = vunpack.c.h.bf16 %v4233_v48 }
 0x160   : > { %v4294_v34 = vpack.c.bf16 %v2112_v2, %v2111_v33  ;;  %v2051_v12 = vunpack.c.l.bf16 %v2009_v29  ;;  %v1287_v17 = vpack.c.bf16 %v1058_v6, %v960_v55  ;;  %v913_v41 = vadd.f32 %v4241_v57, %v4060_v5 }
 0x161   : > { %v1010_v40 = vpop.f32.mrf.mxu2  ;;  %v915_v3 = vpop.f32.mrf.mxu0  ;;  %5134 = vst [vmem:[#allocation43_spill] sm:$0xff] %v4291_v59  ;;  %v2119_v18 = vmul.f32 0.796875, %v2055_v20  ;;  %v4298_v24 = vpack.c.bf16 %v1808_v35, %v1807_v38  ;;  %v2120_v26 = vmul.f32 0.796875, %v2056_v43  ;;  %v1591_v36 = vunpack.c.l.bf16 %v1539_v46 }
 0x162   : > { %v1059_v23 = vpop.f32.mrf.mxu3  ;;  %v964_v30 = vpop.f32.mrf.mxu1  ;;  %v1011_v7 = vadd.f32 %v1010_v40, %v4067_v10  ;;  %5135 = vst [vmem:[#allocation44_spill] sm:$0xff] %v4294_v34  ;;  %v916_v25 = vadd.f32 %v915_v3, %v4060_v5  ;;  %v1592_v48 = vunpack.c.h.bf16 %v1539_v46  ;;  %v4301_v33 = vpack.c.bf16 %v1964_v61, %v1963_v58 }
 0x163   : > { %v1697_v50 = vpack.c.bf16 %v1652_v32, %v1651_v8  ;;  %v1499_v2 = vmul.f32 0.044677734, %v4288_v21  ;;  %v1500_v57 = vmul.f32 0.044677734, %v4291_v59  ;;  %v4305_v55 = vunpack.c.l.bf16 %v1287_v17 }
 0x164   : > { %1110 = vmatmul.bf16.gmra.mxu0 %v4049_v0  ;;  %v1060_v31 = vadd.f32 %v1059_v23, %v1011_v7  ;;  %v4307_v35 = vunpack.c.h.bf16 %v1287_v17  ;;  %v962_v38 = vadd.f32 %v4249_v51, %v913_v41  ;;  %v4311_v46 = vmul.f32 0.796875, %v2051_v12 }
 0x165   : > { %1159 = vmatmul.bf16.gmra.mxu1 %v4051_v1  ;;  %v1903_v6 = vunpack.c.l.bf16 %v4298_v24  ;;  %v965_v20 = vadd.f32 %v964_v30, %v916_v25  ;;  %v1655_v58 = vmul.f32 %v1591_v36, %v4260_v60  ;;  %v1656_v43 = vmul.f32 %v1592_v48, %v4263_v42 }
 0x166   : > { %1208 = vmatmul.bf16.gmra.mxu2 %v4049_v0  ;;  %v2052_v0 = vunpack.c.h.bf16 %v2009_v29  ;;  %5136 = vst [vmem:[#allocation45_spill] sm:$0xff] %v4311_v46  ;;  %v1289_v61 = vpack.c.bf16 %v1060_v31, %v962_v38  ;;  %v4318_v8 = vpack.c.bf16 %v2120_v26, %v2119_v18  ;;  %v1747_v51 = vunpack.c.l.bf16 %v1697_v50 }
 0x167   : > { %1257 = vmatmul.bf16.gmra.mxu3 %v4051_v1  ;;  %v1748_v17 = vunpack.c.h.bf16 %v1697_v50  ;;  %v1904_v12 = vunpack.c.h.bf16 %v4298_v24  ;;  %v1541_v41 = vpack.c.bf16 %v1500_v57, %v1499_v2  ;;  %v1967_v30 = vadd.f32 %v1903_v6, %v4188_v28 }
 0x168   : > { %v4313_v23 = vmul.f32 0.796875, %v2052_v0  ;;  %5138 = vst [vmem:[#allocation47_spill] sm:$0xff] %v4318_v8  ;;  %v1503_v0 = vmul.f32 0.044677734, %v4305_v55  ;;  %v4327_v18 = vperm.slane %v4057_v4, 2  ;;  %v1699_v26 = vpack.c.bf16 %v1656_v43, %v1655_v58 }
 0x169   : > { %v1013_v40 = vpop.f32.mrf.mxu2  ;;  %v917_v1 = vpop.f32.mrf.mxu0  ;;  %v4329_v31 = vunpack.c.l.bf16 %v1289_v61  ;;  %v1811_v57 = vmul.f32 %v1747_v51, %v4229_v9  ;;  %v1812_v38 = vmul.f32 %v1748_v17, %v4231_v14  ;;  %v1595_v6 = vunpack.c.l.bf16 %v1541_v41 }
 0x16a   : > { %v1062_v45 = vpop.f32.mrf.mxu3  ;;  %v966_v29 = vpop.f32.mrf.mxu1  ;;  %v1014_v3 = vadd.f32 %v1013_v40, %v4067_v10  ;;  %5137 = vst [vmem:[#allocation46_spill] sm:$0xff] %v4313_v23  ;;  %v1504_v40 = vmul.f32 0.044677734, %v4307_v35  ;;  %v918_v36 = vadd.f32 %v917_v1, %v4060_v5  ;;  %v1751_v32 = vunpack.c.l.bf16 %v1699_v26 }
 0x16b   : > { %v1507_v51 = vmul.f32 0.044677734, %v4329_v31  ;;  %v1752_v11 = vunpack.c.h.bf16 %v1699_v26  ;;  %v1857_v19 = vpack.c.bf16 %v1812_v38, %v1811_v57 }
 0x16c   : > { %v1063_v7 = vadd.f32 %v1062_v45, %v1014_v3  ;;  %v4331_v45 = vunpack.c.h.bf16 %v1289_v61  ;;  %v1543_v58 = vpack.c.bf16 %v1504_v40, %v1503_v0  ;;  %v1659_v40 = vmul.f32 %v1595_v6, %v4288_v21 }
 0x16e   : > { %v1291_v25 = vpack.c.bf16 %v1063_v7, %v965_v20  ;;  %v1596_v20 = vunpack.c.h.bf16 %v1541_v41  ;;  %v1508_v17 = vmul.f32 0.044677734, %v4331_v45 }
 0x170   : > { %v4336_v3 = vunpack.c.l.bf16 %v1291_v25  ;;  %v4338_v5 = vunpack.c.h.bf16 %v1291_v25  ;;  %v4346_v25 = vperm.slane %v4057_v4, 3  ;;  %v1968_v4 = vadd.f32 %v1904_v12, %v4190_v56 }
 0x171   : > { %v1015_v48 = vpop.f32.mrf.mxu2  ;;  %v1076_v2 = vpop.f32.mrf.mxu0  ;;  %v1545_v26 = vpack.c.bf16 %v1508_v17, %v1507_v51 }
 0x172   : > { %v1016_v24 = vadd.f32 %v1015_v48, %v4067_v10  ;;  %v1064_v50 = vpop.f32.mrf.mxu3  ;;  %v1125_v1 = vpop.f32.mrf.mxu1  ;;  %v1511_v61 = vmul.f32 0.044677734, %v4336_v3  ;;  %v1512_v7 = vmul.f32 0.044677734, %v4338_v5  ;;  %v967_v10 = vadd.f32 %v966_v29, %v918_v36 }
 0x173   : > { %v1077_v48 = vadd.f32 %v1076_v2, %v4327_v18  ;;  %v1600_v29 = vunpack.c.h.bf16 %v1543_v58  ;;  %v1603_v39 = vunpack.c.l.bf16 %v1545_v26  ;;  %v1604_v63 = vunpack.c.h.bf16 %v1545_v26 }
 0x174   : > { %v1065_v43 = vadd.f32 %v1064_v50, %v1016_v24  ;;  %v1547_v52 = vpack.c.bf16 %v1512_v7, %v1511_v61  ;;  %v1660_v24 = vmul.f32 %v1596_v20, %v4291_v59  ;;  %v1599_v50 = vunpack.c.l.bf16 %v1543_v58 }
 0x175   : > { %v1126_v0 = vadd.f32 %v1125_v1, %v1077_v48  ;;  %v1816_v48 = vmul.f32 %v1752_v11, %v4263_v42  ;;  %v1667_v26 = vmul.f32 %v1603_v39, %v4329_v31 }
 0x176   : > { %v1293_v41 = vpack.c.bf16 %v1065_v43, %v967_v10  ;;  %v1607_v36 = vunpack.c.l.bf16 %v1547_v52  ;;  %v1608_v2 = vunpack.c.h.bf16 %v1547_v52  ;;  %v1815_v10 = vmul.f32 %v1751_v32, %v4260_v60 }
 0x177   : > { %v1701_v12 = vpack.c.bf16 %v1660_v24, %v1659_v40  ;;  %v1663_v57 = vmul.f32 %v1599_v50, %v4305_v55 }
 0x178   : > { %v4350_v54 = vunpack.c.l.bf16 %v1293_v41  ;;  %v4352_v53 = vunpack.c.h.bf16 %v1293_v41  ;;  %v1671_v6 = vmul.f32 %v1607_v36, %v4336_v3  ;;  %v1672_v20 = vmul.f32 %v1608_v2, %v4338_v5 }
 0x179   : > { %v1174_v22 = vpop.f32.mrf.mxu2  ;;  %v1078_v61 = vpop.f32.mrf.mxu0  ;;  %v2015_v41 = vpack.c.bf16 %v1968_v4, %v1967_v30  ;;  %v1907_v36 = vunpack.c.l.bf16 %v1857_v19  ;;  %v1908_v2 = vunpack.c.h.bf16 %v1857_v19  ;;  %v1859_v32 = vpack.c.bf16 %v1816_v48, %v1815_v10 }
 0x17a   : > { %v1175_v43 = vadd.f32 %v1174_v22, %v4346_v25  ;;  %v1223_v1 = vpop.f32.mrf.mxu3  ;;  %v1515_v58 = vmul.f32 0.044677734, %v4350_v54  ;;  %v1516_v52 = vmul.f32 0.044677734, %v4352_v53  ;;  %v1127_v7 = vpop.f32.mrf.mxu1  ;;  %v1664_v22 = vmul.f32 %v1600_v29, %v4307_v35 }
 0x17b   : > { %v1079_v17 = vadd.f32 %v1078_v61, %v4327_v18  ;;  %v1707_v44 = vpack.c.bf16 %v1672_v20, %v1671_v6  ;;  %v1755_v13 = vunpack.c.l.bf16 %v1701_v12  ;;  %v1756_v24 = vunpack.c.h.bf16 %v1701_v12 }
 0x17c   : > { %v1549_v38 = vpack.c.bf16 %v1516_v52, %v1515_v58  ;;  %v1224_v51 = vadd.f32 %v1223_v1, %v1175_v43  ;;  %v1703_v50 = vpack.c.bf16 %v1664_v22, %v1663_v57  ;;  %v2063_v61 = vunpack.c.l.bf16 %v2015_v41 }
 0x17d   : > { %v1128_v40 = vadd.f32 %v1127_v7, %v1079_v17  ;;  %v2064_v30 = vunpack.c.h.bf16 %v2015_v41  ;;  %v1767_v4 = vunpack.c.l.bf16 %v1707_v44  ;;  %v1768_v19 = vunpack.c.h.bf16 %v1707_v44 }
 0x17e   : > { %v1611_v62 = vunpack.c.l.bf16 %v1549_v38  ;;  %v1612_v47 = vunpack.c.h.bf16 %v1549_v38  ;;  %v1264_v11 = vpack.c.bf16 %v1224_v51, %v1126_v0  ;;  %v1668_v58 = vmul.f32 %v1604_v63, %v4331_v45 }
 0x17f   : > { %v1911_v10 = vunpack.c.l.bf16 %v1859_v32  ;;  %v1819_v12 = vmul.f32 %v1755_v13, %v4288_v21  ;;  %v1820_v44 = vmul.f32 %v1756_v24, %v4291_v59  ;;  %v1759_v57 = vunpack.c.l.bf16 %v1703_v50 }
 0x180   : > { %v1675_v29 = vmul.f32 %v1611_v62, %v4350_v54  ;;  %v1676_v43 = vmul.f32 %v1612_v47, %v4352_v53  ;;  %v1971_v62 = vadd.f32 %v1907_v36, %v4229_v9  ;;  %v1972_v47 = vadd.f32 %v1908_v2, %v4231_v14 }
 0x181   : > { %v1176_v1 = vpop.f32.mrf.mxu2  ;;  %v1081_v20 = vpop.f32.mrf.mxu0  ;;  %v1760_v22 = vunpack.c.h.bf16 %v1703_v50  ;;  %v1831_v39 = vmul.f32 %v1767_v4, %v4336_v3  ;;  %v1832_v63 = vmul.f32 %v1768_v19, %v4338_v5  ;;  %v2060_v17 = vunpack.c.h.bf16 %v4301_v33 }
 0x182   : > { %v1225_v6 = vpop.f32.mrf.mxu3  ;;  %v1177_v0 = vadd.f32 %v1176_v1, %v4346_v25  ;;  %v1082_v52 = vadd.f32 %v1081_v20, %v4327_v18  ;;  %v1130_v7 = vpop.f32.mrf.mxu1  ;;  %v1709_v48 = vpack.c.bf16 %v1676_v43, %v1675_v29  ;;  %v1912_v41 = vunpack.c.h.bf16 %v1859_v32 }
 0x183   : > { %v1705_v36 = vpack.c.bf16 %v1668_v58, %v1667_v26  ;;  %v4378_v1 = vunpack.c.l.bf16 %v1264_v11  ;;  %v4380_v43 = vunpack.c.h.bf16 %v1264_v11  ;;  %v2127_v24 = vmul.f32 0.796875, %v2063_v61 }
 0x184   : > { %v1226_v38 = vadd.f32 %v1225_v6, %v1177_v0  ;;  %v1131_v51 = vadd.f32 %v1130_v7, %v1082_v52  ;;  %v1771_v2 = vunpack.c.l.bf16 %v1709_v48  ;;  %v1772_v29 = vunpack.c.h.bf16 %v1709_v48 }
 0x185   : > { %5139 = vst [vmem:[#allocation48_spill] sm:$0xff] %v4378_v1  ;;  %v2128_v50 = vmul.f32 0.796875, %v2064_v30  ;;  %v4384_v20 = vpack.c.bf16 %v1972_v47, %v1971_v62  ;;  %v1861_v4 = vpack.c.bf16 %v1820_v44, %v1819_v12  ;;  %v1975_v6 = vadd.f32 %v1911_v10, %v4260_v60 }
 0x186   : > { %5140 = vst [vmem:[#allocation49_spill] sm:$0xff] %v4380_v43  ;;  %v4382_v13 = vpack.c.bf16 %v1226_v38, %v1128_v40  ;;  %v1823_v0 = vmul.f32 %v1759_v57, %v4305_v55  ;;  %v1824_v32 = vmul.f32 %v1760_v22, %v4307_v35  ;;  %v1867_v26 = vpack.c.bf16 %v1832_v63, %v1831_v39 }
 0x187   : > { %v1976_v11 = vadd.f32 %v1912_v41, %v4263_v42  ;;  %v1763_v7 = vunpack.c.l.bf16 %v1705_v36  ;;  %v1764_v40 = vunpack.c.h.bf16 %v1705_v36  ;;  %v1457_v61 = vmul.f32 0.044677734, %v4378_v1 }
 0x188   : > { %v1835_v62 = vmul.f32 %v1771_v2, %v4350_v54  ;;  %v1836_v47 = vmul.f32 %v1772_v29, %v4352_v53  ;;  %v1458_v10 = vmul.f32 0.044677734, %v4380_v43  ;;  %v5141_v12 = vunpack.c.l.bf16 %v4301_v33 }
 0x189   : > { %v1179_v19 = vpop.f32.mrf.mxu2  ;;  %v1083_v52 = vpop.f32.mrf.mxu0  ;;  %v4399_v57 = vmul.f32 0.796875, %v2060_v17  ;;  %v1915_v22 = vunpack.c.l.bf16 %v1861_v4  ;;  %v1916_v39 = vunpack.c.h.bf16 %v1861_v4  ;;  %v1863_v63 = vpack.c.bf16 %v1824_v32, %v1823_v0 }
 0x18a   : > { %v1228_v58 = vpop.f32.mrf.mxu3  ;;  %v1132_v30 = vpop.f32.mrf.mxu1  ;;  %v1180_v48 = vadd.f32 %v1179_v19, %v4346_v25  ;;  %v4397_v44 = vmul.f32 0.796875, %v5141_v12  ;;  %v1927_v38 = vunpack.c.l.bf16 %v1867_v26  ;;  %v1928_v41 = vunpack.c.h.bf16 %v1867_v26 }
 0x18b   : > { %5143 = vst [vmem:[#allocation51_spill] sm:$0xff] %v4399_v57  ;;  %v2067_v2 = vunpack.c.l.bf16 %v4384_v20  ;;  %v1827_v29 = vmul.f32 %v1763_v7, %v4329_v31  ;;  %v1828_v16 = vmul.f32 %v1764_v40, %v4331_v45  ;;  %v1084_v19 = vadd.f32 %v1083_v52, %v4327_v18 }
 0x18c   : > { %5142 = vst [vmem:[#allocation50_spill] sm:$0xff] %v4397_v44  ;;  %v1229_v36 = vadd.f32 %v1228_v58, %v1180_v48  ;;  %v4405_v34 = vpack.c.bf16 %v2128_v50, %v2127_v24  ;;  %v4407_v33 = vpack.c.bf16 %v1976_v11, %v1975_v6  ;;  %v1869_v17 = vpack.c.bf16 %v1836_v47, %v1835_v62 }
 0x18d   : > { %v1520_v12 = vpack.c.bf16 %v1458_v10, %v1457_v61  ;;  %v1979_v4 = vadd.f32 %v1915_v22, %v4288_v21  ;;  %v1980_v0 = vadd.f32 %v1916_v39, %v4291_v59  ;;  %v1133_v26 = vadd.f32 %v1132_v30, %v1084_v19 }
 0x18e   : > { %5144 = vst [vmem:[#allocation52_spill] sm:$0xff] %v4405_v34  ;;  %v1268_v32 = vpack.c.bf16 %v1229_v36, %v1131_v51  ;;  %v1919_v48 = vunpack.c.l.bf16 %v1863_v63  ;;  %v1991_v7 = vadd.f32 %v1927_v38, %v4336_v3  ;;  %v1992_v40 = vadd.f32 %v1928_v41, %v4338_v5 }
 0x18f   : > { %v2068_v6 = vunpack.c.h.bf16 %v4384_v20  ;;  %v4415_v11 = vmul.f32 0.796875, %v2067_v2  ;;  %v1920_v61 = vunpack.c.h.bf16 %v1863_v63  ;;  %v1865_v62 = vpack.c.bf16 %v1828_v16, %v1827_v29 }
 0x190   : > { %v1931_v10 = vunpack.c.l.bf16 %v1869_v17  ;;  %v1932_v51 = vunpack.c.h.bf16 %v1869_v17  ;;  %v1553_v30 = vunpack.c.l.bf16 %v1520_v12  ;;  %v1554_v39 = vunpack.c.h.bf16 %v1520_v12 }
 0x191   : > { %v1181_v58 = vpop.f32.mrf.mxu2  ;;  %v1086_v50 = vpop.f32.mrf.mxu0  ;;  %5145 = vst [vmem:[#allocation53_spill] sm:$0xff] %v4415_v11  ;;  %v4417_v36 = vunpack.c.l.bf16 %v1268_v32  ;;  %v4419_v38 = vunpack.c.h.bf16 %v1268_v32  ;;  %v2071_v19 = vunpack.c.l.bf16 %v4407_v33  ;;  %v1983_v20 = vadd.f32 %v1919_v48, %v4305_v55 }
 0x192   : > { %v1182_v52 = vadd.f32 %v1181_v58, %v4346_v25  ;;  %v1230_v24 = vpop.f32.mrf.mxu3  ;;  %v1135_v47 = vpop.f32.mrf.mxu1  ;;  %v1087_v41 = vadd.f32 %v1086_v50, %v4327_v18  ;;  %v4423_v58 = vpack.c.bf16 %v1980_v0, %v1979_v4  ;;  %v2027_v63 = vpack.c.bf16 %v1992_v40, %v1991_v7 }
 0x193   : > { %5146 = vst [vmem:[#allocation54_spill] sm:$0xff] %v4417_v36  ;;  %v4427_v16 = vunpack.c.l.bf16 %v4382_v13  ;;  %v4430_v2 = vunpack.c.h.bf16 %v4382_v13  ;;  %v1984_v12 = vadd.f32 %v1920_v61, %v4307_v35  ;;  %v1923_v32 = vunpack.c.l.bf16 %v1865_v62 }
 0x194   : > { %v1231_v22 = vadd.f32 %v1230_v24, %v1182_v52  ;;  %5147 = vst [vmem:[#allocation55_spill] sm:$0xff] %v4419_v38  ;;  %v1136_v17 = vadd.f32 %v1135_v47, %v1087_v41  ;;  %v1995_v52 = vadd.f32 %v1931_v10, %v4350_v54  ;;  %v1996_v24 = vadd.f32 %v1932_v51, %v4352_v53 }
 0x195   : > { %5148 = vst [vmem:[#allocation56_spill] sm:$0xff] %v4427_v16  ;;  %v1617_v4 = vmul.f32 %v1553_v30, %v4378_v1  ;;  %v1618_v0 = vmul.f32 %v1554_v39, %v4380_v43  ;;  %v1465_v48 = vmul.f32 0.044677734, %v4417_v36  ;;  %v1466_v7 = vmul.f32 0.044677734, %v4419_v38 }
 0x196   : > { %5149 = vst [vmem:[#allocation57_spill] sm:$0xff] %v4430_v2  ;;  %v1270_v29 = vpack.c.bf16 %v1231_v22, %v1133_v26  ;;  %v1924_v13 = vunpack.c.h.bf16 %v1865_v62  ;;  %v2087_v50 = vunpack.c.l.bf16 %v2027_v63  ;;  %v2088_v26 = vunpack.c.h.bf16 %v2027_v63 }
 0x197   : > { %v2072_v10 = vunpack.c.h.bf16 %v4407_v33  ;;  %v2075_v51 = vunpack.c.l.bf16 %v4423_v58  ;;  %v1461_v30 = vmul.f32 0.044677734, %v4427_v16  ;;  %v1462_v39 = vmul.f32 0.044677734, %v4430_v2 }
 0x198   : > { %v4444_v23 = vmul.f32 0.796875, %v2068_v6  ;;  %v4446_v46 = vmul.f32 0.796875, %v2071_v19  ;;  %v2023_v62 = vpack.c.bf16 %v1984_v12, %v1983_v20  ;;  %v2029_v15 = vpack.c.bf16 %v1996_v24, %v1995_v52 }
 0x199   : > { %v1184_v40 = vpop.f32.mrf.mxu2  ;;  %v1088_v22 = vpop.f32.mrf.mxu0  ;;  %v1680_v63 = vpack.c.bf16 %v1618_v0, %v1617_v4  ;;  %v1524_v49 = vpack.c.bf16 %v1466_v7, %v1465_v48  ;;  %v1987_v33 = vadd.f32 %v1923_v32, %v4329_v31  ;;  %v1988_v37 = vadd.f32 %v1924_v13, %v4331_v45 }
 0x19a   : > { %v1185_v47 = vadd.f32 %v1184_v40, %v4346_v25  ;;  %v1233_v61 = vpop.f32.mrf.mxu3  ;;  %v1137_v41 = vpop.f32.mrf.mxu1  ;;  %5150 = vst [vmem:[#allocation58_spill] sm:$0xff] %v4444_v23  ;;  %v1089_v27 = vadd.f32 %v1088_v22, %v4327_v18  ;;  %v2151_v14 = vmul.f32 0.796875, %v2087_v50  ;;  %v2152_v9 = vmul.f32 0.796875, %v2088_v26 }
 0x19b   : > { %v4451_v56 = vmul.f32 0.796875, %v2072_v10  ;;  %v4454_v8 = vmul.f32 0.796875, %v2075_v51  ;;  %v1522_v19 = vpack.c.bf16 %v1462_v39, %v1461_v30  ;;  %v2091_v20 = vunpack.c.l.bf16 %v2029_v15 }
 0x19c   : > { %v1234_v40 = vadd.f32 %v1233_v61, %v1185_v47  ;;  %v2092_v12 = vunpack.c.h.bf16 %v2029_v15  ;;  %v1138_v24 = vadd.f32 %v1137_v41, %v1089_v27  ;;  %v1713_v4 = vunpack.c.l.bf16 %v1680_v63 }
 0x19d   : > { %v1714_v0 = vunpack.c.h.bf16 %v1680_v63  ;;  %v1561_v48 = vunpack.c.l.bf16 %v1524_v49  ;;  %v1562_v7 = vunpack.c.h.bf16 %v1524_v49  ;;  %v2079_v47 = vunpack.c.l.bf16 %v2023_v62 }
 0x19e   : > { %v1272_v52 = vpack.c.bf16 %v1234_v40, %v1136_v17  ;;  %v2025_v13 = vpack.c.bf16 %v1988_v37, %v1987_v33  ;;  %v2187_v50 = vpack.c.bf16 %v2152_v9, %v2151_v14  ;;  %v4457_v61 = vmul.f32 0.5, %v4336_v3 }
 0x19f   : > { %v1557_v22 = vunpack.c.l.bf16 %v1522_v19  ;;  %v1558_v10 = vunpack.c.h.bf16 %v1522_v19  ;;  %v2155_v27 = vmul.f32 0.796875, %v2091_v20  ;;  %v2156_v17 = vmul.f32 0.796875, %v2092_v12 }
 0x1a0   : > { %v4461_v39 = vunpack.c.l.bf16 %v1270_v29  ;;  %v4463_v49 = vunpack.c.h.bf16 %v1270_v29  ;;  %v1777_v37 = vmul.f32 %v1713_v4, %v4378_v1  ;;  %v1778_v9 = vmul.f32 %v1714_v0, %v4380_v43 }
 0x1a1   : > { %v1186_v32 = vpop.f32.mrf.mxu2  ;;  %v1091_v26 = vpop.f32.mrf.mxu0  ;;  %v1625_v14 = vmul.f32 %v1561_v48, %v4417_v36  ;;  %v1626_v3 = vmul.f32 %v1562_v7, %v4419_v38  ;;  %v2080_v63 = vunpack.c.h.bf16 %v2023_v62  ;;  %v2247_v19 = vunpack.c.l.bf16 %v2187_v50 }
 0x1a2   : > { %v1187_v51 = vadd.f32 %v1186_v32, %v4346_v25  ;;  %v1235_v30 = vpop.f32.mrf.mxu3  ;;  %v1092_v15 = vadd.f32 %v1091_v26, %v4327_v18  ;;  %5151 = vst [vmem:[#allocation59_spill] sm:$0xff] %v4461_v39  ;;  %v1140_v41 = vpop.f32.mrf.mxu1  ;;  %v1621_v20 = vmul.f32 %v1557_v22, %v4427_v16  ;;  %v1622_v12 = vmul.f32 %v1558_v10, %v4430_v2 }
 0x1a3   : > { %5152 = vst [vmem:[#allocation60_spill] sm:$0xff] %v4463_v49  ;;  %v1416_v29 = vmul.f32 0.5, %v4338_v5  ;;  %v2248_v32 = vunpack.c.h.bf16 %v2187_v50  ;;  %v2189_v26 = vpack.c.bf16 %v2156_v17, %v2155_v27  ;;  %v1469_v4 = vmul.f32 0.044677734, %v4461_v39 }
 0x1a4   : > { %v1236_v40 = vadd.f32 %v1235_v30, %v1187_v51  ;;  %v1141_v33 = vadd.f32 %v1140_v41, %v1092_v15  ;;  %v1470_v0 = vmul.f32 0.044677734, %v4463_v49  ;;  %v2143_v6 = vmul.f32 0.796875, %v2079_v47 }
 0x1a5   : > { %v2083_v7 = vunpack.c.l.bf16 %v2025_v13  ;;  %v1840_v28 = vpack.c.bf16 %v1778_v9, %v1777_v37  ;;  %v1684_v62 = vpack.c.bf16 %v1626_v3, %v1625_v14  ;;  %v2144_v30 = vmul.f32 0.796875, %v2080_v63 }
 0x1a6   : > { %v1274_v48 = vpack.c.bf16 %v1236_v40, %v1138_v24  ;;  %v4474_v15 = vunpack.c.l.bf16 %v1272_v52  ;;  %v4476_v22 = vunpack.c.h.bf16 %v1272_v52  ;;  %3444 = vtanh.f32 %v2247_v19 }
 0x1a7   : > { %v2084_v10 = vunpack.c.h.bf16 %v2025_v13  ;;  %v1682_v5 = vpack.c.bf16 %v1622_v12, %v1621_v20  ;;  %v1419_v50 = vmul.f32 0.5, %v4350_v54  ;;  %3446 = vtanh.f32 %v2248_v32 }
 0x1a8   : > { %v1526_v27 = vpack.c.bf16 %v1470_v0, %v1469_v4  ;;  %v1420_v47 = vmul.f32 0.5, %v4352_v53  ;;  %v2251_v37 = vunpack.c.l.bf16 %v2189_v26  ;;  %v2147_v9 = vmul.f32 0.796875, %v2083_v7 }
 0x1a9   : > { %v1189_v51 = vpop.f32.mrf.mxu2  ;;  %v1093_v24 = vpop.f32.mrf.mxu0  ;;  %v1873_v14 = vunpack.c.l.bf16 %v1840_v28  ;;  %v1721_v3 = vunpack.c.l.bf16 %v1684_v62  ;;  %v1722_v41 = vunpack.c.h.bf16 %v1684_v62  ;;  %v1473_v52 = vmul.f32 0.044677734, %v4474_v15 }
 0x1aa   : > { %v1190_v17 = vadd.f32 %v1189_v51, %v4346_v25  ;;  %v1238_v63 = vpop.f32.mrf.mxu3  ;;  %v1474_v13 = vmul.f32 0.044677734, %v4476_v22  ;;  %v2252_v19 = vunpack.c.h.bf16 %v2189_v26  ;;  %v2148_v54 = vmul.f32 0.796875, %v2084_v10  ;;  %v1142_v7 = vpop.f32.mrf.mxu1 }
 0x1ab   : > { %v1874_v20 = vunpack.c.h.bf16 %v1840_v28  ;;  %v1717_v12 = vunpack.c.l.bf16 %v1682_v5  ;;  %v1094_v32 = vadd.f32 %v1093_v24, %v4327_v18  ;;  %v1718_v0 = vunpack.c.h.bf16 %v1682_v5 }
 0x1ac   : > { %v1239_v40 = vadd.f32 %v1238_v63, %v1190_v17  ;;  %v3445_v4 = vpop.eup %3444  ;;  %v1565_v53 = vunpack.c.l.bf16 %v1526_v27  ;;  %v1566_v51 = vunpack.c.h.bf16 %v1526_v27  ;;  %3448 = vtanh.f32 %v2251_v37 }
 0x1ad   : > { %v3447_v57 = vpop.eup %3446  ;;  %v1785_v62 = vmul.f32 %v1721_v3, %v4417_v36  ;;  %v1786_v44 = vmul.f32 %v1722_v41, %v4419_v38  ;;  %v4486_v23 = vadd.f32 %v1142_v7, %v1094_v32  ;;  %v1937_v26 = vadd.f32 %v1873_v14, %v4378_v1 }
 0x1ae   : > { %v1276_v34 = vpack.c.bf16 %v1239_v40, %v1141_v33  ;;  %v1528_v28 = vpack.c.bf16 %v1474_v13, %v1473_v52  ;;  %v4490_v10 = vpack.c.bf16 %v1416_v29, %v4457_v61  ;;  %3450 = vtanh.f32 %v2252_v19 }
 0x1af   : > { %v1938_v5 = vadd.f32 %v1874_v20, %v4380_v43  ;;  %v1781_v27 = vmul.f32 %v1717_v12, %v4427_v16  ;;  %v4494_v17 = vunpack.c.l.bf16 %v1274_v48  ;;  %v4496_v24 = vunpack.c.h.bf16 %v1274_v48 }
 0x1b0   : > { %v1782_v37 = vmul.f32 %v1718_v0, %v4430_v2  ;;  %v1629_v33 = vmul.f32 %v1565_v53, %v4461_v39  ;;  %v1630_v3 = vmul.f32 %v1566_v51, %v4463_v49  ;;  %v2347_v14 = vpack.c.bf16 %v3447_v57, %v3445_v4 }
 0x1b1   : > { %5153 = vst [vmem:[#allocation61_spill] sm:$0xff] %v4496_v24  ;;  %v5154_v41 = vunpack.c.h.bf16 %v4423_v58  ;;  %v4505_v29 = vpack.c.bf16 %v2144_v30, %v2143_v6  ;;  %v4507_v63 = vpack.c.bf16 %v2148_v54, %v2147_v9  ;;  %v1844_v52 = vpack.c.bf16 %v1786_v44, %v1785_v62  ;;  %v1191_v58 = vpop.f32.mrf.mxu2 }
 0x1b2   : > { %v3449_v13 = vpop.eup %3448  ;;  %v1569_v40 = vunpack.c.l.bf16 %v1528_v28  ;;  %v1570_v48 = vunpack.c.h.bf16 %v1528_v28  ;;  %v1453_v19 = vpack.c.bf16 %v1420_v47, %v1419_v50  ;;  %v2567_v20 = vunpack.c.l.bf16 %v4490_v10 }
 0x1b3   : > { %v4503_v61 = vmul.f32 0.796875, %v5154_v41  ;;  %v1477_v12 = vmul.f32 0.044677734, %v4494_v17  ;;  %v1478_v32 = vmul.f32 0.044677734, %v4496_v24  ;;  %v2407_v57 = vunpack.c.l.bf16 %v2347_v14 }
 0x1b4   : > { %v2408_v4 = vunpack.c.h.bf16 %v2347_v14  ;;  %v3451_v0 = vpop.eup %3450  ;;  %v4512_v53 = vpack.c.bf16 %v1938_v5, %v1937_v26  ;;  %v1842_v6 = vpack.c.bf16 %v1782_v37, %v1781_v27  ;;  %v1686_v30 = vpack.c.bf16 %v1630_v3, %v1629_v33 }
 0x1b5   : > { %v4514_v9 = vunpack.c.l.bf16 %v1276_v34  ;;  %v1881_v44 = vunpack.c.l.bf16 %v1844_v52  ;;  %v4516_v54 = vunpack.c.h.bf16 %v1276_v34  ;;  %v2349_v50 = vpack.c.bf16 %v3451_v0, %v3449_v13 }
 0x1b6   : > { %v2471_v47 = vadd.f32 1.0, %v2407_v57  ;;  %v1633_v51 = vmul.f32 %v1569_v40, %v4474_v15  ;;  %v1634_v7 = vmul.f32 %v1570_v48, %v4476_v22  ;;  %v2472_v62 = vadd.f32 1.0, %v2408_v4  ;;  %v1240_v40 = vpop.f32.mrf.mxu3 }
 0x1b7   : > { %v1192_v28 = vadd.f32 %v1191_v58, %v4346_v25  ;;  %v1882_v14 = vunpack.c.h.bf16 %v1844_v52  ;;  %v1530_v41 = vpack.c.bf16 %v1478_v32, %v1477_v12  ;;  %v2411_v26 = vunpack.c.l.bf16 %v2349_v50 }
 0x1b8   : > { %v2412_v5 = vunpack.c.h.bf16 %v2349_v50  ;;  %v1877_v27 = vunpack.c.l.bf16 %v1842_v6  ;;  %v1725_v37 = vunpack.c.l.bf16 %v1686_v30  ;;  %v1726_v33 = vunpack.c.h.bf16 %v1686_v30 }
 0x1b9   : > { %v1481_v3 = vmul.f32 0.044677734, %v4514_v9  ;;  %v1482_v34 = vmul.f32 0.044677734, %v4516_v54  ;;  %v2475_v13 = vadd.f32 1.0, %v2411_v26  ;;  %v2507_v0 = vpack.c.bf16 %v2472_v62, %v2471_v47 }
 0x1ba   : > { %v2476_v57 = vadd.f32 1.0, %v2412_v5  ;;  %v1878_v43 = vunpack.c.h.bf16 %v1842_v6  ;;  %v1945_v48 = vadd.f32 %v1881_v44, %v4417_v36  ;;  %v1688_v4 = vpack.c.bf16 %v1634_v7, %v1633_v51 }
 0x1bb   : > { %v1241_v58 = vadd.f32 %v1240_v40, %v1192_v28  ;;  %v1946_v52 = vadd.f32 %v1882_v14, %v4419_v38  ;;  %v1573_v12 = vunpack.c.l.bf16 %v1530_v41  ;;  %v2631_v50 = vunpack.c.l.bf16 %v2507_v0 }
 0x1bc   : > { %v2509_v32 = vpack.c.bf16 %v2476_v57, %v2475_v13  ;;  %v1789_v30 = vmul.f32 %v1725_v37, %v4461_v39  ;;  %v1574_v1 = vunpack.c.h.bf16 %v1530_v41  ;;  %v2632_v11 = vunpack.c.h.bf16 %v2507_v0  ;;  %v1096_v41 = vpop.f32.mrf.mxu0 }
 0x1bd   : > { %v4527_v59 = vpack.c.bf16 %v1241_v58, %v4486_v23  ;;  %v1790_v47 = vmul.f32 %v1726_v33, %v4463_v49  ;;  %v1532_v62 = vpack.c.bf16 %v1482_v34, %v1481_v3  ;;  %v2571_v6 = vunpack.c.l.bf16 %v1453_v19 }
 0x1be   : > { %v2635_v26 = vunpack.c.l.bf16 %v2509_v32  ;;  %v1729_v44 = vunpack.c.l.bf16 %v1688_v4  ;;  %v2568_v51 = vunpack.c.h.bf16 %v4490_v10  ;;  %v2572_v7 = vunpack.c.h.bf16 %v1453_v19  ;;  %v1145_v10 = vpop.f32.mrf.mxu1 }
 0x1bf   : > { %v2636_v28 = vunpack.c.h.bf16 %v2509_v32  ;;  %v1730_v14 = vunpack.c.h.bf16 %v1688_v4  ;;  %v1637_v5 = vmul.f32 %v1573_v12, %v4494_v17  ;;  %v2695_v13 = vmul.f32 %v2631_v50, %v2567_v20 }
 0x1c0   : > { %v2699_v37 = vmul.f32 %v2635_v26, %v2571_v6  ;;  %v1638_v57 = vmul.f32 %v1574_v1, %v4496_v24  ;;  %v2696_v23 = vmul.f32 %v2632_v11, %v2568_v51  ;;  %v1097_v33 = vadd.f32 %v1096_v41, %v4327_v18 }
 0x1c1   : > { %v2700_v0 = vmul.f32 %v2636_v28, %v2572_v7  ;;  %v1941_v3 = vadd.f32 %v1877_v27, %v4427_v16  ;;  %v1577_v34 = vunpack.c.l.bf16 %v1532_v62  ;;  %v1578_v40 = vunpack.c.h.bf16 %v1532_v62  ;;  %v1194_v7 = vpop.f32.mrf.mxu2 }
 0x1c2   : > { %v2731_v58 = vpack.c.bf16 %v2699_v37, %v2695_v13  ;;  %v1942_v19 = vadd.f32 %v1878_v43, %v4430_v2  ;;  %v4536_v4 = vpack.c.bf16 %v1946_v52, %v1945_v48  ;;  %v1146_v20 = vadd.f32 %v1145_v10, %v1097_v33 }
 0x1c3   : > { %v2732_v12 = vpack.c.bf16 %v2700_v0, %v2696_v23  ;;  %v4540_v32 = vpack.c.bf16 %v4451_v56, %v4446_v46  ;;  %v1846_v1 = vpack.c.bf16 %v1790_v47, %v1789_v30  ;;  %v1793_v11 = vmul.f32 %v1729_v44, %v4474_v15 }
 0x1c4   : > { %v1794_v50 = vmul.f32 %v1730_v14, %v4476_v22  ;;  %2748 = vmatpush.bf16.xpose.msra.mxu0 %v2731_v58  ;;  %v2033_v27 = vunpack.c.l.bf16 %v4512_v53  ;;  %v1690_v62 = vpack.c.bf16 %v1638_v57, %v1637_v5  ;;  %v2239_v43 = vunpack.c.l.bf16 %v4505_v29 }
 0x1c5   : > { %2761 = vmatpush.bf16.xpose.msra.mxu1 %v2732_v12  ;;  %v2240_v48 = vunpack.c.h.bf16 %v4505_v29  ;;  %v1641_v52 = vmul.f32 %v1577_v34, %v4514_v9  ;;  %v1642_v6 = vmul.f32 %v1578_v40, %v4516_v54  ;;  %v2243_v56 = vunpack.c.l.bf16 %v4507_v63 }
 0x1c6   : > { %v2244_v46 = vunpack.c.h.bf16 %v4507_v63  ;;  %v4553_v30 = vpack.c.bf16 %v4503_v61, %v4454_v8  ;;  %v4555_v47 = vpack.c.bf16 %v1942_v19, %v1941_v3  ;;  %v2041_v26 = vunpack.c.l.bf16 %v4536_v4  ;;  %v1243_v3 = vpop.f32.mrf.mxu3 }
 0x1c7   : > { %3452 = vtanh.f32 %v2239_v43  ;;  %v1885_v44 = vunpack.c.l.bf16 %v1846_v1  ;;  %v1886_v51 = vunpack.c.h.bf16 %v1846_v1  ;;  %v4558_v29 = vpack.c.bf16 %v1794_v50, %v1793_v11 }
 0x1c8   : > { %3454 = vtanh.f32 %v2240_v48  ;;  %v2034_v28 = vunpack.c.h.bf16 %v4512_v53  ;;  %v1733_v14 = vunpack.c.l.bf16 %v1690_v62  ;;  %v1407_v63 = vmul.f32 0.5, %v4305_v55 }
 0x1c9   : > { %3456 = vtanh.f32 %v2243_v56  ;;  %v4562_v5 = vmul.f32 0.796875, %v2033_v27  ;;  %v1734_v8 = vunpack.c.h.bf16 %v1690_v62  ;;  %v1692_v61 = vpack.c.bf16 %v1642_v6, %v1641_v52  ;;  %v1098_v27 = vpop.f32.mrf.mxu0 }
 0x1ca   : > { %3458 = vtanh.f32 %v2244_v46  ;;  %v2042_v41 = vunpack.c.h.bf16 %v4536_v4  ;;  %v1195_v57 = vadd.f32 %v1194_v7, %v4346_v25  ;;  %v4568_v23 = vmul.f32 0.796875, %v2041_v26 }
 0x1cb   : > { %5155 = vst [vmem:[#allocation62_spill] sm:$0xff] %v4562_v5  ;;  %v4571_v0 = vadd.f32 %v1885_v44, %v4461_v39  ;;  %v4574_v55 = vadd.f32 %v1886_v51, %v4463_v49  ;;  %v1889_v33 = vunpack.c.l.bf16 %v4558_v29  ;;  %v1890_v40 = vunpack.c.h.bf16 %v4558_v29 }
 0x1cc   : > { %v1797_v58 = vmul.f32 %v1733_v14, %v4494_v17  ;;  %v4580_v10 = vunpack.c.l.bf16 %v4527_v59  ;;  %v1244_v19 = vadd.f32 %v1243_v3, %v1195_v57  ;;  %v1798_v1 = vmul.f32 %v1734_v8, %v4496_v24 }
 0x1cd   : > { %v3453_v34 = vpop.eup %3452  ;;  %v1737_v11 = vunpack.c.l.bf16 %v1692_v61  ;;  %v4584_v50 = vunpack.c.h.bf16 %v4527_v59  ;;  %v2231_v62 = vunpack.c.l.bf16 %v4540_v32  ;;  %v1738_v48 = vunpack.c.h.bf16 %v1692_v61  ;;  %v1147_v61 = vpop.f32.mrf.mxu1 }
 0x1ce   : > { %v3455_v12 = vpop.eup %3454  ;;  %v4587_v6 = vpack.c.bf16 %v1244_v19, %v1146_v20  ;;  %v2232_v56 = vunpack.c.h.bf16 %v4540_v32  ;;  %v1408_v26 = vmul.f32 0.5, %v4307_v35  ;;  %v1411_v44 = vmul.f32 0.5, %v4329_v31 }
 0x1cf   : > { %v3457_v43 = vpop.eup %3456  ;;  %v2343_v52 = vpack.c.bf16 %v3455_v12, %v3453_v34  ;;  %v1412_v51 = vmul.f32 0.5, %v4331_v45  ;;  %v1099_v59 = vadd.f32 %v1098_v27, %v4327_v18  ;;  %v1485_v29 = vmul.f32 0.044677734, %v4580_v10 }
 0x1d0   : > { %v3459_v46 = vpop.eup %3458  ;;  %v1486_v20 = vmul.f32 0.044677734, %v4584_v50  ;;  %v2235_v32 = vunpack.c.l.bf16 %v4553_v30  ;;  %3460 = vtanh.f32 %v2231_v62  ;;  %v2236_v31 = vunpack.c.h.bf16 %v4553_v30 }
 0x1d1   : > { %v2345_v7 = vpack.c.bf16 %v3459_v46, %v3457_v43  ;;  %v2399_v14 = vunpack.c.l.bf16 %v2343_v52  ;;  %v2400_v8 = vunpack.c.h.bf16 %v2343_v52  ;;  %v4596_v57 = vadd.f32 %v1147_v61, %v1099_v59 }
 0x1d2   : > { %3462 = vtanh.f32 %v2232_v56  ;;  %v1447_v45 = vpack.c.bf16 %v1408_v26, %v1407_v63  ;;  %v1449_v34 = vpack.c.bf16 %v1412_v51, %v1411_v44  ;;  %v4600_v27 = vpack.c.bf16 %v1798_v1, %v1797_v58 }
 0x1d3   : > { %v2403_v35 = vunpack.c.l.bf16 %v2345_v7  ;;  %v2404_v3 = vunpack.c.h.bf16 %v2345_v7  ;;  %v2463_v19 = vadd.f32 1.0, %v2399_v14  ;;  %v2464_v12 = vadd.f32 1.0, %v2400_v8 }
 0x1d4   : > { %v1801_v43 = vmul.f32 %v1737_v11, %v4514_v9  ;;  %v1802_v59 = vmul.f32 %v1738_v48, %v4516_v54  ;;  %v1534_v61 = vpack.c.bf16 %v1486_v20, %v1485_v29  ;;  %3464 = vtanh.f32 %v2235_v32  ;;  %v1196_v48 = vpop.f32.mrf.mxu2 }
 0x1d5   : > { %v2467_v52 = vadd.f32 1.0, %v2403_v35  ;;  %v2468_v46 = vadd.f32 1.0, %v2404_v3  ;;  %v2503_v37 = vpack.c.bf16 %v2464_v12, %v2463_v19  ;;  %v1953_v62 = vadd.f32 %v1889_v33, %v4474_v15 }
 0x1d6   : > { %v1954_v30 = vadd.f32 %v1890_v40, %v4476_v22  ;;  %3466 = vtanh.f32 %v2236_v31  ;;  %v3461_v63 = vpop.eup %3460  ;;  %v2559_v26 = vunpack.c.l.bf16 %v1447_v45  ;;  %v2563_v44 = vunpack.c.l.bf16 %v1449_v34 }
 0x1d7   : > { %v2505_v56 = vpack.c.bf16 %v2468_v46, %v2467_v52  ;;  %v2623_v58 = vunpack.c.l.bf16 %v2503_v37  ;;  %v2624_v1 = vunpack.c.h.bf16 %v2503_v37  ;;  %v2560_v7 = vunpack.c.h.bf16 %v1447_v45 }
 0x1d8   : > { %v3463_v51 = vpop.eup %3462  ;;  %v2564_v14 = vunpack.c.h.bf16 %v1449_v34  ;;  %v1893_v29 = vunpack.c.l.bf16 %v4600_v27  ;;  %v1852_v20 = vpack.c.bf16 %v1802_v59, %v1801_v43  ;;  %v1581_v32 = vunpack.c.l.bf16 %v1534_v61  ;;  %v5156_v43 = vld [vmem:[#allocation43_spill] sm:$0xff] }
 0x1d9   : > { %v2627_v11 = vunpack.c.l.bf16 %v2505_v56  ;;  %v2628_v8 = vunpack.c.h.bf16 %v2505_v56  ;;  %v1582_v33 = vunpack.c.h.bf16 %v1534_v61  ;;  %v2687_v35 = vmul.f32 %v2623_v58, %v2559_v26 }
 0x1da   : > { %v2688_v3 = vmul.f32 %v2624_v1, %v2560_v7  ;;  %v3465_v19 = vpop.eup %3464  ;;  %v1399_v12 = vmul.f32 0.5, %v4260_v60  ;;  %v1400_v37 = vmul.f32 0.5, %v4263_v42  ;;  %v2339_v52 = vpack.c.bf16 %v3463_v51, %v3461_v63  ;;  %v1245_v1 = vpop.f32.mrf.mxu3 }
 0x1db   : > { %v2691_v40 = vmul.f32 %v2627_v11, %v2563_v44  ;;  %v2692_v31 = vmul.f32 %v2628_v8, %v2564_v14  ;;  %v1197_v45 = vadd.f32 %v1196_v48, %v4346_v25  ;;  %v1403_v13 = vmul.f32 0.5, %v4288_v21 }
 0x1dc   : > { %v3467_v34 = vpop.eup %3466  ;;  %v1404_v59 = vmul.f32 0.5, %v5156_v43  ;;  %v1894_v61 = vunpack.c.h.bf16 %v4600_v27  ;;  %v1897_v26 = vunpack.c.l.bf16 %v1852_v20  ;;  %v2391_v58 = vunpack.c.l.bf16 %v2339_v52  ;;  %v5157_v43 = vld [vmem:[#allocation53_spill] sm:$0xff] }
 0x1dd   : > { %v2727_v46 = vpack.c.bf16 %v2691_v40, %v2687_v35  ;;  %v2728_v56 = vpack.c.bf16 %v2692_v31, %v2688_v3  ;;  %v2341_v44 = vpack.c.bf16 %v3467_v34, %v3465_v19  ;;  %v1898_v11 = vunpack.c.h.bf16 %v1852_v20 }
 0x1de   : > { %v1645_v60 = vmul.f32 %v1581_v32, %v4580_v10  ;;  %v2392_v42 = vunpack.c.h.bf16 %v2339_v52  ;;  %v1246_v63 = vadd.f32 %v1245_v1, %v1197_v45  ;;  %v1646_v51 = vmul.f32 %v1582_v33, %v4584_v50  ;;  %v5159_v1 = vld [vmem:[#allocation52_spill] sm:$0xff] }
 0x1df   : > { %2749 = vmatpush.bf16.xpose.msra.mxu0 %v2727_v46  ;;  %2762 = vmatpush.bf16.xpose.msra.mxu1 %v2728_v56  ;;  %v1443_v7 = vpack.c.bf16 %v1400_v37, %v1399_v12  ;;  %v2395_v14 = vunpack.c.l.bf16 %v2341_v44  ;;  %v2396_v21 = vunpack.c.h.bf16 %v2341_v44  ;;  %v1445_v8 = vpack.c.bf16 %v1404_v59, %v1403_v13  ;;  %v5158_v59 = vld [vmem:[#allocation58_spill] sm:$0xff] }
 0x1e0   : > { %v2455_v48 = vadd.f32 1.0, %v2391_v58  ;;  %v2456_v35 = vadd.f32 1.0, %v2392_v42  ;;  %v4616_v27 = vpack.c.bf16 %v1246_v63, %v4596_v57  ;;  %v2106_v20 = vmul.f32 0.796875, %v2042_v41 }
 0x1e1   : > { %v2006_v32 = vpack.c.bf16 %v4574_v55, %v4571_v0  ;;  %v2459_v40 = vadd.f32 1.0, %v2395_v14  ;;  %v2460_v3 = vadd.f32 1.0, %v2396_v21  ;;  %v2008_v31 = vpack.c.bf16 %v1954_v30, %v1953_v62 }
 0x1e2   : > { %v1957_v33 = vadd.f32 %v1893_v29, %v4494_v17  ;;  %v1958_v19 = vadd.f32 %v1894_v61, %v4496_v24  ;;  %v2499_v12 = vpack.c.bf16 %v2456_v35, %v2455_v48  ;;  %v1961_v13 = vadd.f32 %v1897_v26, %v4514_v9 }
 0x1e3   : > { %v1962_v37 = vadd.f32 %v1898_v11, %v4516_v54  ;;  %v1694_v57 = vpack.c.bf16 %v1646_v51, %v1645_v60  ;;  %v2501_v52 = vpack.c.bf16 %v2460_v3, %v2459_v40  ;;  %v2551_v45 = vunpack.c.l.bf16 %v1443_v7 }
 0x1e4   : > { %v2555_v4 = vunpack.c.l.bf16 %v1445_v8  ;;  %v2615_v41 = vunpack.c.l.bf16 %v2499_v12  ;;  %v2616_v34 = vunpack.c.h.bf16 %v2499_v12  ;;  %v2552_v0 = vunpack.c.h.bf16 %v1443_v7 }
 0x1e5   : > { %v2619_v46 = vunpack.c.l.bf16 %v2501_v52  ;;  %v2556_v55 = vunpack.c.h.bf16 %v1445_v8  ;;  %v2620_v56 = vunpack.c.h.bf16 %v2501_v52  ;;  %v4627_v62 = vunpack.c.l.bf16 %v4587_v6 }
 0x1e6   : > { %v4630_v30 = vunpack.c.h.bf16 %v4587_v6  ;;  %v2679_v29 = vmul.f32 %v2615_v41, %v2551_v45  ;;  %v2177_v61 = vpack.c.bf16 %v5158_v59, %v5157_v43  ;;  %v2680_v44 = vmul.f32 %v2616_v34, %v2552_v0  ;;  %v5168_v0 = vld [vmem:[#allocation50_spill] sm:$0xff] }
 0x1e7   : > { %v2683_v26 = vmul.f32 %v2619_v46, %v2555_v4  ;;  %v2684_v58 = vmul.f32 %v2620_v56, %v2556_v55  ;;  %v2223_v11 = vunpack.c.l.bf16 %v5159_v1  ;;  %v2045_v60 = vunpack.c.l.bf16 %v2006_v32  ;;  %v5169_v55 = vld [vmem:[#allocation51_spill] sm:$0xff] }
 0x1e8   : > { %v2010_v42 = vpack.c.bf16 %v1958_v19, %v1957_v33  ;;  %v2224_v63 = vunpack.c.h.bf16 %v5159_v1  ;;  %v2227_v51 = vunpack.c.l.bf16 %v2177_v61  ;;  %v1741_v7 = vunpack.c.l.bf16 %v1694_v57 }
 0x1e9   : > { %v1742_v14 = vunpack.c.h.bf16 %v1694_v57  ;;  %v2723_v21 = vpack.c.bf16 %v2683_v26, %v2679_v29  ;;  %v2724_v8 = vpack.c.bf16 %v2684_v58, %v2680_v44  ;;  %v2046_v6 = vunpack.c.h.bf16 %v2006_v32  ;;  %v5170_v26 = vld [vmem:[#allocation33_spill] sm:$0xff]  ;;  %v5171_v58 = vld [vmem:[#allocation47_spill] sm:$0xff] }
 0x1ea   : > { %v2049_v48 = vunpack.c.l.bf16 %v2008_v31  ;;  %v2228_v35 = vunpack.c.h.bf16 %v2177_v61  ;;  %3468 = vtanh.f32 %v2223_v11  ;;  %v4636_v40 = vpack.c.bf16 %v1962_v37, %v1961_v13 }
 0x1eb   : > { %v1489_v3 = vmul.f32 0.044677734, %v4627_v62  ;;  %v1490_v12 = vmul.f32 0.044677734, %v4630_v30  ;;  %2750 = vmatpush.bf16.xpose.msra.mxu0 %v2723_v21  ;;  %2763 = vmatpush.bf16.xpose.msra.mxu1 %v2724_v8  ;;  %3470 = vtanh.f32 %v2224_v63  ;;  %v2050_v33 = vunpack.c.h.bf16 %v2008_v31 }
 0x1ec   : > { %v2053_v19 = vunpack.c.l.bf16 %v2010_v42  ;;  %v2054_v52 = vunpack.c.h.bf16 %v2010_v42  ;;  %3472 = vtanh.f32 %v2227_v51  ;;  %v4642_v57 = vmul.f32 0.796875, %v2034_v28  ;;  %v5172_v42 = vld [vmem:[#allocation34_spill] sm:$0xff]  ;;  %v5173_v51 = vld [vmem:[#allocation35_spill] sm:$0xff] }
 0x1ed   : > { %v1805_v32 = vmul.f32 %v1741_v7, %v4580_v10  ;;  %v1806_v13 = vmul.f32 %v1742_v14, %v4584_v50  ;;  %3474 = vtanh.f32 %v2228_v35  ;;  %v5161_v37 = vunpack.c.l.bf16 %v4555_v47  ;;  %v5174_v14 = vld [vmem:[#allocation36_spill] sm:$0xff] }
 0x1ee   : > { %5160 = vst [vmem:[#allocation43_spill] sm:$0xff] %v4642_v57  ;;  %v5163_v4 = vunpack.c.h.bf16 %v4555_v47  ;;  %v4655_v31 = vpack.c.bf16 %v2106_v20, %v4568_v23  ;;  %v4657_v34 = vmul.f32 0.796875, %v2045_v60  ;;  %v4659_v53 = vmul.f32 0.796875, %v2046_v6  ;;  %v5194_v57 = vld [vmem:[#allocation24_spill] sm:$0xff] }
 0x1ef   : > { %v4648_v45 = vmul.f32 0.796875, %v5161_v37  ;;  %v2057_v28 = vunpack.c.l.bf16 %v4636_v40  ;;  %v4662_v46 = vpack.c.bf16 %v1490_v12, %v1489_v3  ;;  %v2173_v56 = vpack.c.bf16 %v5169_v55, %v5168_v0 }
 0x1f0   : > { %v4652_v41 = vmul.f32 0.796875, %v5163_v4  ;;  %5165 = vst [vmem:[#allocation52_spill] sm:$0xff] %v4655_v31  ;;  %v3469_v29 = vpop.eup %3468  ;;  %v4666_v43 = vmul.f32 0.796875, %v2049_v48  ;;  %v4668_v47 = vmul.f32 0.796875, %v2050_v33  ;;  %v4670_v59 = vmul.f32 0.796875, %v2053_v19  ;;  %v1101_v33 = vpop.f32.mrf.mxu0 }
 0x1f1   : > { %5162 = vst [vmem:[#allocation53_spill] sm:$0xff] %v4648_v45  ;;  %v4672_v23 = vmul.f32 0.796875, %v2054_v52  ;;  %v3471_v20 = vpop.eup %3470  ;;  %v4674_v61 = vpack.c.bf16 %v1806_v13, %v1805_v32  ;;  %v1391_v44 = vmul.f32 0.5, %v5170_v26  ;;  %v2215_v1 = vunpack.c.l.bf16 %v5171_v58  ;;  %v5176_v13 = vld [vmem:[#allocation28_spill] sm:$0xff] }
 0x1f2   : > { %5164 = vst [vmem:[#allocation58_spill] sm:$0xff] %v4652_v41  ;;  %v2216_v11 = vunpack.c.h.bf16 %v5171_v58  ;;  %v3473_v60 = vpop.eup %3472  ;;  %v1392_v63 = vmul.f32 0.5, %v5172_v42  ;;  %v1395_v7 = vmul.f32 0.5, %v5173_v51  ;;  %v1396_v21 = vmul.f32 0.5, %v5174_v14 }
 0x1f3   : > { %5166 = vst [vmem:[#allocation63_spill] sm:$0xff] %v4657_v34  ;;  %v2335_v8 = vpack.c.bf16 %v3471_v20, %v3469_v29  ;;  %v3475_v6 = vpop.eup %3474  ;;  %v4683_v35 = vmul.f32 0.796875, %v2057_v28  ;;  %v1585_v3 = vunpack.c.l.bf16 %v4662_v46  ;;  %v2219_v12 = vunpack.c.l.bf16 %v2173_v56  ;;  %v1199_v28 = vpop.f32.mrf.mxu2 }
 0x1f4   : > { %5167 = vst [vmem:[#allocation64_spill] sm:$0xff] %v4659_v53  ;;  %v2337_v19 = vpack.c.bf16 %v3475_v6, %v3473_v60  ;;  %v2220_v32 = vunpack.c.h.bf16 %v2173_v56  ;;  %3476 = vtanh.f32 %v2215_v1  ;;  %v1102_v37 = vadd.f32 %v1101_v33, %v4327_v18 }
 0x1f5   : > { %v2383_v52 = vunpack.c.l.bf16 %v2335_v8  ;;  %v2384_v4 = vunpack.c.h.bf16 %v2335_v8  ;;  %3478 = vtanh.f32 %v2216_v11  ;;  %v1439_v0 = vpack.c.bf16 %v1392_v63, %v1391_v44  ;;  %v1150_v44 = vpop.f32.mrf.mxu1 }
 0x1f6   : > { %v1441_v55 = vpack.c.bf16 %v1396_v21, %v1395_v7  ;;  %v2387_v29 = vunpack.c.l.bf16 %v2337_v19  ;;  %v2388_v20 = vunpack.c.h.bf16 %v2337_v19  ;;  %v1586_v26 = vunpack.c.h.bf16 %v4662_v46 }
 0x1f7   : > { %v2447_v58 = vadd.f32 1.0, %v2383_v52  ;;  %v2448_v42 = vadd.f32 1.0, %v2384_v4  ;;  %3480 = vtanh.f32 %v2219_v12  ;;  %v1649_v60 = vmul.f32 %v1585_v3, %v4627_v62 }
 0x1f8   : > { %v2451_v56 = vadd.f32 1.0, %v2387_v29  ;;  %v2452_v1 = vadd.f32 1.0, %v2388_v20  ;;  %3482 = vtanh.f32 %v2220_v32  ;;  %v4691_v51 = vunpack.c.l.bf16 %v4616_v27  ;;  %v1248_v29 = vpop.f32.mrf.mxu3  ;;  %v5175_v20 = vld [vmem:[#allocation27_spill] sm:$0xff] }
 0x1f9   : > { %v4694_v11 = vunpack.c.h.bf16 %v4616_v27  ;;  %v2495_v63 = vpack.c.bf16 %v2448_v42, %v2447_v58  ;;  %v1200_v7 = vadd.f32 %v1199_v28, %v4346_v25  ;;  %v1151_v46 = vadd.f32 %v1150_v44, %v1102_v37  ;;  %v5177_v28 = vld [vmem:[#allocation31_spill] sm:$0xff]  ;;  %v5178_v37 = vld [vmem:[#allocation32_spill] sm:$0xff] }
 0x1fa   : > { %v3477_v14 = vpop.eup %3476  ;;  %v2497_v21 = vpack.c.bf16 %v2452_v1, %v2451_v56  ;;  %v2543_v8 = vunpack.c.l.bf16 %v1439_v0  ;;  %v2547_v6 = vunpack.c.l.bf16 %v1441_v55  ;;  %v2544_v33 = vunpack.c.h.bf16 %v1439_v0 }
 0x1fb   : > { %v3479_v12 = vpop.eup %3478  ;;  %v2607_v3 = vunpack.c.l.bf16 %v2495_v63  ;;  %v2548_v19 = vunpack.c.h.bf16 %v1441_v55  ;;  %v2608_v52 = vunpack.c.h.bf16 %v2495_v63  ;;  %v1383_v27 = vmul.f32 0.5, %v5175_v20 }
 0x1fc   : > { %v2611_v32 = vunpack.c.l.bf16 %v2497_v21  ;;  %v2612_v4 = vunpack.c.h.bf16 %v2497_v21  ;;  %v1384_v48 = vmul.f32 0.5, %v5176_v13  ;;  %v1249_v42 = vadd.f32 %v1248_v29, %v1200_v7 }
 0x1fd   : > { %v3481_v58 = vpop.eup %3480  ;;  %v1387_v2 = vmul.f32 0.5, %v5177_v28  ;;  %v1388_v56 = vmul.f32 0.5, %v5178_v37  ;;  %v2331_v1 = vpack.c.bf16 %v3479_v12, %v3477_v14  ;;  %v2671_v16 = vmul.f32 %v2607_v3, %v2543_v8  ;;  %v1103_v8 = vpop.f32.mrf.mxu0 }
 0x1fe   : > { %v3483_v44 = vpop.eup %3482  ;;  %v2675_v49 = vmul.f32 %v2611_v32, %v2547_v6  ;;  %v2672_v0 = vmul.f32 %v2608_v52, %v2544_v33  ;;  %v2676_v55 = vmul.f32 %v2612_v4, %v2548_v19  ;;  %v1650_v63 = vmul.f32 %v1586_v26, %v4630_v30  ;;  %v1201_v3 = vpop.f32.mrf.mxu2 }
 0x1ff   : > { %v1493_v21 = vmul.f32 0.044677734, %v4691_v51  ;;  %v2333_v39 = vpack.c.bf16 %v3483_v44, %v3481_v58  ;;  %v2375_v20 = vunpack.c.l.bf16 %v2331_v1  ;;  %v1494_v13 = vmul.f32 0.044677734, %v4694_v11 }
 0x200   : > { %v2719_v38 = vpack.c.bf16 %v2675_v49, %v2671_v16  ;;  %v2720_v7 = vpack.c.bf16 %v2676_v55, %v2672_v0  ;;  %v2376_v29 = vunpack.c.h.bf16 %v2331_v1  ;;  %v5179_v28 = vunpack.c.h.bf16 %v4636_v40 }
 0x201   : > { %v1284_v14 = vpack.c.bf16 %v1249_v42, %v1151_v46  ;;  %v2379_v6 = vunpack.c.l.bf16 %v2333_v39  ;;  %v2380_v12 = vunpack.c.h.bf16 %v2333_v39  ;;  %v1435_v26 = vpack.c.bf16 %v1384_v48, %v1383_v27  ;;  %v1152_v48 = vpop.f32.mrf.mxu1 }
 0x202   : > { %v4706_v37 = vmul.f32 0.796875, %v5179_v28  ;;  %2751 = vmatpush.bf16.xpose.msra.mxu0 %v2719_v38  ;;  %2764 = vmatpush.bf16.xpose.msra.mxu1 %v2720_v7  ;;  %v1437_v33 = vpack.c.bf16 %v1388_v56, %v1387_v2  ;;  %v2439_v19 = vadd.f32 1.0, %v2375_v20  ;;  %v2440_v52 = vadd.f32 1.0, %v2376_v29 }
 0x203   : > { %v1902_v32 = vunpack.c.h.bf16 %v4674_v61  ;;  %v5180_v16 = vunpack.c.l.bf16 %v4674_v61  ;;  %v2443_v40 = vadd.f32 1.0, %v2379_v6  ;;  %v2444_v4 = vadd.f32 1.0, %v2380_v12 }
 0x204   : > { %v1696_v58 = vpack.c.bf16 %v1650_v63, %v1649_v60  ;;  %v1538_v46 = vpack.c.bf16 %v1494_v13, %v1493_v21  ;;  %v2491_v42 = vpack.c.bf16 %v2440_v52, %v2439_v19  ;;  %v1202_v39 = vadd.f32 %v1201_v3, %v4346_v25  ;;  %v1250_v63 = vpop.f32.mrf.mxu3 }
 0x205   : > { %v1965_v49 = vadd.f32 %v5180_v16, %v4580_v10  ;;  %v4713_v1 = vunpack.c.l.bf16 %v1284_v14  ;;  %v4715_v38 = vunpack.c.h.bf16 %v1284_v14  ;;  %v1104_v2 = vadd.f32 %v1103_v8, %v4327_v18  ;;  %v5181_v16 = vld [vmem:[#allocation45_spill] sm:$0xff] }
 0x206   : > { %v2493_v27 = vpack.c.bf16 %v2444_v4, %v2443_v40  ;;  %v2535_v56 = vunpack.c.l.bf16 %v1435_v26  ;;  %v2539_v44 = vunpack.c.l.bf16 %v1437_v33  ;;  %v2599_v0 = vunpack.c.l.bf16 %v2491_v42  ;;  %v5182_v40 = vld [vmem:[#allocation46_spill] sm:$0xff] }
 0x207   : > { %v2600_v61 = vunpack.c.h.bf16 %v2491_v42  ;;  %v2536_v20 = vunpack.c.h.bf16 %v1435_v26  ;;  %v2540_v7 = vunpack.c.h.bf16 %v1437_v33  ;;  %v1966_v21 = vadd.f32 %v1902_v32, %v4584_v50  ;;  %v1106_v32 = vpop.f32.mrf.mxu0 }
 0x208   : > { %v2603_v55 = vunpack.c.l.bf16 %v2493_v27  ;;  %v2604_v60 = vunpack.c.h.bf16 %v2493_v27  ;;  %v1745_v13 = vunpack.c.l.bf16 %v1696_v58  ;;  %v1746_v29 = vunpack.c.h.bf16 %v1696_v58 }
 0x209   : > { %v1251_v28 = vadd.f32 %v1250_v63, %v1202_v39  ;;  %v2663_v14 = vmul.f32 %v2599_v0, %v2535_v56  ;;  %v2664_v12 = vmul.f32 %v2600_v61, %v2536_v20  ;;  %v1589_v3 = vunpack.c.l.bf16 %v1538_v46  ;;  %v5183_v39 = vld [vmem:[#allocation44_spill] sm:$0xff] }
 0x20a   : > { %v2667_v6 = vmul.f32 %v2603_v55, %v2539_v44  ;;  %v2668_v8 = vmul.f32 %v2604_v60, %v2540_v7  ;;  %v1590_v19 = vunpack.c.h.bf16 %v1538_v46  ;;  %v1153_v52 = vadd.f32 %v1152_v48, %v1104_v2  ;;  %v1204_v55 = vpop.f32.mrf.mxu2 }
 0x20b   : > { %v2169_v4 = vpack.c.bf16 %v5182_v40, %v5181_v16  ;;  %v1497_v26 = vmul.f32 0.044677734, %v4713_v1  ;;  %v1498_v33 = vmul.f32 0.044677734, %v4715_v38  ;;  %v1107_v58 = vadd.f32 %v1106_v32, %v4327_v18  ;;  %v5186_v16 = vld [vmem:[#allocation42_spill] sm:$0xff] }
 0x20c   : > { %v2715_v42 = vpack.c.bf16 %v2667_v6, %v2663_v14  ;;  %v2716_v27 = vpack.c.bf16 %v2668_v8, %v2664_v12  ;;  %v2207_v56 = vunpack.c.l.bf16 %v5183_v39  ;;  %v2208_v44 = vunpack.c.h.bf16 %v5183_v39 }
 0x20d   : > { %v2211_v0 = vunpack.c.l.bf16 %v2169_v4  ;;  %v4726_v61 = vpack.c.bf16 %v1966_v21, %v1965_v49  ;;  %v1809_v46 = vmul.f32 %v1745_v13, %v4627_v62  ;;  %v1286_v2 = vpack.c.bf16 %v1251_v28, %v1153_v52  ;;  %v1155_v13 = vpop.f32.mrf.mxu1  ;;  %v5185_v52 = vld [vmem:[#allocation41_spill] sm:$0xff] }
 0x20e   : > { %2752 = vmatpush.bf16.xpose.msra.mxu0 %v2715_v42  ;;  %2765 = vmatpush.bf16.xpose.msra.mxu1 %v2716_v27  ;;  %v2212_v48 = vunpack.c.h.bf16 %v2169_v4  ;;  %v1810_v20 = vmul.f32 %v1746_v29, %v4630_v30  ;;  %v1653_v7 = vmul.f32 %v1589_v3, %v4691_v51  ;;  %v1654_v60 = vmul.f32 %v1590_v19, %v4694_v11  ;;  %v5184_v3 = vld [vmem:[#allocation40_spill] sm:$0xff]  ;;  %v5188_v27 = vld [vmem:[#allocation26_spill] sm:$0xff] }
 0x20f   : > { %3484 = vtanh.f32 %v2207_v56  ;;  %v4734_v63 = vpack.c.bf16 %v4668_v47, %v4666_v43  ;;  %v4738_v49 = vpack.c.bf16 %v4672_v23, %v4670_v59  ;;  %v1540_v21 = vpack.c.bf16 %v1498_v33, %v1497_v26  ;;  %v1253_v47 = vpop.f32.mrf.mxu3  ;;  %v5187_v33 = vld [vmem:[#allocation25_spill] sm:$0xff]  ;;  %v1108_v36 = vpop.f32.mrf.mxu0 }
 0x210   : > { %3486 = vtanh.f32 %v2208_v44  ;;  %v4742_v28 = vpack.c.bf16 %v4706_v37, %v4683_v35  ;;  %v1156_v29 = vadd.f32 %v1155_v13, %v1107_v58  ;;  %v1205_v14 = vadd.f32 %v1204_v55, %v4346_v25  ;;  %v5189_v58 = vld [vmem:[#allocation29_spill] sm:$0xff] }
 0x211   : > { %3488 = vtanh.f32 %v2211_v0  ;;  %v4746_v12 = vunpack.c.l.bf16 %v1286_v2  ;;  %v4748_v43 = vunpack.c.h.bf16 %v1286_v2  ;;  %v4750_v59 = vpack.c.bf16 %v1810_v20, %v1809_v46  ;;  %v5190_v2 = vld [vmem:[#allocation30_spill] sm:$0xff] }
 0x212   : > { %3490 = vtanh.f32 %v2212_v48  ;;  %v1698_v23 = vpack.c.bf16 %v1654_v60, %v1653_v7  ;;  %v1254_v8 = vadd.f32 %v1253_v47, %v1205_v14  ;;  %v2199_v19 = vunpack.c.l.bf16 %v5184_v3  ;;  %v1206_v5 = vpop.f32.mrf.mxu2 }
 0x213   : > { %v1593_v35 = vunpack.c.l.bf16 %v1540_v21  ;;  %v1594_v37 = vunpack.c.h.bf16 %v1540_v21  ;;  %v2165_v40 = vpack.c.bf16 %v5186_v16, %v5185_v52  ;;  %v2200_v4 = vunpack.c.h.bf16 %v5184_v3 }
 0x214   : > { %v1375_v42 = vmul.f32 0.5, %v5187_v33  ;;  %v1376_v32 = vmul.f32 0.5, %v5188_v27  ;;  %v1379_v39 = vmul.f32 0.5, %v5189_v58  ;;  %v1288_v56 = vpack.c.bf16 %v1254_v8, %v1156_v29 }
 0x215   : > { %v3485_v26 = vpop.eup %3484  ;;  %v1501_v0 = vmul.f32 0.044677734, %v4746_v12  ;;  %v1502_v46 = vmul.f32 0.044677734, %v4748_v43  ;;  %v1380_v48 = vmul.f32 0.5, %v5190_v2  ;;  %3492 = vtanh.f32 %v2199_v19 }
 0x216   : > { %v3487_v44 = vpop.eup %3486  ;;  %v1749_v20 = vunpack.c.l.bf16 %v1698_v23  ;;  %v4762_v60 = vunpack.c.l.bf16 %v1288_v56  ;;  %v2203_v21 = vunpack.c.l.bf16 %v2165_v40  ;;  %v1750_v14 = vunpack.c.h.bf16 %v1698_v23 }
 0x217   : > { %v3489_v55 = vpop.eup %3488  ;;  %v2327_v7 = vpack.c.bf16 %v3487_v44, %v3485_v26  ;;  %v4764_v47 = vunpack.c.h.bf16 %v1288_v56  ;;  %v2204_v3 = vunpack.c.h.bf16 %v2165_v40  ;;  %3494 = vtanh.f32 %v2200_v4 }
 0x218   : > { %v3491_v13 = vpop.eup %3490  ;;  %v1657_v29 = vmul.f32 %v1593_v35, %v4713_v1  ;;  %v1658_v33 = vmul.f32 %v1594_v37, %v4715_v38  ;;  %v4768_v19 = vpack.c.bf16 %v1502_v46, %v1501_v0  ;;  %v1431_v27 = vpack.c.bf16 %v1376_v32, %v1375_v42 }
 0x219   : > { %v2329_v8 = vpack.c.bf16 %v3491_v13, %v3489_v55  ;;  %v2367_v52 = vunpack.c.l.bf16 %v2327_v7  ;;  %v2368_v16 = vunpack.c.h.bf16 %v2327_v7  ;;  %v1433_v26 = vpack.c.bf16 %v1380_v48, %v1379_v39 }
 0x21a   : > { %v1505_v2 = vmul.f32 0.044677734, %v4762_v60  ;;  %3496 = vtanh.f32 %v2203_v21  ;;  %v1506_v4 = vmul.f32 0.044677734, %v4764_v47  ;;  %v4774_v55 = vmul.f32 %v1749_v20, %v4691_v51 }
 0x21b   : > { %v2371_v58 = vunpack.c.l.bf16 %v2329_v8  ;;  %v2372_v44 = vunpack.c.h.bf16 %v2329_v8  ;;  %v3493_v23 = vpop.eup %3492  ;;  %v2431_v56 = vadd.f32 1.0, %v2367_v52  ;;  %v2432_v40 = vadd.f32 1.0, %v2368_v16 }
 0x21c   : > { %3498 = vtanh.f32 %v2204_v3  ;;  %v4777_v32 = vmul.f32 %v1750_v14, %v4694_v11  ;;  %v4779_v39 = vpack.c.bf16 %v1658_v33, %v1657_v29  ;;  %v2527_v48 = vunpack.c.l.bf16 %v1431_v27  ;;  %v5191_v14 = vld [vmem:[#allocation21_spill] sm:$0xff]  ;;  %v5192_v33 = vld [vmem:[#allocation22_spill] sm:$0xff] }
 0x21d   : > { %v2435_v37 = vadd.f32 1.0, %v2371_v58  ;;  %v2436_v0 = vadd.f32 1.0, %v2372_v44  ;;  %v3495_v42 = vpop.eup %3494  ;;  %v2487_v46 = vpack.c.bf16 %v2432_v40, %v2431_v56  ;;  %v1597_v7 = vunpack.c.l.bf16 %v4768_v19  ;;  %v5193_v40 = vld [vmem:[#allocation23_spill] sm:$0xff] }
 0x21e   : > { %v2531_v13 = vunpack.c.l.bf16 %v1433_v26  ;;  %v2323_v3 = vpack.c.bf16 %v3495_v42, %v3493_v23  ;;  %v2528_v52 = vunpack.c.h.bf16 %v1431_v27  ;;  %v1544_v20 = vpack.c.bf16 %v1506_v4, %v1505_v2 }
 0x21f   : > { %v2489_v21 = vpack.c.bf16 %v2436_v0, %v2435_v37  ;;  %v2591_v8 = vunpack.c.l.bf16 %v2487_v46  ;;  %v2592_v16 = vunpack.c.h.bf16 %v2487_v46  ;;  %v2532_v44 = vunpack.c.h.bf16 %v1433_v26 }
 0x220   : > { %v3497_v6 = vpop.eup %3496  ;;  %v1367_v41 = vmul.f32 0.5, %v5191_v14  ;;  %v1368_v56 = vmul.f32 0.5, %v5192_v33  ;;  %v1371_v45 = vmul.f32 0.5, %v5193_v40  ;;  %v1372_v37 = vmul.f32 0.5, %v5194_v57 }
 0x221   : > { %v2595_v58 = vunpack.c.l.bf16 %v2489_v21  ;;  %v2596_v35 = vunpack.c.h.bf16 %v2489_v21  ;;  %v2359_v0 = vunpack.c.l.bf16 %v2323_v3  ;;  %v2655_v23 = vmul.f32 %v2591_v8, %v2527_v48 }
 0x222   : > { %v3499_v29 = vpop.eup %3498  ;;  %v2656_v27 = vmul.f32 %v2592_v16, %v2528_v52  ;;  %v1601_v2 = vunpack.c.l.bf16 %v1544_v20  ;;  %v1109_v4 = vadd.f32 %v1108_v36, %v4327_v18  ;;  %v2360_v21 = vunpack.c.h.bf16 %v2323_v3 }
 0x223   : > { %v2659_v42 = vmul.f32 %v2595_v58, %v2531_v13  ;;  %v2660_v46 = vmul.f32 %v2596_v35, %v2532_v44  ;;  %v2325_v26 = vpack.c.bf16 %v3499_v29, %v3497_v6  ;;  %v1602_v53 = vunpack.c.h.bf16 %v1544_v20  ;;  %v1157_v35 = vpop.f32.mrf.mxu1  ;;  %v1255_v20 = vpop.f32.mrf.mxu3 }
 0x224   : > { %v2423_v34 = vadd.f32 1.0, %v2359_v0  ;;  %v1598_v33 = vunpack.c.h.bf16 %v4768_v19  ;;  %v1427_v40 = vpack.c.bf16 %v1368_v56, %v1367_v41  ;;  %v1753_v48 = vunpack.c.l.bf16 %v4779_v39 }
 0x225   : > { %v2711_v31 = vpack.c.bf16 %v2659_v42, %v2655_v23  ;;  %v2712_v14 = vpack.c.bf16 %v2660_v46, %v2656_v27  ;;  %v2363_v24 = vunpack.c.l.bf16 %v2325_v26  ;;  %v2364_v57 = vunpack.c.h.bf16 %v2325_v26 }
 0x226   : > { %v1429_v13 = vpack.c.bf16 %v1372_v37, %v1371_v45  ;;  %v2424_v8 = vadd.f32 1.0, %v2360_v21  ;;  %v1207_v36 = vadd.f32 %v1206_v5, %v4346_v25  ;;  %v1754_v6 = vunpack.c.h.bf16 %v4779_v39 }
 0x227   : > { %2753 = vmatpush.bf16.xpose.msra.mxu0 %v2711_v31  ;;  %2766 = vmatpush.bf16.xpose.msra.mxu1 %v2712_v14  ;;  %v1158_v3 = vadd.f32 %v1157_v35, %v1109_v4  ;;  %v2427_v52 = vadd.f32 1.0, %v2363_v24  ;;  %v2428_v16 = vadd.f32 1.0, %v2364_v57  ;;  %v1665_v19 = vmul.f32 %v1601_v2, %v4762_v60  ;;  %v5196_v4 = vld [vmem:[#allocation39_spill] sm:$0xff]  ;;  %v1111_v57 = vpop.f32.mrf.mxu0 }
 0x228   : > { %v1666_v41 = vmul.f32 %v1602_v53, %v4764_v47  ;;  %v2483_v58 = vpack.c.bf16 %v2424_v8, %v2423_v34  ;;  %v1256_v44 = vadd.f32 %v1255_v20, %v1207_v36  ;;  %v1661_v31 = vmul.f32 %v1597_v7, %v4746_v12  ;;  %v5195_v34 = vld [vmem:[#allocation38_spill] sm:$0xff] }
 0x229   : > { %v1662_v29 = vmul.f32 %v1598_v33, %v4748_v43  ;;  %v2485_v45 = vpack.c.bf16 %v2428_v16, %v2427_v52  ;;  %v2519_v56 = vunpack.c.l.bf16 %v1427_v40  ;;  %v2523_v37 = vunpack.c.l.bf16 %v1429_v13 }
 0x22a   : > { %v2583_v5 = vunpack.c.l.bf16 %v2483_v58  ;;  %v2584_v0 = vunpack.c.h.bf16 %v2483_v58  ;;  %v1290_v39 = vpack.c.bf16 %v1256_v44, %v1158_v3  ;;  %v2520_v24 = vunpack.c.h.bf16 %v1427_v40  ;;  %v5197_v40 = vld [vmem:[#allocation37_spill] sm:$0xff]  ;;  %v1209_v3 = vpop.f32.mrf.mxu2 }
 0x22b   : > { %v2587_v23 = vunpack.c.l.bf16 %v2485_v45  ;;  %v2524_v42 = vunpack.c.h.bf16 %v1429_v13  ;;  %v2588_v27 = vunpack.c.h.bf16 %v2485_v45  ;;  %v1704_v46 = vpack.c.bf16 %v1666_v41, %v1665_v19 }
 0x22c   : > { %v4795_v2 = vunpack.c.l.bf16 %v1290_v39  ;;  %v4797_v53 = vunpack.c.h.bf16 %v1290_v39  ;;  %v2161_v7 = vpack.c.bf16 %v5196_v4, %v5195_v34  ;;  %v2647_v26 = vmul.f32 %v2583_v5, %v2519_v56  ;;  %v1160_v5 = vpop.f32.mrf.mxu1  ;;  %v1258_v39 = vpop.f32.mrf.mxu3 }
 0x22d   : > { %v2651_v21 = vmul.f32 %v2587_v23, %v2523_v37  ;;  %v2648_v14 = vmul.f32 %v2584_v0, %v2520_v24  ;;  %v2652_v33 = vmul.f32 %v2588_v27, %v2524_v42  ;;  %v2191_v13 = vunpack.c.l.bf16 %v5197_v40 }
 0x22e   : > { %v1509_v35 = vmul.f32 0.044677734, %v4795_v2  ;;  %v1510_v8 = vmul.f32 0.044677734, %v4797_v53  ;;  %v2192_v36 = vunpack.c.h.bf16 %v5197_v40  ;;  %v4805_v52 = vpack.c.bf16 %v1662_v29, %v1661_v31 }
 0x22f   : > { %v2707_v16 = vpack.c.bf16 %v2651_v21, %v2647_v26  ;;  %v2708_v20 = vpack.c.bf16 %v2652_v33, %v2648_v14  ;;  %v1112_v19 = vadd.f32 %v1111_v57, %v4327_v18  ;;  %v2195_v58 = vunpack.c.l.bf16 %v2161_v7  ;;  %v5199_v21 = vld [vmem:[#allocation18_spill] sm:$0xff] }
 0x230   : > { %v1546_v41 = vpack.c.bf16 %v1510_v8, %v1509_v35  ;;  %v2196_v44 = vunpack.c.h.bf16 %v2161_v7  ;;  %3500 = vtanh.f32 %v2191_v13  ;;  %v1906_v45 = vunpack.c.h.bf16 %v4750_v59  ;;  %v5198_v7 = vld [vmem:[#allocation17_spill] sm:$0xff] }
 0x231   : > { %v1761_v56 = vunpack.c.l.bf16 %v1704_v46  ;;  %v1762_v37 = vunpack.c.h.bf16 %v1704_v46  ;;  %2754 = vmatpush.bf16.xpose.msra.mxu0 %v2707_v16  ;;  %2767 = vmatpush.bf16.xpose.msra.mxu1 %v2708_v20  ;;  %3502 = vtanh.f32 %v2192_v36  ;;  %v4811_v31 = vpack.c.bf16 %v4777_v32, %v4774_v55  ;;  %v5202_v20 = vld [vmem:[#allocation20_spill] sm:$0xff] }
 0x232   : > { %v1605_v29 = vunpack.c.l.bf16 %v1546_v41  ;;  %v1606_v0 = vunpack.c.h.bf16 %v1546_v41  ;;  %3504 = vtanh.f32 %v2195_v58  ;;  %v1817_v23 = vmul.f32 %v1753_v48, %v4713_v1  ;;  %v1113_v41 = vpop.f32.mrf.mxu0 }
 0x233   : > { %v1818_v24 = vmul.f32 %v1754_v6, %v4715_v38  ;;  %v1757_v42 = vunpack.c.l.bf16 %v4805_v52  ;;  %3506 = vtanh.f32 %v2196_v44  ;;  %v1161_v34 = vadd.f32 %v1160_v5, %v1112_v19 }
 0x234   : > { %v1669_v27 = vmul.f32 %v1605_v29, %v4795_v2  ;;  %v1670_v46 = vmul.f32 %v1606_v0, %v4797_v53  ;;  %v1210_v4 = vadd.f32 %v1209_v3, %v4346_v25  ;;  %v1825_v55 = vmul.f32 %v1761_v56, %v4762_v60  ;;  %v5201_v3 = vld [vmem:[#allocation19_spill] sm:$0xff] }
 0x235   : > { %v1826_v32 = vmul.f32 %v1762_v37, %v4764_v47  ;;  %v1359_v26 = vmul.f32 0.5, %v5198_v7  ;;  %v1360_v48 = vmul.f32 0.5, %v5199_v21  ;;  %v5200_v6 = vunpack.c.l.bf16 %v4750_v59  ;;  %v1211_v37 = vpop.f32.mrf.mxu2 }
 0x236   : > { %v3501_v14 = vpop.eup %3500  ;;  %v4829_v57 = vadd.f32 %v1906_v45, %v4630_v30  ;;  %v1706_v35 = vpack.c.bf16 %v1670_v46, %v1669_v27  ;;  %v1259_v8 = vadd.f32 %v1258_v39, %v1210_v4  ;;  %v1909_v13 = vunpack.c.l.bf16 %v4811_v31 }
 0x237   : > { %v4826_v33 = vadd.f32 %v5200_v6, %v4627_v62  ;;  %v3503_v40 = vpop.eup %3502  ;;  %v4832_v36 = vpack.c.bf16 %v1818_v24, %v1817_v23  ;;  %v1363_v16 = vmul.f32 0.5, %v5201_v3  ;;  %v1364_v19 = vmul.f32 0.5, %v5202_v20 }
 0x238   : > { %v3505_v58 = vpop.eup %3504  ;;  %v1758_v59 = vunpack.c.h.bf16 %v4805_v52  ;;  %v4838_v44 = vmul.f32 %v1757_v42, %v4746_v12  ;;  %v2319_v45 = vpack.c.bf16 %v3503_v40, %v3501_v14  ;;  %v1292_v56 = vpack.c.bf16 %v1259_v8, %v1161_v34  ;;  %v1162_v34 = vpop.f32.mrf.mxu1 }
 0x239   : > { %v3507_v5 = vpop.eup %3506  ;;  %v4840_v29 = vpack.c.bf16 %v1826_v32, %v1825_v55  ;;  %v1423_v0 = vpack.c.bf16 %v1360_v48, %v1359_v26  ;;  %v1114_v39 = vadd.f32 %v1113_v41, %v4327_v18  ;;  %v1212_v23 = vadd.f32 %v1211_v37, %v4346_v25  ;;  %v1260_v26 = vpop.f32.mrf.mxu3 }
 0x23a   : > { %v1765_v24 = vunpack.c.l.bf16 %v1706_v35  ;;  %v1766_v27 = vunpack.c.h.bf16 %v1706_v35  ;;  %v2321_v46 = vpack.c.bf16 %v3507_v5, %v3505_v58  ;;  %v2351_v4 = vunpack.c.l.bf16 %v2319_v45 }
 0x23b   : > { %v1425_v7 = vpack.c.bf16 %v1364_v19, %v1363_v16  ;;  %v2352_v52 = vunpack.c.h.bf16 %v2319_v45  ;;  %v4844_v21 = vunpack.c.l.bf16 %v1292_v56  ;;  %v4846_v42 = vunpack.c.h.bf16 %v1292_v56 }
 0x23c   : > { %v2355_v14 = vunpack.c.l.bf16 %v2321_v46  ;;  %v2356_v6 = vunpack.c.h.bf16 %v2321_v46  ;;  %v2415_v55 = vadd.f32 1.0, %v2351_v4  ;;  %v1163_v32 = vadd.f32 %v1162_v34, %v1114_v39 }
 0x23d   : > { %v2416_v48 = vadd.f32 1.0, %v2352_v52  ;;  %v1513_v18 = vmul.f32 0.044677734, %v4844_v21  ;;  %v1514_v25 = vmul.f32 0.044677734, %v4846_v42  ;;  %v1261_v35 = vadd.f32 %v1260_v26, %v1212_v23 }
 0x23e   : > { %v1829_v8 = vmul.f32 %v1765_v24, %v4795_v2  ;;  %v1830_v40 = vmul.f32 %v1766_v27, %v4797_v53  ;;  %v2419_v3 = vadd.f32 1.0, %v2355_v14  ;;  %v2420_v16 = vadd.f32 1.0, %v2356_v6 }
 0x23f   : > { %v2479_v20 = vpack.c.bf16 %v2416_v48, %v2415_v55  ;;  %v2511_v19 = vunpack.c.l.bf16 %v1423_v0  ;;  %v1548_v41 = vpack.c.bf16 %v1514_v25, %v1513_v18  ;;  %v1294_v58 = vpack.c.bf16 %v1261_v35, %v1163_v32 }
 0x240   : > { %v2481_v45 = vpack.c.bf16 %v2420_v16, %v2419_v3  ;;  %v2515_v56 = vunpack.c.l.bf16 %v1425_v7  ;;  %v2512_v37 = vunpack.c.h.bf16 %v1423_v0  ;;  %v2516_v5 = vunpack.c.h.bf16 %v1425_v7 }
 0x241   : > { %v2575_v39 = vunpack.c.l.bf16 %v2479_v20  ;;  %v2576_v46 = vunpack.c.h.bf16 %v2479_v20  ;;  %v1609_v4 = vunpack.c.l.bf16 %v1548_v41  ;;  %v1610_v52 = vunpack.c.h.bf16 %v1548_v41 }
 0x242   : > { %v1866_v34 = vpack.c.bf16 %v1830_v40, %v1829_v8  ;;  %v2579_v23 = vunpack.c.l.bf16 %v2481_v45  ;;  %v2580_v26 = vunpack.c.h.bf16 %v2481_v45  ;;  %v4852_v24 = vunpack.c.l.bf16 %v1294_v58 }
 0x243   : > { %v1921_v27 = vunpack.c.l.bf16 %v4840_v29  ;;  %v1922_v14 = vunpack.c.h.bf16 %v4840_v29  ;;  %v1673_v6 = vmul.f32 %v1609_v4, %v4844_v21  ;;  %v1674_v55 = vmul.f32 %v1610_v52, %v4846_v42 }
 0x244   : > { %v2639_v32 = vmul.f32 %v2575_v39, %v2511_v19  ;;  %v2643_v0 = vmul.f32 %v2579_v23, %v2515_v56  ;;  %v2640_v7 = vmul.f32 %v2576_v46, %v2512_v37  ;;  %v2644_v48 = vmul.f32 %v2580_v26, %v2516_v5 }
 0x245   : > { %v1822_v18 = vmul.f32 %v1758_v59, %v4748_v43  ;;  %v1708_v25 = vpack.c.bf16 %v1674_v55, %v1673_v6  ;;  %v4859_v35 = vunpack.c.h.bf16 %v1294_v58  ;;  %v1517_v8 = vmul.f32 0.044677734, %v4852_v24 }
 0x246   : > { %v1925_v40 = vunpack.c.l.bf16 %v1866_v34  ;;  %v1926_v3 = vunpack.c.h.bf16 %v1866_v34  ;;  %v2703_v16 = vpack.c.bf16 %v2643_v0, %v2639_v32  ;;  %v2704_v20 = vpack.c.bf16 %v2644_v48, %v2640_v7 }
 0x247   : > { %v1910_v29 = vunpack.c.h.bf16 %v4811_v31  ;;  %v1769_v41 = vunpack.c.l.bf16 %v1708_v25  ;;  %v1770_v45 = vunpack.c.h.bf16 %v1708_v25  ;;  %v1518_v19 = vmul.f32 0.044677734, %v4859_v35 }
 0x248   : > { %v1913_v56 = vunpack.c.l.bf16 %v4832_v36  ;;  %v1914_v37 = vunpack.c.h.bf16 %v4832_v36  ;;  %v1985_v59 = vadd.f32 %v1921_v27, %v4762_v60  ;;  %v1986_v58 = vadd.f32 %v1922_v14, %v4764_v47  ;;  %2755 = vmatpush.bf16.xpose.msra.mxu0 %v2703_v16  ;;  %2768 = vmatpush.bf16.xpose.msra.mxu1 %v2704_v20 }
 0x249   : > { %v2062_v5 = vunpack.c.h.bf16 %v4726_v61  ;;  %v1833_v39 = vmul.f32 %v1769_v41, %v4844_v21  ;;  %v1834_v46 = vmul.f32 %v1770_v45, %v4846_v42  ;;  %v1550_v4 = vpack.c.bf16 %v1518_v19, %v1517_v8 }
 0x24a   : > { %v2016_v52 = vpack.c.bf16 %v4829_v57, %v4826_v33  ;;  %v1862_v34 = vpack.c.bf16 %v1822_v18, %v4838_v44  ;;  %v1989_v36 = vadd.f32 %v1925_v40, %v4795_v2  ;;  %v1990_v23 = vadd.f32 %v1926_v3, %v4797_v53 }
 0x24b   : > { %v1973_v26 = vadd.f32 %v1909_v13, %v4691_v51  ;;  %v1868_v27 = vpack.c.bf16 %v1834_v46, %v1833_v39  ;;  %v1613_v14 = vunpack.c.l.bf16 %v1550_v4  ;;  %v1614_v6 = vunpack.c.h.bf16 %v1550_v4 }
 0x24c   : > { %v1974_v55 = vadd.f32 %v1910_v29, %v4694_v11  ;;  %v1977_v32 = vadd.f32 %v1913_v56, %v4713_v1  ;;  %v1978_v0 = vadd.f32 %v1914_v37, %v4715_v38  ;;  %v2024_v33 = vpack.c.bf16 %v1986_v58, %v1985_v59 }
 0x24d   : > { %v1929_v57 = vunpack.c.l.bf16 %v1868_v27  ;;  %v1930_v44 = vunpack.c.h.bf16 %v1868_v27  ;;  %v1677_v7 = vmul.f32 %v1613_v14, %v4852_v24  ;;  %v1678_v48 = vmul.f32 %v1614_v6, %v4859_v35 }
 0x24e   : > { %v5203_v18 = vunpack.c.l.bf16 %v4726_v61  ;;  %v1917_v13 = vunpack.c.l.bf16 %v1862_v34  ;;  %v1918_v25 = vunpack.c.h.bf16 %v1862_v34  ;;  %v2026_v8 = vpack.c.bf16 %v1990_v23, %v1989_v36 }
 0x24f   : > { %v4888_v40 = vmul.f32 0.796875, %v2062_v5  ;;  %v1993_v3 = vadd.f32 %v1929_v57, %v4844_v21  ;;  %v1994_v16 = vadd.f32 %v1930_v44, %v4846_v42  ;;  %v1710_v20 = vpack.c.bf16 %v1678_v48, %v1677_v7 }
 0x250   : > { %v4886_v31 = vmul.f32 0.796875, %v5203_v18  ;;  %v2065_v29 = vunpack.c.l.bf16 %v2016_v52  ;;  %v2018_v41 = vpack.c.bf16 %v1974_v55, %v1973_v26  ;;  %v2081_v45 = vunpack.c.l.bf16 %v2024_v33 }
 0x251   : > { %v2082_v19 = vunpack.c.h.bf16 %v2024_v33  ;;  %v2020_v56 = vpack.c.bf16 %v1978_v0, %v1977_v32  ;;  %v2028_v37 = vpack.c.bf16 %v1994_v16, %v1993_v3  ;;  %v1773_v59 = vunpack.c.l.bf16 %v1710_v20 }
 0x252   : > { %v1774_v61 = vunpack.c.h.bf16 %v1710_v20  ;;  %v1981_v58 = vadd.f32 %v1917_v13, %v4746_v12  ;;  %v1982_v39 = vadd.f32 %v1918_v25, %v4748_v43  ;;  %v2085_v46 = vunpack.c.l.bf16 %v2026_v8 }
 0x253   : > { %v2086_v5 = vunpack.c.h.bf16 %v2026_v8  ;;  %v2089_v4 = vunpack.c.l.bf16 %v2028_v37  ;;  %v2090_v34 = vunpack.c.h.bf16 %v2028_v37  ;;  %v1837_v36 = vmul.f32 %v1773_v59, %v4852_v24 }
 0x254   : > { %v1838_v23 = vmul.f32 %v1774_v61, %v4859_v35  ;;  %v2066_v27 = vunpack.c.h.bf16 %v2016_v52  ;;  %v2069_v26 = vunpack.c.l.bf16 %v2018_v41  ;;  %v2145_v14 = vmul.f32 0.796875, %v2081_v45 }
 0x255   : > { %v2146_v6 = vmul.f32 0.796875, %v2082_v19  ;;  %v2070_v55 = vunpack.c.h.bf16 %v2018_v41  ;;  %v2153_v32 = vmul.f32 0.796875, %v2089_v4  ;;  %v2154_v0 = vmul.f32 0.796875, %v2090_v34 }
 0x256   : > { %v1870_v33 = vpack.c.bf16 %v1838_v23, %v1837_v36  ;;  %v2073_v57 = vunpack.c.l.bf16 %v2020_v56  ;;  %v2022_v44 = vpack.c.bf16 %v1982_v39, %v1981_v58  ;;  %v2149_v7 = vmul.f32 0.796875, %v2085_v46 }
 0x257   : > { %v2150_v48 = vmul.f32 0.796875, %v2086_v5  ;;  %v2074_v18 = vunpack.c.h.bf16 %v2020_v56  ;;  %v2188_v13 = vpack.c.bf16 %v2154_v0, %v2153_v32  ;;  %v2129_v3 = vmul.f32 0.796875, %v2065_v29 }
 0x258   : > { %v1933_v25 = vunpack.c.l.bf16 %v1870_v33  ;;  %v1934_v8 = vunpack.c.h.bf16 %v1870_v33  ;;  %v2130_v16 = vmul.f32 0.796875, %v2066_v27  ;;  %v2133_v20 = vmul.f32 0.796875, %v2069_v26 }
 0x259   : > { %v2184_v37 = vpack.c.bf16 %v2146_v6, %v2145_v14  ;;  %v2249_v41 = vunpack.c.l.bf16 %v2188_v13  ;;  %v2250_v19 = vunpack.c.h.bf16 %v2188_v13  ;;  %v2134_v59 = vmul.f32 0.796875, %v2070_v55 }
 0x25a   : > { %v1997_v52 = vadd.f32 %v1933_v25, %v4852_v24  ;;  %v1998_v45 = vadd.f32 %v1934_v8, %v4859_v35  ;;  %v2137_v61 = vmul.f32 0.796875, %v2073_v57  ;;  %v2077_v4 = vunpack.c.l.bf16 %v2022_v44 }
 0x25b   : > { %v2186_v58 = vpack.c.bf16 %v2150_v48, %v2149_v7  ;;  %v2138_v39 = vmul.f32 0.796875, %v2074_v18  ;;  %v2078_v46 = vunpack.c.h.bf16 %v2022_v44  ;;  %3508 = vtanh.f32 %v2249_v41 }
 0x25c   : > { %v2030_v56 = vpack.c.bf16 %v1998_v45, %v1997_v52  ;;  %v1417_v5 = vmul.f32 0.5, %v4844_v21  ;;  %v1418_v29 = vmul.f32 0.5, %v4846_v42  ;;  %v1421_v34 = vmul.f32 0.5, %v4852_v24 }
 0x25d   : > { %3510 = vtanh.f32 %v2250_v19  ;;  %v1422_v27 = vmul.f32 0.5, %v4859_v35  ;;  %v2241_v26 = vunpack.c.l.bf16 %v2184_v37  ;;  %v2141_v14 = vmul.f32 0.796875, %v2077_v4 }
 0x25e   : > { %v2093_v36 = vunpack.c.l.bf16 %v2030_v56  ;;  %v2094_v23 = vunpack.c.h.bf16 %v2030_v56  ;;  %v2242_v6 = vunpack.c.h.bf16 %v2184_v37  ;;  %v2245_v55 = vunpack.c.l.bf16 %v2186_v58 }
 0x25f   : > { %v2246_v32 = vunpack.c.h.bf16 %v2186_v58  ;;  %v2142_v0 = vmul.f32 0.796875, %v2078_v46  ;;  %3512 = vtanh.f32 %v2241_v26  ;;  %v4902_v44 = vpack.c.bf16 %v1418_v29, %v1417_v5 }
 0x260   : > { %v2157_v33 = vmul.f32 0.796875, %v2093_v36  ;;  %v2158_v57 = vmul.f32 0.796875, %v2094_v23  ;;  %v1409_v21 = vmul.f32 0.5, %v4762_v60  ;;  %v1410_v42 = vmul.f32 0.5, %v4764_v47 }
 0x261   : > { %3514 = vtanh.f32 %v2242_v6  ;;  %v3509_v24 = vpop.eup %3508  ;;  %v4908_v35 = vpack.c.bf16 %v4888_v40, %v4886_v31  ;;  %v4910_v48 = vpack.c.bf16 %v1422_v27, %v1421_v34  ;;  %v2180_v13 = vpack.c.bf16 %v2138_v39, %v2137_v61 }
 0x262   : > { %v2190_v7 = vpack.c.bf16 %v2158_v57, %v2157_v33  ;;  %3516 = vtanh.f32 %v2245_v55  ;;  %v1413_v25 = vmul.f32 0.5, %v4795_v2  ;;  %v1414_v8 = vmul.f32 0.5, %v4797_v53 }
 0x263   : > { %v3511_v18 = vpop.eup %3510  ;;  %3518 = vtanh.f32 %v2246_v32  ;;  %v4914_v60 = vpack.c.bf16 %v2130_v16, %v2129_v3  ;;  %v4916_v45 = vpack.c.bf16 %v2134_v59, %v2133_v20  ;;  %v2182_v31 = vpack.c.bf16 %v2142_v0, %v2141_v14 }
 0x264   : > { %v2253_v47 = vunpack.c.l.bf16 %v2190_v7  ;;  %v2254_v37 = vunpack.c.h.bf16 %v2190_v7  ;;  %v2348_v52 = vpack.c.bf16 %v3511_v18, %v3509_v24  ;;  %v2569_v40 = vunpack.c.l.bf16 %v4902_v44 }
 0x265   : > { %v4919_v41 = vpack.c.bf16 %v1410_v42, %v1409_v21  ;;  %v3513_v19 = vpop.eup %3512  ;;  %v2573_v2 = vunpack.c.l.bf16 %v4910_v48  ;;  %v4922_v3 = vpack.c.bf16 %v1414_v8, %v1413_v25  ;;  %v2233_v16 = vunpack.c.l.bf16 %v2180_v13 }
 0x266   : > { %3520 = vtanh.f32 %v2253_v47  ;;  %v2409_v61 = vunpack.c.l.bf16 %v2348_v52  ;;  %v2410_v4 = vunpack.c.h.bf16 %v2348_v52  ;;  %v2234_v58 = vunpack.c.h.bf16 %v2180_v13 }
 0x267   : > { %v3515_v53 = vpop.eup %3514  ;;  %3522 = vtanh.f32 %v2254_v37  ;;  %v2570_v46 = vunpack.c.h.bf16 %v4902_v44  ;;  %v2574_v29 = vunpack.c.h.bf16 %v4910_v48  ;;  %v2561_v34 = vunpack.c.l.bf16 %v4919_v41 }
 0x268   : > { %v3517_v39 = vpop.eup %3516  ;;  %v2473_v20 = vadd.f32 1.0, %v2409_v61  ;;  %v2474_v59 = vadd.f32 1.0, %v2410_v4  ;;  %v2344_v56 = vpack.c.bf16 %v3515_v53, %v3513_v19  ;;  %v2237_v36 = vunpack.c.l.bf16 %v2182_v31 }
 0x269   : > { %v3519_v5 = vpop.eup %3518  ;;  %3524 = vtanh.f32 %v2233_v16  ;;  %v2565_v6 = vunpack.c.l.bf16 %v4922_v3  ;;  %v1401_v55 = vmul.f32 0.5, %v4713_v1  ;;  %v2238_v32 = vunpack.c.h.bf16 %v2182_v31 }
 0x26a   : > { %v2508_v23 = vpack.c.bf16 %v2474_v59, %v2473_v20  ;;  %v2346_v27 = vpack.c.bf16 %v3519_v5, %v3517_v39  ;;  %v2401_v26 = vunpack.c.l.bf16 %v2344_v56  ;;  %v2402_v14 = vunpack.c.h.bf16 %v2344_v56 }
 0x26b   : > { %3526 = vtanh.f32 %v2234_v58  ;;  %v1402_v44 = vmul.f32 0.5, %v4715_v38  ;;  %v1405_v21 = vmul.f32 0.5, %v4746_v12  ;;  %v1406_v18 = vmul.f32 0.5, %v4748_v43 }
 0x26c   : > { %v3521_v0 = vpop.eup %3520  ;;  %v2405_v33 = vunpack.c.l.bf16 %v2346_v27  ;;  %v2406_v57 = vunpack.c.h.bf16 %v2346_v27  ;;  %v2465_v24 = vadd.f32 1.0, %v2401_v26  ;;  %v2466_v7 = vadd.f32 1.0, %v2402_v14 }
 0x26d   : > { %v3523_v42 = vpop.eup %3522  ;;  %3528 = vtanh.f32 %v2237_v36  ;;  %v2633_v25 = vunpack.c.l.bf16 %v2508_v23  ;;  %v2562_v1 = vunpack.c.h.bf16 %v4919_v41  ;;  %v2634_v37 = vunpack.c.h.bf16 %v2508_v23 }
 0x26e   : > { %v2350_v13 = vpack.c.bf16 %v3523_v42, %v3521_v0  ;;  %v2469_v8 = vadd.f32 1.0, %v2405_v33  ;;  %v2470_v52 = vadd.f32 1.0, %v2406_v57  ;;  %v2504_v31 = vpack.c.bf16 %v2466_v7, %v2465_v24 }
 0x26f   : > { %v3525_v47 = vpop.eup %3524  ;;  %3530 = vtanh.f32 %v2238_v32  ;;  %v2566_v12 = vunpack.c.h.bf16 %v4922_v3  ;;  %v4934_v61 = vpack.c.bf16 %v1402_v44, %v1401_v55  ;;  %v4936_v43 = vpack.c.bf16 %v1406_v18, %v1405_v21 }
 0x270   : > { %v2413_v19 = vunpack.c.l.bf16 %v2350_v13  ;;  %v2414_v38 = vunpack.c.h.bf16 %v2350_v13  ;;  %v2506_v53 = vpack.c.bf16 %v2470_v52, %v2469_v8  ;;  %v1393_v16 = vmul.f32 0.5, %v4627_v62 }
 0x271   : > { %v3527_v4 = vpop.eup %3526  ;;  %v1394_v58 = vmul.f32 0.5, %v4630_v30  ;;  %v2697_v59 = vmul.f32 %v2633_v25, %v2569_v40  ;;  %v2698_v36 = vmul.f32 %v2634_v37, %v2570_v46  ;;  %v2625_v23 = vunpack.c.l.bf16 %v2504_v31 }
 0x272   : > { %v2477_v39 = vadd.f32 1.0, %v2413_v19  ;;  %v2478_v20 = vadd.f32 1.0, %v2414_v38  ;;  %v2340_v56 = vpack.c.bf16 %v3527_v4, %v3525_v47  ;;  %v2629_v27 = vunpack.c.l.bf16 %v2506_v53 }
 0x273   : > { %v3529_v5 = vpop.eup %3528  ;;  %v2630_v26 = vunpack.c.h.bf16 %v2506_v53  ;;  %v2626_v14 = vunpack.c.h.bf16 %v2504_v31  ;;  %v1397_v33 = vmul.f32 0.5, %v4691_v51  ;;  %v1398_v62 = vmul.f32 0.5, %v4694_v11 }
 0x274   : > { %v2510_v3 = vpack.c.bf16 %v2478_v20, %v2477_v39  ;;  %v2393_v55 = vunpack.c.l.bf16 %v2340_v56  ;;  %v2394_v32 = vunpack.c.h.bf16 %v2340_v56  ;;  %v4942_v57 = vpack.c.bf16 %v1394_v58, %v1393_v16 }
 0x275   : > { %v3531_v0 = vpop.eup %3530  ;;  %v2225_v30 = vunpack.c.l.bf16 %v4914_v60  ;;  %v2693_v42 = vmul.f32 %v2629_v27, %v2565_v6  ;;  %v2694_v24 = vmul.f32 %v2630_v26, %v2566_v12  ;;  %v2226_v18 = vunpack.c.h.bf16 %v4914_v60 }
 0x276   : > { %v2637_v40 = vunpack.c.l.bf16 %v2510_v3  ;;  %v2638_v44 = vunpack.c.h.bf16 %v2510_v3  ;;  %v2342_v21 = vpack.c.bf16 %v3531_v0, %v3529_v5  ;;  %v2457_v46 = vadd.f32 1.0, %v2393_v55 }
 0x277   : > { %v2458_v7 = vadd.f32 1.0, %v2394_v32  ;;  %v2229_v47 = vunpack.c.l.bf16 %v4916_v45  ;;  %v2230_v37 = vunpack.c.h.bf16 %v4916_v45  ;;  %3532 = vtanh.f32 %v2225_v30 }
 0x278   : > { %v2701_v13 = vmul.f32 %v2637_v40, %v2573_v2  ;;  %v2702_v51 = vmul.f32 %v2638_v44, %v2574_v29  ;;  %v2397_v11 = vunpack.c.l.bf16 %v2342_v21  ;;  %v2398_v25 = vunpack.c.h.bf16 %v2342_v21 }
 0x279   : > { %v2500_v8 = vpack.c.bf16 %v2458_v7, %v2457_v46  ;;  %v2689_v60 = vmul.f32 %v2625_v23, %v2561_v34  ;;  %v2553_v2 = vunpack.c.l.bf16 %v4934_v61  ;;  %v2557_v48 = vunpack.c.l.bf16 %v4936_v43 }
 0x27a   : > { %v2733_v52 = vpack.c.bf16 %v2701_v13, %v2697_v59  ;;  %v2734_v6 = vpack.c.bf16 %v2702_v51, %v2698_v36  ;;  %v2461_v31 = vadd.f32 1.0, %v2397_v11  ;;  %v2462_v19 = vadd.f32 1.0, %v2398_v25 }
 0x27b   : > { %3534 = vtanh.f32 %v2226_v18  ;;  %v2690_v29 = vmul.f32 %v2626_v14, %v2562_v1  ;;  %v4956_v12 = vpack.c.bf16 %v1398_v62, %v1397_v33  ;;  %v2729_v45 = vpack.c.bf16 %v2693_v42, %v2689_v60 }
 0x27c   : > { %2774 = vmatpush.bf16.xpose.msra.mxu2 %v2733_v52  ;;  %2787 = vmatpush.bf16.xpose.msra.mxu3 %v2734_v6  ;;  %v2502_v38 = vpack.c.bf16 %v2462_v19, %v2461_v31  ;;  %3536 = vtanh.f32 %v2229_v47  ;;  %v2554_v4 = vunpack.c.h.bf16 %v4934_v61  ;;  %v2558_v53 = vunpack.c.h.bf16 %v4936_v43 }
 0x27d   : > { %3538 = vtanh.f32 %v2230_v37  ;;  %v2730_v41 = vpack.c.bf16 %v2694_v24, %v2690_v29  ;;  %v2617_v34 = vunpack.c.l.bf16 %v2500_v8  ;;  %v2618_v16 = vunpack.c.h.bf16 %v2500_v8  ;;  %v3533_v39 = vpop.eup %3532 }
 0x27e   : > { %v2545_v58 = vunpack.c.l.bf16 %v4942_v57  ;;  %v2621_v20 = vunpack.c.l.bf16 %v2502_v38  ;;  %v2622_v59 = vunpack.c.h.bf16 %v2502_v38  ;;  %v2217_v1 = vunpack.c.l.bf16 %v4742_v28 }
 0x27f   : > { %v2218_v56 = vunpack.c.h.bf16 %v4742_v28  ;;  %v2549_v5 = vunpack.c.l.bf16 %v4956_v12  ;;  %v1385_v36 = vmul.f32 0.5, %v4514_v9  ;;  %v1386_v61 = vmul.f32 0.5, %v4516_v54 }
 0x280   : > { %v2221_v43 = vunpack.c.l.bf16 %v4908_v35  ;;  %v1389_v27 = vmul.f32 0.5, %v4580_v10  ;;  %v1390_v26 = vmul.f32 0.5, %v4584_v50  ;;  %v2222_v3 = vunpack.c.h.bf16 %v4908_v35 }
 0x281   : > { %v3535_v23 = vpop.eup %3534  ;;  %3540 = vtanh.f32 %v2217_v1  ;;  %v2681_v55 = vmul.f32 %v2617_v34, %v2553_v2  ;;  %v2546_v28 = vunpack.c.h.bf16 %v4942_v57  ;;  %v2685_v9 = vmul.f32 %v2621_v20, %v2557_v48 }
 0x282   : > { %v3537_v14 = vpop.eup %3536  ;;  %v2336_v32 = vpack.c.bf16 %v3535_v23, %v3533_v39  ;;  %3542 = vtanh.f32 %v2218_v56  ;;  %v2682_v33 = vmul.f32 %v2618_v16, %v2554_v4  ;;  %v2686_v54 = vmul.f32 %v2622_v59, %v2558_v53 }
 0x283   : > { %v3539_v0 = vpop.eup %3538  ;;  %3544 = vtanh.f32 %v2221_v43  ;;  %v2550_v50 = vunpack.c.h.bf16 %v4956_v12  ;;  %v4972_v35 = vpack.c.bf16 %v1386_v61, %v1385_v36  ;;  %v4974_v40 = vpack.c.bf16 %v1390_v26, %v1389_v27  ;;  %v5204_v43 = vld [vmem:[#allocation61_spill] sm:$0xff]  ;;  %v5206_v27 = vld [vmem:[#allocation64_spill] sm:$0xff] }
 0x284   : > { %2775 = vmatpush.bf16.xpose.msra.mxu2 %v2729_v45  ;;  %2788 = vmatpush.bf16.xpose.msra.mxu3 %v2730_v41  ;;  %v2338_v62 = vpack.c.bf16 %v3539_v0, %v3537_v14  ;;  %v2385_v10 = vunpack.c.l.bf16 %v2336_v32  ;;  %v2386_v30 = vunpack.c.h.bf16 %v2336_v32  ;;  %3546 = vtanh.f32 %v2222_v3 }
 0x285   : > { %v1377_v44 = vmul.f32 0.5, %v4474_v15  ;;  %v2725_v18 = vpack.c.bf16 %v2685_v9, %v2681_v55  ;;  %v2726_v13 = vpack.c.bf16 %v2686_v54, %v2682_v33  ;;  %v2209_v51 = vunpack.c.l.bf16 %v4734_v63 }
 0x286   : > { %v2389_v21 = vunpack.c.l.bf16 %v2338_v62  ;;  %v2390_v46 = vunpack.c.h.bf16 %v2338_v62  ;;  %v2449_v42 = vadd.f32 1.0, %v2385_v10  ;;  %v2450_v24 = vadd.f32 1.0, %v2386_v30 }
 0x287   : > { %v3541_v7 = vpop.eup %3540  ;;  %v2210_v11 = vunpack.c.h.bf16 %v4734_v63  ;;  %v2213_v52 = vunpack.c.l.bf16 %v4738_v49  ;;  %v1378_v15 = vmul.f32 0.5, %v4476_v22  ;;  %v2214_v19 = vunpack.c.h.bf16 %v4738_v49 }
 0x288   : > { %v3543_v25 = vpop.eup %3542  ;;  %v2453_v8 = vadd.f32 1.0, %v2389_v21  ;;  %v2454_v47 = vadd.f32 1.0, %v2390_v46  ;;  %v2496_v37 = vpack.c.bf16 %v2450_v24, %v2449_v42  ;;  %3548 = vtanh.f32 %v2209_v51  ;;  %v5207_v21 = vld [vmem:[#allocation52_spill] sm:$0xff] }
 0x289   : > { %v3545_v6 = vpop.eup %3544  ;;  %v2332_v31 = vpack.c.bf16 %v3543_v25, %v3541_v7  ;;  %3550 = vtanh.f32 %v2210_v11  ;;  %v1381_v4 = vmul.f32 0.5, %v4494_v17  ;;  %v1382_v23 = vmul.f32 0.5, %v5204_v43 }
 0x28a   : > { %v3547_v60 = vpop.eup %3546  ;;  %v2498_v2 = vpack.c.bf16 %v2454_v47, %v2453_v8  ;;  %v2609_v48 = vunpack.c.l.bf16 %v2496_v37  ;;  %v2610_v29 = vunpack.c.h.bf16 %v2496_v37  ;;  %3552 = vtanh.f32 %v2213_v52 }
 0x28b   : > { %v2334_v38 = vpack.c.bf16 %v3547_v60, %v3545_v6  ;;  %v2377_v63 = vunpack.c.l.bf16 %v2332_v31  ;;  %v2378_v45 = vunpack.c.h.bf16 %v2332_v31  ;;  %3554 = vtanh.f32 %v2214_v19  ;;  %v5209_v19 = vld [vmem:[#allocation43_spill] sm:$0xff] }
 0x28c   : > { %2776 = vmatpush.bf16.xpose.msra.mxu2 %v2725_v18  ;;  %2789 = vmatpush.bf16.xpose.msra.mxu3 %v2726_v13  ;;  %v2613_v53 = vunpack.c.l.bf16 %v2498_v2  ;;  %v2673_v41 = vmul.f32 %v2609_v48, %v2545_v58  ;;  %v2614_v22 = vunpack.c.h.bf16 %v2498_v2  ;;  %v2674_v59 = vmul.f32 %v2610_v29, %v2546_v28  ;;  %v5205_v58 = vld [vmem:[#allocation63_spill] sm:$0xff]  ;;  %v5210_v29 = vld [vmem:[#allocation53_spill] sm:$0xff] }
 0x28d   : > { %v2381_v49 = vunpack.c.l.bf16 %v2334_v38  ;;  %v2382_v34 = vunpack.c.h.bf16 %v2334_v38  ;;  %v2441_v16 = vadd.f32 1.0, %v2377_v63  ;;  %v2442_v39 = vadd.f32 1.0, %v2378_v45  ;;  %v2735_v48 = vld [vmem:[%s5055_s3] sm:$0xf]  ;;  %v5211_v38 = vld [vmem:[#allocation58_spill] sm:$0xff] }
 0x28e   : > { %v2677_v20 = vmul.f32 %v2613_v53, %v2549_v5  ;;  %v2678_v1 = vmul.f32 %v2614_v22, %v2550_v50  ;;  %v3549_v56 = vpop.eup %3548  ;;  %v2166_v26 = vpack.c.bf16 %v5206_v27, %v5205_v58  ;;  %v2537_v55 = vunpack.c.l.bf16 %v4972_v35  ;;  %2739 = vst [vmem:[#allocation1] ss:$9 sm:$0xff] %v2735_v48 }
 0x28f   : > { %v2445_v17 = vadd.f32 1.0, %v2381_v49  ;;  %v2446_v36 = vadd.f32 1.0, %v2382_v34  ;;  %v2492_v61 = vpack.c.bf16 %v2442_v39, %v2441_v16  ;;  %v3551_v57 = vpop.eup %3550  ;;  %v2541_v9 = vunpack.c.l.bf16 %v4974_v40 }
 0x290   : > { %v2721_v3 = vpack.c.bf16 %v2677_v20, %v2673_v41  ;;  %v2722_v14 = vpack.c.bf16 %v2678_v1, %v2674_v59  ;;  %v2328_v28 = vpack.c.bf16 %v3551_v57, %v3549_v56  ;;  %v3553_v0 = vpop.eup %3552  ;;  %v2538_v33 = vunpack.c.h.bf16 %v4972_v35  ;;  %v5212_v20 = vld [vmem:[#allocation54_spill] sm:$0xff]  ;;  %v5213_v1 = vld [vmem:[#allocation55_spill] sm:$0xff] }
 0x291   : > { %v2494_v32 = vpack.c.bf16 %v2446_v36, %v2445_v17  ;;  %v2601_v12 = vunpack.c.l.bf16 %v2492_v61  ;;  %v2602_v5 = vunpack.c.h.bf16 %v2492_v61  ;;  %v2542_v54 = vunpack.c.h.bf16 %v4974_v40  ;;  %v3555_v42 = vpop.eup %3554  ;;  %v5214_v17 = vld [vmem:[#allocation59_spill] sm:$0xff] }
 0x292   : > { %v1432_v62 = vpack.c.bf16 %v1378_v15, %v1377_v44  ;;  %v1434_v50 = vpack.c.bf16 %v1382_v23, %v1381_v4  ;;  %v2201_v46 = vunpack.c.l.bf16 %v5207_v21  ;;  %v2369_v18 = vunpack.c.l.bf16 %v2328_v28  ;;  %v5208_v15 = vld [vmem:[#allocation62_spill] sm:$0xff]  ;;  %v5215_v23 = vld [vmem:[#allocation60_spill] sm:$0xff] }
 0x293   : > { %v2605_v10 = vunpack.c.l.bf16 %v2494_v32  ;;  %v2606_v30 = vunpack.c.h.bf16 %v2494_v32  ;;  %v2665_v24 = vmul.f32 %v2601_v12, %v2537_v55  ;;  %v2666_v7 = vmul.f32 %v2602_v5, %v2538_v33 }
 0x294   : > { %2777 = vmatpush.bf16.xpose.msra.mxu2 %v2721_v3  ;;  %2790 = vmatpush.bf16.xpose.msra.mxu3 %v2722_v14  ;;  %v2370_v13 = vunpack.c.h.bf16 %v2328_v28  ;;  %v2330_v25 = vpack.c.bf16 %v3555_v42, %v3553_v0  ;;  %v2202_v35 = vunpack.c.h.bf16 %v5207_v21  ;;  %v2433_v8 = vadd.f32 1.0, %v2369_v18 }
 0x295   : > { %v2669_v51 = vmul.f32 %v2605_v10, %v2541_v9  ;;  %v2670_v11 = vmul.f32 %v2606_v30, %v2542_v54  ;;  %v2205_v44 = vunpack.c.l.bf16 %v2166_v26  ;;  %v2206_v47 = vunpack.c.h.bf16 %v2166_v26  ;;  %v2740_v33 = vld [vmem:[#allocation1] sm:$0xff]  ;;  %v2741_v30 = vld [vmem:[#allocation1 + $0x9] sm:$0xff] }
 0x296   : > { %v2434_v40 = vadd.f32 1.0, %v2370_v13  ;;  %v2373_v6 = vunpack.c.l.bf16 %v2330_v25  ;;  %v2374_v31 = vunpack.c.h.bf16 %v2330_v25  ;;  %v2160_v60 = vpack.c.bf16 %v5209_v19, %v5208_v15  ;;  %2756 = vmatmul.bf16.vlgmr.msra.gmra.mxu0 %v2740_v33  ;;  %2769 = vmatmul.bf16.vlgmr.msra.gmra.mxu1 %v2741_v30  ;;  %v5216_v25 = vld [vmem:[#allocation48_spill] sm:$0xff]  ;;  %v5219_v15 = vld [vmem:[#allocation57_spill] sm:$0xff] }
 0x297   : > { %v2717_v37 = vpack.c.bf16 %v2669_v51, %v2665_v24  ;;  %v2718_v52 = vpack.c.bf16 %v2670_v11, %v2666_v7  ;;  %3556 = vtanh.f32 %v2201_v46  ;;  %v2162_v63 = vpack.c.bf16 %v5211_v38, %v5210_v29 }
 0x298   : > { %v2488_v2 = vpack.c.bf16 %v2434_v40, %v2433_v8  ;;  %v2437_v45 = vadd.f32 1.0, %v2373_v6  ;;  %v2438_v4 = vadd.f32 1.0, %v2374_v31  ;;  %3558 = vtanh.f32 %v2202_v35  ;;  %v5217_v8 = vld [vmem:[#allocation49_spill] sm:$0xff] }
 0x299   : > { %v2529_v53 = vunpack.c.l.bf16 %v1432_v62  ;;  %v2533_v41 = vunpack.c.l.bf16 %v1434_v50  ;;  %3560 = vtanh.f32 %v2205_v44  ;;  %v2530_v34 = vunpack.c.h.bf16 %v1432_v62  ;;  %v5218_v44 = vld [vmem:[#allocation56_spill] sm:$0xff] }
 0x29a   : > { %v2593_v22 = vunpack.c.l.bf16 %v2488_v2  ;;  %v2490_v49 = vpack.c.bf16 %v2438_v4, %v2437_v45  ;;  %v2594_v16 = vunpack.c.h.bf16 %v2488_v2  ;;  %3562 = vtanh.f32 %v2206_v47 }
 0x29b   : > { %v2534_v39 = vunpack.c.h.bf16 %v1434_v50  ;;  %v1369_v59 = vmul.f32 0.5, %v5212_v20  ;;  %v1370_v56 = vmul.f32 0.5, %v5213_v1  ;;  %v1373_v36 = vmul.f32 0.5, %v5214_v17 }
 0x29c   : > { %2778 = vmatpush.bf16.xpose.msra.mxu2 %v2717_v37  ;;  %2791 = vmatpush.bf16.xpose.msra.mxu3 %v2718_v52  ;;  %v2597_v61 = vunpack.c.l.bf16 %v2490_v49  ;;  %v2598_v43 = vunpack.c.h.bf16 %v2490_v49  ;;  %v1374_v57 = vmul.f32 0.5, %v5215_v23  ;;  %v2193_v58 = vunpack.c.l.bf16 %v2160_v60 }
 0x29d   : > { %v3557_v27 = vpop.eup %3556  ;;  %v2657_v26 = vmul.f32 %v2593_v22, %v2529_v53  ;;  %v2194_v3 = vunpack.c.h.bf16 %v2160_v60  ;;  %v2197_v14 = vunpack.c.l.bf16 %v2162_v63  ;;  %v2198_v55 = vunpack.c.h.bf16 %v2162_v63 }
 0x29e   : > { %v3559_v32 = vpop.eup %3558  ;;  %v2661_v12 = vmul.f32 %v2597_v61, %v2533_v41  ;;  %v2658_v5 = vmul.f32 %v2594_v16, %v2530_v34  ;;  %v2662_v28 = vmul.f32 %v2598_v43, %v2534_v39  ;;  %3564 = vtanh.f32 %v2193_v58 }
 0x29f   : > { %v3561_v0 = vpop.eup %3560  ;;  %v2324_v9 = vpack.c.bf16 %v3559_v32, %v3557_v27  ;;  %3566 = vtanh.f32 %v2194_v3  ;;  %v1428_v42 = vpack.c.bf16 %v1370_v56, %v1369_v59  ;;  %v1430_v24 = vpack.c.bf16 %v1374_v57, %v1373_v36 }
 0x2a0   : > { %v3563_v54 = vpop.eup %3562  ;;  %v2713_v62 = vpack.c.bf16 %v2661_v12, %v2657_v26  ;;  %v2714_v10 = vpack.c.bf16 %v2662_v28, %v2658_v5  ;;  %3568 = vtanh.f32 %v2197_v14  ;;  %v1361_v35 = vmul.f32 0.5, %v5216_v25 }
 0x2a1   : > { %v2326_v50 = vpack.c.bf16 %v3563_v54, %v3561_v0  ;;  %v2361_v21 = vunpack.c.l.bf16 %v2324_v9  ;;  %v2362_v46 = vunpack.c.h.bf16 %v2324_v9  ;;  %3570 = vtanh.f32 %v2198_v55 }
 0x2a2   : > { %v1362_v40 = vmul.f32 0.5, %v5217_v8  ;;  %v1365_v47 = vmul.f32 0.5, %v5218_v44  ;;  %v1366_v19 = vmul.f32 0.5, %v5219_v15  ;;  %v2521_v2 = vunpack.c.l.bf16 %v1428_v42 }
 0x2a3   : > { %v2365_v7 = vunpack.c.l.bf16 %v2326_v50  ;;  %v2366_v18 = vunpack.c.h.bf16 %v2326_v50  ;;  %v2425_v13 = vadd.f32 1.0, %v2361_v21  ;;  %v2426_v51 = vadd.f32 1.0, %v2362_v46 }
 0x2a4   : > { %2779 = vmatpush.bf16.xpose.msra.mxu2 %v2713_v62  ;;  %2792 = vmatpush.bf16.xpose.msra.mxu3 %v2714_v10  ;;  %v3565_v11 = vpop.eup %3564  ;;  %v2525_v48 = vunpack.c.l.bf16 %v1430_v24  ;;  %v2522_v4 = vunpack.c.h.bf16 %v1428_v42  ;;  %v2526_v41 = vunpack.c.h.bf16 %v1430_v24  ;;  %v1424_v20 = vpack.c.bf16 %v1362_v40, %v1361_v35  ;;  %v2742_v42 = vld [vmem:[#allocation1 + $0x12] sm:$0xff]  ;;  %v2743_v24 = vld [vmem:[#allocation1 + $0x1b] sm:$0xff] }
 0x2a5   : > { %v3567_v37 = vpop.eup %3566  ;;  %v2429_v52 = vadd.f32 1.0, %v2365_v7  ;;  %v2430_v6 = vadd.f32 1.0, %v2366_v18  ;;  %v2484_v31 = vpack.c.bf16 %v2426_v51, %v2425_v13  ;;  %v1426_v59 = vpack.c.bf16 %v1366_v19, %v1365_v47 }
 0x2a6   : > { %v3569_v60 = vpop.eup %3568  ;;  %v2320_v29 = vpack.c.bf16 %v3567_v37, %v3565_v11  ;;  %v2513_v5 = vunpack.c.l.bf16 %v1424_v20  ;;  %v2514_v9 = vunpack.c.h.bf16 %v1424_v20  ;;  %v2737_v11 = vstv %s2736_s12 }
 0x2a7   : > { %v3571_v38 = vpop.eup %3570  ;;  %v2486_v63 = vpack.c.bf16 %v2430_v6, %v2429_v52  ;;  %v2585_v45 = vunpack.c.l.bf16 %v2484_v31  ;;  %v2586_v53 = vunpack.c.h.bf16 %v2484_v31  ;;  %v2517_v28 = vunpack.c.l.bf16 %v1426_v59 }
 0x2a8   : > { %v2322_v22 = vpack.c.bf16 %v3571_v38, %v3569_v60  ;;  %v2353_v49 = vunpack.c.l.bf16 %v2320_v29  ;;  %v2354_v34 = vunpack.c.h.bf16 %v2320_v29  ;;  %v2518_v33 = vunpack.c.h.bf16 %v1426_v59 }
 0x2a9   : > { %v2589_v16 = vunpack.c.l.bf16 %v2486_v63  ;;  %v2590_v39 = vunpack.c.h.bf16 %v2486_v63  ;;  %v2649_v61 = vmul.f32 %v2585_v45, %v2521_v2  ;;  %v2650_v23 = vmul.f32 %v2586_v53, %v2522_v4 }
 0x2aa   : > { %v2357_v1 = vunpack.c.l.bf16 %v2322_v22  ;;  %v2358_v56 = vunpack.c.h.bf16 %v2322_v22  ;;  %v2417_v17 = vadd.f32 1.0, %v2353_v49  ;;  %v2418_v36 = vadd.f32 1.0, %v2354_v34  ;;  %v2818_v22 = vld [vmem:[%s339_s10] sm:$0x1]  ;;  %s3716_s10 = scalar_lea.hbm %s5059_s7, 2 }
 0x2ab   : > { %v2653_v43 = vmul.f32 %v2589_v16, %v2525_v48  ;;  %v2654_v57 = vmul.f32 %v2590_v39, %v2526_v41  ;;  %v2821_v49 = vld [vmem:[%s380_s25] sm:$0x1]  ;;  %p3718_p11 = scmp.lt.s32.totalorder %s3716_s10, %s3712_s18 }
 0x2ac   : > { %v2421_v58 = vadd.f32 1.0, %v2357_v1  ;;  %v2422_v27 = vadd.f32 1.0, %v2358_v56  ;;  %v2480_v26 = vpack.c.bf16 %v2418_v36, %v2417_v17 }
 0x2ad   : > { %v2709_v3 = vpack.c.bf16 %v2653_v43, %v2649_v61  ;;  %v2710_v14 = vpack.c.bf16 %v2654_v57, %v2650_v23  ;;  %p3719_p9 = por %p3718_p11, %p3717_p10 }
 0x2ae   : > { %v2482_v55 = vpack.c.bf16 %v2422_v27, %v2421_v58  ;;  %v2577_v32 = vunpack.c.l.bf16 %v2480_v26  ;;  %v2578_v12 = vunpack.c.h.bf16 %v2480_v26 }
 0x2af   : > { %2780 = vmatpush.bf16.xpose.msra.mxu2 %v2709_v3  ;;  %2793 = vmatpush.bf16.xpose.msra.mxu3 %v2710_v14  ;;  %p3720_p12 = pnand %p3719_p9, %p3715_p2 }
 0x2b0   : > { %v2581_v0 = vunpack.c.l.bf16 %v2482_v55  ;;  %v2582_v54 = vunpack.c.h.bf16 %v2482_v55  ;;  %v2641_v62 = vmul.f32 %v2577_v32, %v2513_v5  ;;  %v2642_v30 = vmul.f32 %v2578_v12, %v2514_v9 }
 0x2b2   : > { %v2645_v10 = vmul.f32 %v2581_v0, %v2517_v28  ;;  %v2646_v50 = vmul.f32 %v2582_v54, %v2518_v33 }
 0x2b4   : > { %v2705_v21 = vpack.c.bf16 %v2645_v10, %v2641_v62  ;;  %v2706_v46 = vpack.c.bf16 %v2646_v50, %v2642_v30 }
 0x2b7   : > { %2781 = vmatpush.bf16.xpose.msra.mxu2 %v2705_v21  ;;  %2794 = vmatpush.bf16.xpose.msra.mxu3 %v2706_v46 }
 0x2be   : > { %2782 = vmatmul.bf16.vlgmr.msra.gmra.mxu2 %v2742_v42  ;;  %2795 = vmatmul.bf16.vlgmr.msra.gmra.mxu3 %v2743_v24 }
 0x313   : > { %v2757_v7 = vpop.f32.mrf.mxu0  ;;  %v2770_v18 = vpop.f32.mrf.mxu1 }
 0x314   : > { %v2758_v25 = vadd.f32 %v2757_v7, %v2737_v11 }
 0x316   : > { %v2771_v35 = vadd.f32 %v2770_v18, %v2758_v25 }
 0x31b   : > { %v2759_v13 = vpop.f32.mrf.mxu0  ;;  %v2772_v51 = vpop.f32.mrf.mxu1 }
 0x341   : > { %v2783_v8 = vpop.f32.mrf.mxu2  ;;  %v2796_v40 = vpop.f32.mrf.mxu3 }
 0x342   : > { %v2784_v44 = vadd.f32 %v2783_v8, %v2771_v35 }
 0x344   : > { %v2797_v47 = vadd.f32 %v2796_v40, %v2784_v44 }
 0x346   : > { %v2800_v37 = vsub.f32 0.0, %v2797_v47 }
 0x348   : > { %v2801_v52 = vmul.f32 1.442695, %v2800_v37 }
 0x349   : > { %v2785_v6 = vpop.f32.mrf.mxu2  ;;  %v2798_v31 = vpop.f32.mrf.mxu3 }
 0x34a   : > { %3572 = vpow2.f32 %v2801_v52 }
 0x350   : > { %v3573_v15 = vpop.eup %3572 }
 0x351   : > { %v2803_v19 = vadd.f32 1.0, %v3573_v15 }
 0x353   : > { %3574 = vrcp.f32 %v2803_v19  ;;  %v2815_v29 = vand.u32 2147483648, %v2803_v19  ;;  %v2813_v63 = vand.u32 2147483647, %v2803_v19  ;;  %vm2809_vm1 = vweird.f32 %v2803_v19 }
 0x355   : > { %v2816_v4 = vor.u32 1.1754944e-38, %v2815_v29  ;;  %vm2814_vm3 = vcmp.eq.f32.partialorder %v2813_v63, 8.507059e+37 }
 0x359   : > { %v3575_v60 = vpop.eup %3574 }
 0x35a   : > { %v2805_v2 = vmul.f32 %v3575_v60, %v2803_v19  ;;  %vm2810_vm0 = vweird.f32 %v3575_v60 }
 0x35b   : > { %vm2811_vm2 = vmor %vm2809_vm1, %vm2810_vm0 }
 0x35c   : > { %v2806_v48 = vsub.f32 1.0, %v2805_v2 }
 0x35e   : > { %v2807_v38 = vmul.f32 %v3575_v60, %v2806_v48 }
 0x360   : > { %v2808_v45 = vadd.f32 %v3575_v60, %v2807_v38 }
 0x362   : > { %v2812_v53 = vsel %vm2811_vm2, %v3575_v60, %v2808_v45 }
 0x363   : > { %v2817_v41 = vsel %vm2814_vm3, %v2816_v4, %v2812_v53 }
 0x364   : > { %v2820_v34 = vsub.f32 1.0, %v2817_v41  ;;  %v2819_v16 = vmul.f32 %v2818_v22, %v2817_v41 }
 0x366   : > { %v2822_v39 = vmul.f32 %v2821_v49, %v2820_v34 }
 0x368   : > { %v2823_v20 = vadd.f32 %v2822_v39, %v2819_v16 }
 0x36a   : > { %2824 = vst [vmem:[%s376_s19] sm:$0x1] %v2823_v20 }
 0x36b   : > { %3723 = shalt.err (!%p3720_p12)
}
 0x36c   : > { %3380 = dma.vmem_to_hbm [thread:$0]  (%p3887_p3), %s2837_s2, 16, %s2839_s20, %s2826_s0  }
 0x36d PF: > { %s2850_s11 = sand.u32 1, %s3758_s26   ;;  %p5220_p13 = scmp.ge.s32.totalorder %s3770_s29, 2 }
 0x36e   : > { %s2851_s12 = scalar_lea.sflag [#allocation5], %s2850_s11 }
 0x36f   : > { %p3397_p0 = pnand %p5220_p13, %p3856_p6 }
 0x371   : > { %p3398_p5 = pneg %p3397_p0 }
 0x373   : > { %3753 = dma.done.wait (%p3398_p5), %s2851_s12, 16  }
 0x374   : > { %3755 = vsyncadd (%p3398_p5), %s2851_s12, 4294967280  ;;  %s5221_s14 = sld [smem:[#allocation16_spill]]  ;;  %p25_p7 = scmp.ge.s32.totalorder %s3877_s23, 4  }
 0x375   : > { %s5222_s26 = smov %s3762_s27  ;;  %s5223_s27 = smov %s3766_s28 }
 0x376   : > { %s5225_s29 = smov %s3877_s23  ;;  %27 = sbr.rel (!%p25_p7) target bundleno = 13 (0xd), region = 117 }
 0x37a   : > { %s5224_s28 = smov %s5221_s14 }
 0x37b   :  { %2856 = vsyncpa [#allocation4], 1 }
 0x37c   :  { %2858 = vsyncpa [#allocation4 + $0x1], 1 }
 0x37d   :  { %2859 = vsyncpa [#allocation7], 1 }
 0x37e   :  { %2860 = vsyncpa [#allocation10], 1 }
 0x37f   :  { %2862 = vsyncpa [#allocation10 + $0x1], 1 }
 0x380   :  { %2863 = vsyncpa [#allocation5], 1 }
 0x381   :  { %2865 = vsyncpa [#allocation5 + $0x1], 1 }

</bundles_post_ra>
